<compile_context>
chip_gen: v5e
topology: v5e:2x2
jax: 0.10.0
libtpu: 0.0.40
codegen_flags: <defaults>
</compile_context>

<pallas_src>
import jax
import jax.numpy as jnp
from jax.experimental import pallas as pl
from jax.experimental.pallas import tpu as pltpu

KSIZE = 7          # spatial-gate conv kernel size
PAD = (KSIZE - 1) // 2


def _sigmoid(x):
    # Numerically stable sigmoid; tanh goes to the EUP slot (essentially free).
    return 0.5 * (jnp.tanh(0.5 * x) + 1.0)


def cbam_kernel(x_ref, w1t_ref, b1_ref, w2t_ref, b2_ref, m_ref, cb_ref, o_ref):
    # x_ref block: (TB, C, HW) -- lane-dense (HW in lanes, C in sublanes).
    TB, C, HW = x_ref.shape
    inv_hw = 1.0 / HW
    inv_c = 1.0 / C

    xf = x_ref[...].astype(jnp.float32)                                  # (TB, C, HW)

    # ------------- Channel gate: global avg pool -> MLP -> sigmoid ----------
    avg = jnp.sum(xf, axis=-1) * inv_hw                                  # (TB, C)
    h = jnp.dot(avg, w1t_ref[...], preferred_element_type=jnp.float32) + b1_ref[...]
    h = jnp.maximum(h, 0.0)                                              # (TB, Ch)
    att = jnp.dot(h, w2t_ref[...], preferred_element_type=jnp.float32) + b2_ref[...]
    cscale = _sigmoid(att)                                               # (TB, C)

    # ------------- Channel-gated activations (shared by both consumers) -----
    # One VPU multiply; reused for the channel-mean below and for the output
    # epilogue, so no M=1 MXU dots / concatenates and only one extra multiply
    # at the end.
    g = xf * cscale[:, :, None]                                          # (TB, C, HW)

    # ------------- Spatial gate: channel mean -> 7x7 conv (+BN) -> sigmoid --
    xc = jnp.sum(g, axis=1) * inv_c                                      # (TB, HW) sublane reduce
    conv = jnp.dot(xc, m_ref[...], preferred_element_type=jnp.float32) + cb_ref[0]
    sscale = _sigmoid(conv)                                              # (TB, HW)

    # ------------- Fused gating epilogue (single streaming store) -----------
    # TODO(synk): for bf16 inputs on v6e/v7x the epilogue multiply/store could
    # stay in bf16 to halve vst/HBM-writeback pressure; kept in f32 here.
    o_ref[...] = (g * sscale[:, None, :]).astype(o_ref.dtype)


def _conv_as_matrix(conv_w, H, W):
    """Build M (H*W, H*W) s.t. flat_out = flat_in @ M equals a same-padded
    KSIZE x KSIZE cross-correlation with weights `conv_w` (7, 7)."""
    K = conv_w.shape[0]
    pad = (K - 1) // 2
    HW = H * W
    ho = jnp.arange(H).reshape(H, 1, 1, 1)
    wo = jnp.arange(W).reshape(1, W, 1, 1)
    dh = jnp.arange(K).reshape(1, 1, K, 1)
    dw = jnp.arange(K).reshape(1, 1, 1, K)
    hi = ho + dh - pad
    wi = wo + dw - pad
    valid = (hi >= 0) & (hi < H) & (wi >= 0) & (wi < W)
    in_idx = jnp.clip(hi, 0, H - 1) * W + jnp.clip(wi, 0, W - 1)       # (H,W,K,K)
    out_idx = jnp.broadcast_to(ho * W + wo, (H, W, K, K))
    vals = jnp.where(valid, conv_w.reshape(1, 1, K, K), 0.0).astype(jnp.float32)
    m = jnp.zeros((HW, HW), jnp.float32)
    m = m.at[in_idx.reshape(-1), out_idx.reshape(-1)].add(vals.reshape(-1))
    return m


def _chip_config():
    """Per-generation VMEM budget and megacore hint."""
    kind = ""
    try:
        kind = jax.devices()[0].device_kind.lower()
    except Exception:
        pass
    if "v7" in kind:
        # v7x: 64 MiB physical VMEM per TC, 2 TCs -> keep >=2 grid steps.
        return {"vmem_limit": 48 << 20, "multi_core": True}
    if "v5" in kind or "v6" in kind:
        # v5e / v6e: single TensorCore, 128 MiB physical VMEM.
        return {"vmem_limit": 64 << 20, "multi_core": False}
    # Unknown chip: be conservative on VMEM, assume single core.
    return {"vmem_limit": 48 << 20, "multi_core": False}


def _pick_block_b(B, C, HW, itemsize, vmem_limit, multi_core):
    """Largest batch-block that divides B and fits the VMEM budget.  On
    multi-core chips keep >=2 grid steps so the 'parallel' axis can shard."""
    per_img_io = C * HW * itemsize           # one x (or o) block per image
    per_img_tmp = C * HW * 4                 # f32 channel-gated intermediate g
    # 2x double-buffered input + 2x double-buffered output + ~2x f32 temps
    per_img_cost = 4 * per_img_io + 2 * per_img_tmp
    # double-buffered conv matrix + small params + headroom
    fixed = 2 * HW * HW * 4 + (1 << 20)
    budget = max(per_img_cost, int(vmem_limit * 0.75) - fixed)
    max_tb = max(1, budget // per_img_cost)
    best = 1
    for tb in range(1, B + 1):
        if B % tb != 0 or tb > max_tb:
            continue
        if multi_core and B >= 2 and B // tb < 2:
            continue
        best = tb
    return best
    # TODO(synk): non-divisor B falls back to small blocks; a ragged last
    # block via pl.cdiv + masking would avoid that.


def _build_call(B, C, HW, Ch, out_dtype, block_b, vmem_limit, single_buffer_consts):
    """Construct the pallas_call callable."""
    def const_spec(shape):
        nd = len(shape)
        if single_buffer_consts:
            return pl.BlockSpec(shape, lambda b: (0,) * nd,
                                pipeline_mode=pl.Buffered(1))
        return pl.BlockSpec(shape, lambda b: (0,) * nd)

    grid_spec = pltpu.PrefetchScalarGridSpec(
        num_scalar_prefetch=0,
        grid=(B // block_b,),
        in_specs=[
            pl.BlockSpec((block_b, C, HW), lambda b: (b, 0, 0)),   # x (lane-dense)
            const_spec((C, Ch)),                                   # W1^T
            const_spec((1, Ch)),                                   # b1
            const_spec((Ch, C)),                                   # W2^T
            const_spec((1, C)),                                    # b2
            const_spec((HW, HW)),                                  # conv as matrix
            pl.BlockSpec(memory_space=pltpu.MemorySpace.SMEM),     # conv bias (1,)
        ],
        out_specs=pl.BlockSpec((block_b, C, HW), lambda b: (b, 0, 0)),
    )
    return pl.pallas_call(
        cbam_kernel,
        out_shape=jax.ShapeDtypeStruct((B, C, HW), out_dtype),
        grid_spec=grid_spec,
        compiler_params=pltpu.CompilerParams(
            dimension_semantics=("parallel",),
            vmem_limit_bytes=vmem_limit),
    )


def cbam_prepare_params(w1, b1, w2, b2, conv_w, conv_b, H, W):
    """One-time parameter prep: transposed MLP weights, (1, n) biases, the 7x7
    conv folded into a dense (HW, HW) matrix, conv bias as an SMEM scalar.
    Cache the result and reuse across forward calls."""
    Ch, C = w1.shape
    return {
        "w1t": jnp.transpose(w1).astype(jnp.float32),     # (C, Ch)
        "b1": jnp.reshape(b1, (1, Ch)).astype(jnp.float32),
        "w2t": jnp.transpose(w2).astype(jnp.float32),     # (Ch, C)
        "b2": jnp.reshape(b2, (1, C)).astype(jnp.float32),
        "m": _conv_as_matrix(conv_w, H, W),               # (HW, HW)
        "conv_b": jnp.asarray(conv_b, jnp.float32).reshape(1),
        "H": H,
        "W": W,
    }


def cbam_forward(x, params, *, block_b=None):
    """CBAM forward.  x: (B, C, H, W); `params` from cbam_prepare_params."""
    B, C, H, W = x.shape
    HW = H * W
    Ch = params["w1t"].shape[1]
    assert params["H"] == H and params["W"] == W

    # Lane-dense view (last dim H*W), done once outside the kernel.
    x2 = x.reshape(B, C, HW)

    cfg = _chip_config()
    vmem_limit = cfg["vmem_limit"]
    if block_b is None:
        block_b = _pick_block_b(B, C, HW, jnp.dtype(x.dtype).itemsize,
                                vmem_limit, cfg["multi_core"])

    args = (x2, params["w1t"], params["b1"], params["w2t"], params["b2"],
            params["m"], params["conv_b"])

    # Prefer single-buffered constant parameter blocks; fall back to default
    # double buffering if this backend rejects pipeline_mode=Buffered(1).
    try:
        out2 = _build_call(B, C, HW, Ch, x.dtype, block_b, vmem_limit, True)(*args)
        out2 = jax.block_until_ready(out2)
    except Exception:
        out2 = _build_call(B, C, HW, Ch, x.dtype, block_b, vmem_limit, False)(*args)

    return out2.reshape(B, C, H, W)


def cbam_reference(x, w1, b1, w2, b2, conv_w, conv_b):
    """Pure-JAX reference matching the PyTorch forward (eval-mode BN folded)."""
    avg = x.mean(axis=(2, 3))                               # (B, C)
    h = jnp.maximum(avg @ w1.T + b1, 0.0)                   # (B, Ch)
    att = h @ w2.T + b2                                     # (B, C)
    cs = jax.nn.sigmoid(att)
    xcg = x * cs[:, :, None, None]
    xc = xcg.mean(axis=1, keepdims=True)                    # (B, 1, H, W)
    conv = jax.lax.conv_general_dilated(
        xc, conv_w[None, None, :, :], window_strides=(1, 1),
        padding=[(PAD, PAD), (PAD, PAD)]) + conv_b[0]
    ss = jax.nn.sigmoid(conv)
    return xcg * ss


if __name__ == "__main__":
    B, C, H, W = 2, 128, 16, 16          # gate_channels=128 (module default)
    reduction_ratio = 16
    Ch = C // reduction_ratio            # hidden width of the channel MLP

    key = jax.random.PRNGKey(0)
    k1, k2, k3, k4, k5, kx = jax.random.split(key, 6)

    # Deterministic synthetic parameters (PyTorch nn.Linear weight layout).
    w1 = jax.random.normal(k1, (Ch, C), jnp.float32) * 0.1
    b1 = jax.random.normal(k2, (Ch,), jnp.float32) * 0.1
    w2 = jax.random.normal(k3, (C, Ch), jnp.float32) * 0.1
    b2 = jax.random.normal(k4, (C,), jnp.float32) * 0.1

    # Spatial-gate 7x7 conv (bias=False) with BatchNorm2d folded in
    # (eval mode: gamma=1, beta=0, running_mean=0, running_var=1, eps=1e-5).
    conv_w_raw = jax.random.normal(k5, (KSIZE, KSIZE), jnp.float32) * 0.1
    bn_gamma, bn_beta, bn_mean, bn_var, bn_eps = 1.0, 0.0, 0.0, 1.0, 1e-5
    bn_scale = bn_gamma / jnp.sqrt(bn_var + bn_eps)
    conv_w = (conv_w_raw * bn_scale).astype(jnp.float32)
    conv_b = jnp.array([bn_beta - bn_mean * bn_scale], jnp.float32)

    x = jax.random.normal(kx, (B, C, H, W), jnp.float32)

    # Parameter prep is done once (outside the per-call path) and reused.
    params = cbam_prepare_params(w1, b1, w2, b2, conv_w, conv_b, H, W)

    out = jax.block_until_ready(cbam_forward(x, params))
    ref = cbam_reference(x, w1, b1, w2, b2, conv_w, conv_b)

    assert out.shape == (B, C, H, W)
    max_diff = jnp.max(jnp.abs(out - ref))
    assert jnp.allclose(out, ref, atol=1e-3, rtol=1e-3), f"max abs diff {max_diff}"

    print("KERNEL_OK")
</pallas_src>

<mosaic_0001>
module attributes {stable_mosaic.version = 11 : i64} {
  func.func @cbam_kernel(%arg0: i32, %arg1: memref<2x128x256xf32, #tpu.memory_space<vmem>>, %arg2: memref<128x8xf32, #tpu.memory_space<vmem>>, %arg3: memref<1x8xf32, #tpu.memory_space<vmem>>, %arg4: memref<8x128xf32, #tpu.memory_space<vmem>>, %arg5: memref<1x128xf32, #tpu.memory_space<vmem>>, %arg6: memref<256x256xf32, #tpu.memory_space<vmem>>, %arg7: memref<1xf32, #tpu.memory_space<smem>>, %arg8: memref<2x128x256xf32, #tpu.memory_space<vmem>>) attributes {dimension_semantics = [#tpu.dimension_semantics<parallel>], iteration_bounds = array<i64: 1>, scalar_prefetch = 0 : i64, scratch_operands = 0 : i64, tpu.core_type = #tpu.core_type<tc>, window_params = [{transform_indices = @transform_0, window_bounds = array<i64: 2, 128, 256>}, {pipeline_mode = #tpu.pipeline_mode<synchronous>, transform_indices = @transform_1, window_bounds = array<i64: 128, 8>}, {pipeline_mode = #tpu.pipeline_mode<synchronous>, transform_indices = @transform_2, window_bounds = array<i64: 1, 8>}, {pipeline_mode = #tpu.pipeline_mode<synchronous>, transform_indices = @transform_3, window_bounds = array<i64: 8, 128>}, {pipeline_mode = #tpu.pipeline_mode<synchronous>, transform_indices = @transform_4, window_bounds = array<i64: 1, 128>}, {pipeline_mode = #tpu.pipeline_mode<synchronous>, transform_indices = @transform_5, window_bounds = array<i64: 256, 256>}, {transform_indices = @transform_6, window_bounds = array<i64: 1>}, {transform_indices = @transform_7, window_bounds = array<i64: 2, 128, 256>}]} {
    %c0 = arith.constant 0 : index
    %c0_0 = arith.constant 0 : index
    %c0_1 = arith.constant 0 : index
    %0 = vector.load %arg1[%c0, %c0_0, %c0_1] : memref<2x128x256xf32, #tpu.memory_space<vmem>>, vector<2x128x256xf32>
    %cst = arith.constant dense<0.000000e+00> : vector<2x128xf32>
    %1 = vector.multi_reduction <add>, %0, %cst [2] : vector<2x128x256xf32> to vector<2x128xf32>
    %cst_2 = arith.constant 3.906250e-03 : f32
    %2 = vector.broadcast %cst_2 : f32 to vector<2x128xf32>
    %3 = arith.mulf %1, %2 : vector<2x128xf32>
    %c0_3 = arith.constant 0 : index
    %c0_4 = arith.constant 0 : index
    %4 = vector.load %arg2[%c0_3, %c0_4] : memref<128x8xf32, #tpu.memory_space<vmem>>, vector<128x8xf32>
    %cst_5 = arith.constant dense<0.000000e+00> : vector<2x8xf32>
    %5 = tpu.matmul %3, %4, %cst_5 {dimension_numbers = #tpu.dot_dimension_numbers<[1], [0], [0], [1], [0, 0, 1, 1], [], []>} : vector<2x128xf32>, vector<128x8xf32>, vector<2x8xf32> -> vector<2x8xf32>
    %c0_6 = arith.constant 0 : index
    %c0_7 = arith.constant 0 : index
    %6 = vector.load %arg3[%c0_6, %c0_7] : memref<1x8xf32, #tpu.memory_space<vmem>>, vector<1x8xf32>
    %7 = vector.broadcast %6 : vector<1x8xf32> to vector<2x8xf32>
    %8 = arith.addf %5, %7 : vector<2x8xf32>
    %cst_8 = arith.constant 0.000000e+00 : f32
    %9 = vector.broadcast %cst_8 : f32 to vector<2x8xf32>
    %10 = arith.maximumf %8, %9 : vector<2x8xf32>
    %c0_9 = arith.constant 0 : index
    %c0_10 = arith.constant 0 : index
    %11 = vector.load %arg4[%c0_9, %c0_10] : memref<8x128xf32, #tpu.memory_space<vmem>>, vector<8x128xf32>
    %cst_11 = arith.constant dense<0.000000e+00> : vector<2x128xf32>
    %12 = tpu.matmul %10, %11, %cst_11 {dimension_numbers = #tpu.dot_dimension_numbers<[1], [0], [0], [1], [0, 0, 1, 1], [], []>} : vector<2x8xf32>, vector<8x128xf32>, vector<2x128xf32> -> vector<2x128xf32>
    %c0_12 = arith.constant 0 : index
    %c0_13 = arith.constant 0 : index
    %13 = vector.load %arg5[%c0_12, %c0_13] : memref<1x128xf32, #tpu.memory_space<vmem>>, vector<1x128xf32>
    %14 = vector.broadcast %13 : vector<1x128xf32> to vector<2x128xf32>
    %15 = arith.addf %12, %14 : vector<2x128xf32>
    %cst_14 = arith.constant 5.000000e-01 : f32
    %16 = vector.broadcast %cst_14 : f32 to vector<2x128xf32>
    %17 = arith.mulf %16, %15 : vector<2x128xf32>
    %18 = math.tanh %17 : vector<2x128xf32>
    %cst_15 = arith.constant 1.000000e+00 : f32
    %19 = vector.broadcast %cst_15 : f32 to vector<2x128xf32>
    %20 = arith.addf %18, %19 : vector<2x128xf32>
    %cst_16 = arith.constant 5.000000e-01 : f32
    %21 = vector.broadcast %cst_16 : f32 to vector<2x128xf32>
    %22 = arith.mulf %21, %20 : vector<2x128xf32>
    %23 = vector.shape_cast %22 : vector<2x128xf32> to vector<2x128x1xf32>
    %24 = vector.broadcast %23 : vector<2x128x1xf32> to vector<2x128x256xf32>
    %25 = arith.mulf %0, %24 : vector<2x128x256xf32>
    %cst_17 = arith.constant dense<0.000000e+00> : vector<2x256xf32>
    %26 = vector.multi_reduction <add>, %25, %cst_17 [1] : vector<2x128x256xf32> to vector<2x256xf32>
    %cst_18 = arith.constant 7.812500e-03 : f32
    %27 = vector.broadcast %cst_18 : f32 to vector<2x256xf32>
    %28 = arith.mulf %26, %27 : vector<2x256xf32>
    %c0_19 = arith.constant 0 : index
    %c0_20 = arith.constant 0 : index
    %29 = vector.load %arg6[%c0_19, %c0_20] : memref<256x256xf32, #tpu.memory_space<vmem>>, vector<256x256xf32>
    %cst_21 = arith.constant dense<0.000000e+00> : vector<2x256xf32>
    %30 = tpu.matmul %28, %29, %cst_21 {dimension_numbers = #tpu.dot_dimension_numbers<[1], [0], [0], [1], [0, 0, 1, 1], [], []>} : vector<2x256xf32>, vector<256x256xf32>, vector<2x256xf32> -> vector<2x256xf32>
    %c0_22 = arith.constant 0 : index
    %31 = memref.load %arg7[%c0_22] : memref<1xf32, #tpu.memory_space<smem>>
    %32 = vector.broadcast %31 : f32 to vector<2x256xf32>
    %33 = arith.addf %30, %32 : vector<2x256xf32>
    %cst_23 = arith.constant 5.000000e-01 : f32
    %34 = vector.broadcast %cst_23 : f32 to vector<2x256xf32>
    %35 = arith.mulf %34, %33 : vector<2x256xf32>
    %36 = math.tanh %35 : vector<2x256xf32>
    %cst_24 = arith.constant 1.000000e+00 : f32
    %37 = vector.broadcast %cst_24 : f32 to vector<2x256xf32>
    %38 = arith.addf %36, %37 : vector<2x256xf32>
    %cst_25 = arith.constant 5.000000e-01 : f32
    %39 = vector.broadcast %cst_25 : f32 to vector<2x256xf32>
    %40 = arith.mulf %39, %38 : vector<2x256xf32>
    %41 = vector.shape_cast %40 : vector<2x256xf32> to vector<2x1x256xf32>
    %42 = vector.broadcast %41 : vector<2x1x256xf32> to vector<2x128x256xf32>
    %43 = arith.mulf %25, %42 : vector<2x128x256xf32>
    %c0_26 = arith.constant 0 : index
    %c0_27 = arith.constant 0 : index
    %c0_28 = arith.constant 0 : index
    %44 = vector.load %arg8[%c0_26, %c0_27, %c0_28] : memref<2x128x256xf32, #tpu.memory_space<vmem>>, vector<2x128x256xf32>
    tpu.vector_store %arg8[%c0_26, %c0_27, %c0_28], %43 {strides = array<i32>} : memref<2x128x256xf32, #tpu.memory_space<vmem>>, vector<2x128x256xf32>,
    return
  }
  func.func @transform_0(%arg0: i32) -> (i32, i32, i32) {
    %c0_i32 = arith.constant 0 : i32
    %c0_i32_0 = arith.constant 0 : i32
    %c0_i32_1 = arith.constant 0 : i32
    return %arg0, %c0_i32, %c0_i32_0 : i32, i32, i32
  }
  func.func @transform_1(%arg0: i32) -> (i32, i32) {
    %c0_i32 = arith.constant 0 : i32
    %c0_i32_0 = arith.constant 0 : i32
    %c0_i32_1 = arith.constant 0 : i32
    return %c0_i32, %c0_i32_0 : i32, i32
  }
  func.func @transform_2(%arg0: i32) -> (i32, i32) {
    %c0_i32 = arith.constant 0 : i32
    %c0_i32_0 = arith.constant 0 : i32
    %c0_i32_1 = arith.constant 0 : i32
    return %c0_i32, %c0_i32_0 : i32, i32
  }
  func.func @transform_3(%arg0: i32) -> (i32, i32) {
    %c0_i32 = arith.constant 0 : i32
    %c0_i32_0 = arith.constant 0 : i32
    %c0_i32_1 = arith.constant 0 : i32
    return %c0_i32, %c0_i32_0 : i32, i32
  }
  func.func @transform_4(%arg0: i32) -> (i32, i32) {
    %c0_i32 = arith.constant 0 : i32
    %c0_i32_0 = arith.constant 0 : i32
    %c0_i32_1 = arith.constant 0 : i32
    return %c0_i32, %c0_i32_0 : i32, i32
  }
  func.func @transform_5(%arg0: i32) -> (i32, i32) {
    %c0_i32 = arith.constant 0 : i32
    %c0_i32_0 = arith.constant 0 : i32
    %c0_i32_1 = arith.constant 0 : i32
    return %c0_i32, %c0_i32_0 : i32, i32
  }
  func.func @transform_6(%arg0: i32) -> i32 {
    %c0_i32 = arith.constant 0 : i32
    %c0_i32_0 = arith.constant 0 : i32
    return %c0_i32 : i32
  }
  func.func @transform_7(%arg0: i32) -> (i32, i32, i32) {
    %c0_i32 = arith.constant 0 : i32
    %c0_i32_0 = arith.constant 0 : i32
    %c0_i32_1 = arith.constant 0 : i32
    return %arg0, %c0_i32, %c0_i32_0 : i32, i32, i32
  }
}

module attributes {stable_mosaic.version = 11 : i64} {
  func.func @cbam_kernel(%arg0: i32, %arg1: memref<2x128x256xf32, #tpu.memory_space<vmem>>, %arg2: memref<128x8xf32, #tpu.memory_space<vmem>>, %arg3: memref<1x8xf32, #tpu.memory_space<vmem>>, %arg4: memref<8x128xf32, #tpu.memory_space<vmem>>, %arg5: memref<1x128xf32, #tpu.memory_space<vmem>>, %arg6: memref<256x256xf32, #tpu.memory_space<vmem>>, %arg7: memref<1xf32, #tpu.memory_space<smem>>, %arg8: memref<2x128x256xf32, #tpu.memory_space<vmem>>) attributes {dimension_semantics = [#tpu.dimension_semantics<parallel>], iteration_bounds = array<i64: 1>, scalar_prefetch = 0 : i64, scratch_operands = 0 : i64, tpu.core_type = #tpu.core_type<tc>, window_params = [{transform_indices = @transform_0, window_bounds = array<i64: 2, 128, 256>}, {pipeline_mode = #tpu.pipeline_mode<synchronous>, transform_indices = @transform_1, window_bounds = array<i64: 128, 8>}, {pipeline_mode = #tpu.pipeline_mode<synchronous>, transform_indices = @transform_2, window_bounds = array<i64: 1, 8>}, {pipeline_mode = #tpu.pipeline_mode<synchronous>, transform_indices = @transform_3, window_bounds = array<i64: 8, 128>}, {pipeline_mode = #tpu.pipeline_mode<synchronous>, transform_indices = @transform_4, window_bounds = array<i64: 1, 128>}, {pipeline_mode = #tpu.pipeline_mode<synchronous>, transform_indices = @transform_5, window_bounds = array<i64: 256, 256>}, {transform_indices = @transform_6, window_bounds = array<i64: 1>}, {transform_indices = @transform_7, window_bounds = array<i64: 2, 128, 256>}]} {
    %c0 = arith.constant 0 : index
    %c0_0 = arith.constant 0 : index
    %c0_1 = arith.constant 0 : index
    %0 = vector.load %arg1[%c0, %c0_0, %c0_1] : memref<2x128x256xf32, #tpu.memory_space<vmem>>, vector<2x128x256xf32>
    %cst = arith.constant dense<0.000000e+00> : vector<2x128xf32>
    %1 = vector.multi_reduction <add>, %0, %cst [2] : vector<2x128x256xf32> to vector<2x128xf32>
    %cst_2 = arith.constant 3.906250e-03 : f32
    %2 = vector.broadcast %cst_2 : f32 to vector<2x128xf32>
    %3 = arith.mulf %1, %2 : vector<2x128xf32>
    %c0_3 = arith.constant 0 : index
    %c0_4 = arith.constant 0 : index
    %4 = vector.load %arg2[%c0_3, %c0_4] : memref<128x8xf32, #tpu.memory_space<vmem>>, vector<128x8xf32>
    %cst_5 = arith.constant dense<0.000000e+00> : vector<2x8xf32>
    %5 = tpu.matmul %3, %4, %cst_5 {dimension_numbers = #tpu.dot_dimension_numbers<[1], [0], [0], [1], [0, 0, 1, 1], [], []>} : vector<2x128xf32>, vector<128x8xf32>, vector<2x8xf32> -> vector<2x8xf32>
    %c0_6 = arith.constant 0 : index
    %c0_7 = arith.constant 0 : index
    %6 = vector.load %arg3[%c0_6, %c0_7] : memref<1x8xf32, #tpu.memory_space<vmem>>, vector<1x8xf32>
    %7 = vector.broadcast %6 : vector<1x8xf32> to vector<2x8xf32>
    %8 = arith.addf %5, %7 : vector<2x8xf32>
    %cst_8 = arith.constant 0.000000e+00 : f32
    %9 = vector.broadcast %cst_8 : f32 to vector<2x8xf32>
    %10 = arith.maximumf %8, %9 : vector<2x8xf32>
    %c0_9 = arith.constant 0 : index
    %c0_10 = arith.constant 0 : index
    %11 = vector.load %arg4[%c0_9, %c0_10] : memref<8x128xf32, #tpu.memory_space<vmem>>, vector<8x128xf32>
    %cst_11 = arith.constant dense<0.000000e+00> : vector<2x128xf32>
    %12 = tpu.matmul %10, %11, %cst_11 {dimension_numbers = #tpu.dot_dimension_numbers<[1], [0], [0], [1], [0, 0, 1, 1], [], []>} : vector<2x8xf32>, vector<8x128xf32>, vector<2x128xf32> -> vector<2x128xf32>
    %c0_12 = arith.constant 0 : index
    %c0_13 = arith.constant 0 : index
    %13 = vector.load %arg5[%c0_12, %c0_13] : memref<1x128xf32, #tpu.memory_space<vmem>>, vector<1x128xf32>
    %14 = vector.broadcast %13 : vector<1x128xf32> to vector<2x128xf32>
    %15 = arith.addf %12, %14 : vector<2x128xf32>
    %cst_14 = arith.constant 5.000000e-01 : f32
    %16 = vector.broadcast %cst_14 : f32 to vector<2x128xf32>
    %17 = arith.mulf %16, %15 : vector<2x128xf32>
    %18 = math.tanh %17 : vector<2x128xf32>
    %cst_15 = arith.constant 1.000000e+00 : f32
    %19 = vector.broadcast %cst_15 : f32 to vector<2x128xf32>
    %20 = arith.addf %18, %19 : vector<2x128xf32>
    %cst_16 = arith.constant 5.000000e-01 : f32
    %21 = vector.broadcast %cst_16 : f32 to vector<2x128xf32>
    %22 = arith.mulf %21, %20 : vector<2x128xf32>
    %23 = vector.shape_cast %22 : vector<2x128xf32> to vector<2x128x1xf32>
    %24 = vector.broadcast %23 : vector<2x128x1xf32> to vector<2x128x256xf32>
    %25 = arith.mulf %0, %24 : vector<2x128x256xf32>
    %cst_17 = arith.constant dense<0.000000e+00> : vector<2x256xf32>
    %26 = vector.multi_reduction <add>, %25, %cst_17 [1] : vector<2x128x256xf32> to vector<2x256xf32>
    %cst_18 = arith.constant 7.812500e-03 : f32
    %27 = vector.broadcast %cst_18 : f32 to vector<2x256xf32>
    %28 = arith.mulf %26, %27 : vector<2x256xf32>
    %c0_19 = arith.constant 0 : index
    %c0_20 = arith.constant 0 : index
    %29 = vector.load %arg6[%c0_19, %c0_20] : memref<256x256xf32, #tpu.memory_space<vmem>>, vector<256x256xf32>
    %cst_21 = arith.constant dense<0.000000e+00> : vector<2x256xf32>
    %30 = tpu.matmul %28, %29, %cst_21 {dimension_numbers = #tpu.dot_dimension_numbers<[1], [0], [0], [1], [0, 0, 1, 1], [], []>} : vector<2x256xf32>, vector<256x256xf32>, vector<2x256xf32> -> vector<2x256xf32>
    %c0_22 = arith.constant 0 : index
    %31 = memref.load %arg7[%c0_22] : memref<1xf32, #tpu.memory_space<smem>>
    %32 = vector.broadcast %31 : f32 to vector<2x256xf32>
    %33 = arith.addf %30, %32 : vector<2x256xf32>
    %cst_23 = arith.constant 5.000000e-01 : f32
    %34 = vector.broadcast %cst_23 : f32 to vector<2x256xf32>
    %35 = arith.mulf %34, %33 : vector<2x256xf32>
    %36 = math.tanh %35 : vector<2x256xf32>
    %cst_24 = arith.constant 1.000000e+00 : f32
    %37 = vector.broadcast %cst_24 : f32 to vector<2x256xf32>
    %38 = arith.addf %36, %37 : vector<2x256xf32>
    %cst_25 = arith.constant 5.000000e-01 : f32
    %39 = vector.broadcast %cst_25 : f32 to vector<2x256xf32>
    %40 = arith.mulf %39, %38 : vector<2x256xf32>
    %41 = vector.shape_cast %40 : vector<2x256xf32> to vector<2x1x256xf32>
    %42 = vector.broadcast %41 : vector<2x1x256xf32> to vector<2x128x256xf32>
    %43 = arith.mulf %25, %42 : vector<2x128x256xf32>
    %c0_26 = arith.constant 0 : index
    %c0_27 = arith.constant 0 : index
    %c0_28 = arith.constant 0 : index
    %44 = vector.load %arg8[%c0_26, %c0_27, %c0_28] : memref<2x128x256xf32, #tpu.memory_space<vmem>>, vector<2x128x256xf32>
    tpu.vector_store %arg8[%c0_26, %c0_27, %c0_28], %43 {strides = array<i32>} : memref<2x128x256xf32, #tpu.memory_space<vmem>>, vector<2x128x256xf32>,
    return
  }
  func.func @transform_0(%arg0: i32) -> (i32, i32, i32) {
    %c0_i32 = arith.constant 0 : i32
    %c0_i32_0 = arith.constant 0 : i32
    %c0_i32_1 = arith.constant 0 : i32
    return %arg0, %c0_i32, %c0_i32_0 : i32, i32, i32
  }
  func.func @transform_1(%arg0: i32) -> (i32, i32) {
    %c0_i32 = arith.constant 0 : i32
    %c0_i32_0 = arith.constant 0 : i32
    %c0_i32_1 = arith.constant 0 : i32
    return %c0_i32, %c0_i32_0 : i32, i32
  }
  func.func @transform_2(%arg0: i32) -> (i32, i32) {
    %c0_i32 = arith.constant 0 : i32
    %c0_i32_0 = arith.constant 0 : i32
    %c0_i32_1 = arith.constant 0 : i32
    return %c0_i32, %c0_i32_0 : i32, i32
  }
  func.func @transform_3(%arg0: i32) -> (i32, i32) {
    %c0_i32 = arith.constant 0 : i32
    %c0_i32_0 = arith.constant 0 : i32
    %c0_i32_1 = arith.constant 0 : i32
    return %c0_i32, %c0_i32_0 : i32, i32
  }
  func.func @transform_4(%arg0: i32) -> (i32, i32) {
    %c0_i32 = arith.constant 0 : i32
    %c0_i32_0 = arith.constant 0 : i32
    %c0_i32_1 = arith.constant 0 : i32
    return %c0_i32, %c0_i32_0 : i32, i32
  }
  func.func @transform_5(%arg0: i32) -> (i32, i32) {
    %c0_i32 = arith.constant 0 : i32
    %c0_i32_0 = arith.constant 0 : i32
    %c0_i32_1 = arith.constant 0 : i32
    return %c0_i32, %c0_i32_0 : i32, i32
  }
  func.func @transform_6(%arg0: i32) -> i32 {
    %c0_i32 = arith.constant 0 : i32
    %c0_i32_0 = arith.constant 0 : i32
    return %c0_i32 : i32
  }
  func.func @transform_7(%arg0: i32) -> (i32, i32, i32) {
    %c0_i32 = arith.constant 0 : i32
    %c0_i32_0 = arith.constant 0 : i32
    %c0_i32_1 = arith.constant 0 : i32
    return %arg0, %c0_i32, %c0_i32_0 : i32, i32, i32
  }
}

</mosaic_0001>

<bundles_post_ra>
// kernel: tpu_custom_call.1
= control target key start
LH: loop header
LB: loop body
LE: loop exit
PB: predicated region body
PF: predicated region fallthrough
CT: control target
= control target key end

     0   :  { %13 = vsyncpa [#allocation4], 0  ;;  %s2064_s0 = inlined_call_operand.hbm [shape: f32[2,128,256], index: 0, kind: input, shape index: {}]   ;;  %s2065_s1 = inlined_call_operand.vmem [shape: f32[128,8], index: 1, kind: input, shape index: {}]   ;;  %s2066_s2 = inlined_call_operand.vmem [shape: f32[1,8], index: 2, kind: input, shape index: {}]   ;;  %s2067_s3 = inlined_call_operand.vmem [shape: f32[8,128], index: 3, kind: input, shape index: {}]   ;;  %s2068_s4 = inlined_call_operand.vmem [shape: f32[1,128], index: 4, kind: input, shape index: {}]   ;;  %s2069_s5 = inlined_call_operand.hbm [shape: f32[256,256], index: 5, kind: input, shape index: {}]   ;;  %s2070_s6 = inlined_call_operand.<no memory space> [shape: f32[1], index: 6, kind: input, shape index: {}]   ;;  %s2071_s7 = inlined_call_operand.hbm [shape: f32[2,128,256], index: 7, kind: output, shape index: {}]  }
   0x1   :  { %14 = vsyncpa [#allocation7], 0 }
   0x2   :  { %15 = vsyncpa [#allocation5], 0  ;;  %s20_s26 = sshll.u32 %s2064_s0, 4  ;;  %s1284_s27 = smov [#allocation3]   ;;  %s21_s26 = int_to_ptr.hbm [resolvable:$true] %s20_s26 }
   0x3   :  { %s22_s28 = sshll.u32 %s1284_s27, 4  ;;  %s41_s8 = sshll.u32 %s2069_s5, 4  ;;  %s23_s28 = int_to_ptr.vmem [resolvable:$true] %s22_s28  ;;  %s42_s8 = int_to_ptr.hbm [resolvable:$true] %s41_s8 }
   0x4   :  { %s1285_s9 = smov 256   ;;  %s1286_s10 = smov 16  }
   0x5   :  { %28 = dma.hbm_to_vmem [thread:$0]  %s21_s26, 8192, %s23_s28, [#allocation4], %s1285_s9, %s1285_s9, %s1286_s10  }
   0x6   :  { %s1287_s11 = smov [#allocation6]  }
   0x7   :  { %s43_s12 = sshll.u32 %s1287_s11, 4  ;;  %s44_s12 = int_to_ptr.vmem [resolvable:$true] %s43_s12 }
   0x8   :  { %49 = dma.hbm_to_vmem [thread:$0]  %s42_s8, 8192, %s44_s12, [#allocation7], %s1285_s9, %s1285_s9, %s1286_s10  }
   0x9   :  { %1278 = dma.done.wait [#allocation4], 8192  }
   0xa   :  { %1279 = vsyncadd [#allocation4], 4294959104 }
   0xb   :  { %1280 = dma.done.wait [#allocation7], 8192  }
   0xc   :  { %1281 = vsyncadd [#allocation7], 4294959104  ;;  %v1341_v0 = vld [vmem:[#allocation3 + $0x100] sm:$0xff]  ;;  %v1343_v1 = vld [vmem:[#allocation3 + $0x108] sm:$0xff]  ;;  %vm309_vm0 = vcmask 130112   ;;  %vm313_vm1 = vcmask 195712  }
   0xd   :  { %v1345_v2 = vld [vmem:[#allocation3] sm:$0xff]  ;;  %v172_v3 = vadd.f32 %v1343_v1, %v1341_v0  ;;  %v1349_v4 = vld [vmem:[#allocation3 + $0x8] sm:$0xff]  ;;  %v1359_v9 = vld [vmem:[#allocation3 + $0x110] sm:$0xff]  ;;  %vm317_vm2 = vcmask 261312   ;;  %vm321_vm3 = vcmask 326912   ;;  %vm325_vm4 = vcmask 392512  }
   0xe   :  { %v1351_v5 = vld [vmem:[#allocation3 + $0x20] sm:$0xff]  ;;  %v1353_v6 = vld [vmem:[#allocation3 + $0x28] sm:$0xff]  ;;  %v124_v7 = vadd.f32 %v1349_v4, %v1345_v2  ;;  %v1361_v10 = vld [vmem:[#allocation3 + $0x118] sm:$0xff]  ;;  %vm329_vm5 = vcmask 458112   ;;  %vm333_vm6 = vcmask 523712   ;;  %vm337_vm7 = vcmask 589312  }
   0xf   :  { %v130_v8 = vadd.f32 %v1353_v6, %v1351_v5  ;;  %173 = vadd.xlane.f32.xlu1 %v172_v3  ;;  %v1363_v11 = vld [vmem:[#allocation3 + $0x10] sm:$0xff]  ;;  %v1365_v12 = vld [vmem:[#allocation3 + $0x18] sm:$0xff]  ;;  %v1367_v13 = vld [vmem:[#allocation3 + $0x120] sm:$0xff]  ;;  %v175_v15 = vadd.f32 %v1361_v10, %v1359_v9  ;;  %vm341_vm8 = vcmask 654912   ;;  %vm345_vm9 = vcmask 720512   ;;  %s1112_s27 = sshll.u32 %s2071_s7, 4  ;;  %s1113_s27 = int_to_ptr.hbm [resolvable:$true] %s1112_s27 }
  0x10   :  { %125 = vadd.xlane.f32.xlu0 %v124_v7  ;;  %v1369_v14 = vld [vmem:[#allocation3 + $0x128] sm:$0xff]  ;;  %v127_v16 = vadd.f32 %v1365_v12, %v1363_v11  ;;  %v1377_v18 = vld [vmem:[#allocation3 + $0x130] sm:$0xff]  ;;  %v1379_v19 = vld [vmem:[#allocation3 + $0x138] sm:$0xff]  ;;  %vm349_vm10 = vcmask 786112   ;;  %vm353_vm11 = vcmask 851712   ;;  %vm357_vm12 = vcmask 917312  }
  0x11   :  { %131 = vadd.xlane.f32.xlu2 %v130_v8  ;;  %v178_v17 = vadd.f32 %v1369_v14, %v1367_v13  ;;  %v1381_v20 = vld [vmem:[#allocation3 + $0x30] sm:$0xff]  ;;  %v1383_v21 = vld [vmem:[#allocation3 + $0x38] sm:$0xff]  ;;  %v1385_v22 = vld [vmem:[#allocation3 + $0x40] sm:$0xff]  ;;  %v181_v24 = vadd.f32 %v1379_v19, %v1377_v18  ;;  %vm361_vm13 = vcmask 982912   ;;  %vm365_vm14 = vcmask 1048512  }
  0x12   :  { %v1387_v23 = vld [vmem:[#allocation3 + $0x48] sm:$0xff]  ;;  %v133_v25 = vadd.f32 %v1383_v21, %v1381_v20  ;;  %v1395_v27 = vld [vmem:[#allocation3 + $0x50] sm:$0xff]  ;;  %v1397_v28 = vld [vmem:[#allocation3 + $0x58] sm:$0xff]  ;;  %vm398_vm15 = vcmask 1041409  }
  0x13   :  { %v136_v26 = vadd.f32 %v1387_v23, %v1385_v22  ;;  %v1399_v29 = vld [vmem:[#allocation3 + $0x140] sm:$0xff]  ;;  %v1401_v30 = vld [vmem:[#allocation3 + $0x148] sm:$0xff]  ;;  %v1403_v31 = vld [vmem:[#allocation3 + $0x150] sm:$0xff]  ;;  %v139_v33 = vadd.f32 %v1397_v28, %v1395_v27 }
  0x14   :  { %2109 = vst [vmem:[#allocation12_spill] sm:$0xff] %v1401_v30  ;;  %v1405_v32 = vld [vmem:[#allocation3 + $0x158] sm:$0xff]  ;;  %v184_v34 = vadd.f32 %v1401_v30, %v1399_v29  ;;  %v104_v36 = vld [vmem:[#allocation3 + $0x160] sm:$0xff]  ;;  %v105_v37 = vld [vmem:[#allocation3 + $0x168] sm:$0xff] }
  0x15   :  { %2110 = vst [vmem:[#allocation13_spill] sm:$0xff] %v1403_v31  ;;  %v187_v35 = vadd.f32 %v1405_v32, %v1403_v31  ;;  %v1413_v38 = vld [vmem:[#allocation3 + $0x60] sm:$0xff]  ;;  %v1415_v39 = vld [vmem:[#allocation3 + $0x68] sm:$0xff]  ;;  %v1417_v40 = vld [vmem:[#allocation3 + $0x70] sm:$0xff]  ;;  %v190_v42 = vadd.f32 %v105_v37, %v104_v36 }
  0x16   :  { %2111 = vst [vmem:[#allocation14_spill] sm:$0xff] %v1405_v32  ;;  %v1419_v41 = vld [vmem:[#allocation3 + $0x78] sm:$0xff]  ;;  %v142_v43 = vadd.f32 %v1415_v39, %v1413_v38  ;;  %v1425_v45 = vld [vmem:[#allocation3 + $0x80] sm:$0xff]  ;;  %v1427_v46 = vld [vmem:[#allocation3 + $0x88] sm:$0xff] }
  0x17   :  { %176 = vadd.xlane.f32.xlu1 %v175_v15  ;;  %2112 = vst [vmem:[#allocation15_spill] sm:$0xff] %v1413_v38  ;;  %v145_v44 = vadd.f32 %v1419_v41, %v1417_v40  ;;  %v106_v47 = vld [vmem:[#allocation3 + $0x170] sm:$0xff]  ;;  %v107_v48 = vld [vmem:[#allocation3 + $0x178] sm:$0xff]  ;;  %v108_v49 = vld [vmem:[#allocation3 + $0x180] sm:$0xff]  ;;  %v148_v51 = vadd.f32 %v1427_v46, %v1425_v45 }
  0x18   :  { %128 = vadd.xlane.f32.xlu0 %v127_v16  ;;  %2113 = vst [vmem:[#allocation16_spill] sm:$0xff] %v1415_v39  ;;  %v109_v50 = vld [vmem:[#allocation3 + $0x188] sm:$0xff]  ;;  %v193_v52 = vadd.f32 %v107_v48, %v106_v47  ;;  %v110_v54 = vld [vmem:[#allocation3 + $0x190] sm:$0xff]  ;;  %v111_v55 = vld [vmem:[#allocation3 + $0x198] sm:$0xff] }
  0x19   :  { %179 = vadd.xlane.f32.xlu2 %v178_v17  ;;  %2114 = vst [vmem:[#allocation17_spill] sm:$0xff] %v1417_v40  ;;  %v196_v53 = vadd.f32 %v109_v50, %v108_v49  ;;  %v1431_v56 = vld [vmem:[#allocation3 + $0x90] sm:$0xff]  ;;  %v79_v57 = vld [vmem:[#allocation3 + $0x98] sm:$0xff]  ;;  %v80_v58 = vld [vmem:[#allocation3 + $0xa0] sm:$0xff]  ;;  %v199_v60 = vadd.f32 %v111_v55, %v110_v54 }
  0x1a   :  { %2115 = vst [vmem:[#allocation18_spill] sm:$0xff] %v1419_v41  ;;  %v81_v59 = vld [vmem:[#allocation3 + $0xa8] sm:$0xff]  ;;  %v151_v61 = vadd.f32 %v79_v57, %v1431_v56  ;;  %v82_v63 = vld [vmem:[#allocation3 + $0xb0] sm:$0xff]  ;;  %v83_v3 = vld [vmem:[#allocation3 + $0xb8] sm:$0xff] }
  0x1b   :  { %2116 = vst [vmem:[#allocation19_spill] sm:$0xff] %v1425_v45  ;;  %v154_v62 = vadd.f32 %v81_v59, %v80_v58  ;;  %v112_v7 = vld [vmem:[#allocation3 + $0x1a0] sm:$0xff]  ;;  %v113_v8 = vld [vmem:[#allocation3 + $0x1a8] sm:$0xff]  ;;  %v114_v15 = vld [vmem:[#allocation3 + $0x1b0] sm:$0xff]  ;;  %v157_v17 = vadd.f32 %v83_v3, %v82_v63 }
  0x1c   :  { %2117 = vst [vmem:[#allocation20_spill] sm:$0xff] %v1427_v46  ;;  %v115_v16 = vld [vmem:[#allocation3 + $0x1b8] sm:$0xff]  ;;  %v86_v36 = vld [vmem:[#allocation3 + $0xd0] sm:$0xff]  ;;  %v88_v47 = vld [vmem:[#allocation3 + $0xe0] sm:$0xff] }
  0x1d   :  { %2118 = vst [vmem:[#allocation21_spill] sm:$0xff] %v1431_v56  ;;  %v87_v37 = vld [vmem:[#allocation3 + $0xd8] sm:$0xff]  ;;  %v89_v48 = vld [vmem:[#allocation3 + $0xe8] sm:$0xff]  ;;  %v118_v49 = vld [vmem:[#allocation3 + $0x1d0] sm:$0xff] }
  0x1e   :  { %v119_v50 = vld [vmem:[#allocation3 + $0x1d8] sm:$0xff]  ;;  %v122_v57 = vld [vmem:[#allocation3 + $0x1f0] sm:$0xff] }
  0x1f   :  { %182 = vadd.xlane.f32.xlu1 %v181_v24  ;;  %v202_v24 = vadd.f32 %v113_v8, %v112_v7  ;;  %v211_v54 = vadd.f32 %v119_v50, %v118_v49  ;;  %v123_v58 = vld [vmem:[#allocation3 + $0x1f8] sm:$0xff]  ;;  %v90_v59 = vld [vmem:[#allocation3 + $0xf0] sm:$0xff]  ;;  %v261_v50 = vld [vmem:[%s2065_s1 + $0x48] sm:$0xff] }
  0x20   :  { %134 = vadd.xlane.f32.xlu0 %v133_v25  ;;  %v205_v25 = vadd.f32 %v115_v16, %v114_v15  ;;  %v262_v49 = vld [vmem:[%s2065_s1 + $0x50] sm:$0xff] }
  0x21   :  { %137 = vadd.xlane.f32.xlu2 %v136_v26  ;;  %v116_v26 = vld [vmem:[#allocation3 + $0x1c0] sm:$0xff] }
  0x27   :  { %140 = vadd.xlane.f32.xlu1 %v139_v33  ;;  %v117_v33 = vld [vmem:[#allocation3 + $0x1c8] sm:$0xff] }
  0x28   :  { %185 = vadd.xlane.f32.xlu0 %v184_v34  ;;  %v84_v34 = vld [vmem:[#allocation3 + $0xc0] sm:$0xff] }
  0x29   :  { %188 = vadd.xlane.f32.xlu2 %v187_v35  ;;  %v85_v35 = vld [vmem:[#allocation3 + $0xc8] sm:$0xff] }
  0x2f   :  { %191 = vadd.xlane.f32.xlu1 %v190_v42  ;;  %v208_v42 = vadd.f32 %v117_v33, %v116_v26  ;;  %v267_v26 = vld [vmem:[%s2065_s1 + $0x78] sm:$0xff] }
  0x30   :  { %143 = vadd.xlane.f32.xlu0 %v142_v43  ;;  %v160_v43 = vadd.f32 %v85_v35, %v84_v34  ;;  %401 = vmatpush.msra.mxu0 %v267_v26 }
  0x31   :  { %146 = vadd.xlane.f32.xlu2 %v145_v44  ;;  %v163_v44 = vadd.f32 %v87_v37, %v86_v36  ;;  %v266_v36 = vld [vmem:[%s2065_s1 + $0x70] sm:$0xff]  ;;  %v265_v37 = vld [vmem:[%s2065_s1 + $0x68] sm:$0xff] }
  0x32   :  { %402 = vmatpush.msra.mxu0 %v266_v36 }
  0x34   :  { %403 = vmatpush.msra.mxu0 %v265_v37 }
  0x37   :  { %149 = vadd.xlane.f32.xlu1 %v148_v51  ;;  %v120_v51 = vld [vmem:[#allocation3 + $0x1e0] sm:$0xff] }
  0x38   :  { %194 = vadd.xlane.f32.xlu0 %v193_v52  ;;  %v121_v52 = vld [vmem:[#allocation3 + $0x1e8] sm:$0xff] }
  0x39   :  { %197 = vadd.xlane.f32.xlu2 %v196_v53  ;;  %v166_v53 = vadd.f32 %v89_v48, %v88_v47  ;;  %v214_v55 = vadd.f32 %v121_v52, %v120_v51  ;;  %v260_v51 = vld [vmem:[%s2065_s1 + $0x40] sm:$0xff]  ;;  %v259_v52 = vld [vmem:[%s2065_s1 + $0x38] sm:$0xff] }
  0x3f   :  { %200 = vadd.xlane.f32.xlu1 %v199_v60  ;;  %v91_v60 = vld [vmem:[#allocation3 + $0xf8] sm:$0xff] }
  0x40   :  { %152 = vadd.xlane.f32.xlu0 %v151_v61  ;;  %v217_v61 = vadd.f32 %v123_v58, %v122_v57  ;;  %v258_v57 = vld [vmem:[%s2065_s1 + $0x30] sm:$0xff]  ;;  %v257_v58 = vld [vmem:[%s2065_s1 + $0x28] sm:$0xff] }
  0x41   :  { %155 = vadd.xlane.f32.xlu2 %v154_v62  ;;  %v169_v62 = vadd.f32 %v91_v60, %v90_v59  ;;  %v2072_v59 = vlaneseq  ;;  %v256_v60 = vld [vmem:[%s2065_s1 + $0x20] sm:$0xff] }
  0x43   :  { %v1498_v26 = vand.u32 127, %v2072_v59 }
  0x45   :  { %v319_v46 = vadd.s32 4294967264, %v1498_v26  ;;  %v331_v38 = vadd.s32 4294967240, %v1498_v26 }
  0x47   :  { %158 = vadd.xlane.f32.xlu1 %v157_v17 }
  0x48   :  { %203 = vadd.xlane.f32.xlu0 %v202_v24 }
  0x49   :  { %206 = vadd.xlane.f32.xlu2 %v205_v25 }
  0x4f   :  { %209 = vadd.xlane.f32.xlu1 %v208_v42  ;;  %v264_v42 = vld [vmem:[%s2065_s1 + $0x60] sm:$0xff] }
  0x50   :  { %161 = vadd.xlane.f32.xlu0 %v160_v43  ;;  %404 = vmatpush.msra.mxu0 %v264_v42  ;;  %v263_v43 = vld [vmem:[%s2065_s1 + $0x58] sm:$0xff]  ;;  %v254_v42 = vld [vmem:[%s2065_s1 + $0x10] sm:$0xff] }
  0x51   :  { %164 = vadd.xlane.f32.xlu2 %v163_v44 }
  0x52   :  { %405 = vmatpush.msra.mxu0 %v263_v43  ;;  %v307_v43 = vadd.s32 4294967288, %v1498_v26 }
  0x54   :  { %406 = vmatpush.msra.mxu0 %v262_v49 }
  0x56   :  { %407 = vmatpush.msra.mxu0 %v261_v50 }
  0x57   :  { %167 = vadd.xlane.f32.xlu1 %v166_v53 }
  0x58   :  { %212 = vadd.xlane.f32.xlu0 %v211_v54  ;;  %408 = vmatpush.msra.mxu0 %v260_v51  ;;  %v253_v51 = vld [vmem:[%s2065_s1 + $0x8] sm:$0xff] }
  0x59   :  { %215 = vadd.xlane.f32.xlu2 %v214_v55 }
  0x5a   :  { %409 = vmatpush.msra.mxu0 %v259_v52  ;;  %v252_v52 = vld [vmem:[%s2065_s1] sm:$0xff] }
  0x5c   :  { %410 = vmatpush.msra.mxu0 %v258_v57 }
  0x5e   :  { %411 = vmatpush.msra.mxu0 %v257_v58 }
  0x5f   :  { %218 = vadd.xlane.f32.xlu1 %v217_v61  ;;  %v255_v61 = vld [vmem:[%s2065_s1 + $0x18] sm:$0xff] }
  0x60   :  { %170 = vadd.xlane.f32.xlu0 %v169_v62  ;;  %412 = vmatpush.msra.mxu0 %v256_v60  ;;  %v311_v60 = vadd.s32 4294967280, %v1498_v26 }
  0x62   :  { %413 = vmatpush.msra.mxu0 %v255_v61  ;;  %v315_v61 = vadd.s32 4294967272, %v1498_v26 }
  0x64   :  { %414 = vmatpush.msra.mxu0 %v254_v42 }
  0x66   :  { %415 = vmatpush.msra.mxu0 %v253_v51 }
  0x68   :  { %416 = vmatpush.msra.mxu0 %v252_v52 }
  0x82   :  { %v174_v63 = vpop.xlane.xlu1 %173 }
  0x83   :  { %v126_v3 = vpop.xlane.xlu0 %125  ;;  %v236_v57 = vmul.f32 0.00390625, %v174_v63 }
  0x84   :  { %v1434_v7 = vpop.xlane.xlu2 %131  ;;  %v220_v58 = vmul.f32 0.00390625, %v126_v3 }
  0x85   :  { %v367_v63 = vperm.slane %v236_v57, %v1498_v26  ;;  %v222_v51 = vmul.f32 0.00390625, %v1434_v7 }
  0x86   :  { %v306_v3 = vperm.slane %v220_v58, %v1498_v26 }
  0x87   :  { %v312_v40 = vperm.slane %v222_v51, %v311_v60 }
  0x8a   :  { %v177_v8 = vpop.xlane.xlu1 %176 }
  0x8b   :  { %v129_v15 = vpop.xlane.xlu0 %128  ;;  %v237_v49 = vmul.f32 0.00390625, %v177_v8 }
  0x8c   :  { %v180_v16 = vpop.xlane.xlu2 %179  ;;  %v221_v50 = vmul.f32 0.00390625, %v129_v15 }
  0x8d   :  { %v368_v8 = vperm.slane %v237_v49, %v307_v43  ;;  %v238_v42 = vmul.f32 0.00390625, %v180_v16  ;;  %v323_v16 = vadd.s32 4294967256, %v1498_v26 }
  0x8e   :  { %v308_v15 = vperm.slane %v221_v50, %v307_v43 }
  0x8f   :  { %v370_v52 = vperm.slane %v238_v42, %v311_v60 }
  0x90   :  { %v310_v50 = vsel %vm309_vm0, %v308_v15, %v306_v3 }
  0x92   :  { %v183_v17 = vpop.xlane.xlu1 %182 }
  0x93   :  { %v135_v24 = vpop.xlane.xlu0 %134  ;;  %v239_v59 = vmul.f32 0.00390625, %v183_v17  ;;  %v327_v17 = vadd.s32 4294967248, %v1498_v26 }
  0x94   :  { %v1436_v25 = vpop.xlane.xlu2 %137  ;;  %v223_v56 = vmul.f32 0.00390625, %v135_v24  ;;  %v369_v24 = vsel %vm309_vm0, %v368_v8, %v367_v63  ;;  %v335_v8 = vadd.s32 4294967232, %v1498_v26  ;;  %vm427_vm0 = vcmask 64512  }
  0x95   :  { %v224_v57 = vmul.f32 0.00390625, %v1436_v25  ;;  %v372_v58 = vperm.slane %v239_v59, %v315_v61  ;;  %v371_v25 = vsel %vm313_vm1, %v370_v52, %v369_v24  ;;  %v347_v52 = vadd.s32 4294967208, %v1498_v26 }
  0x96   :  { %v316_v32 = vperm.slane %v223_v56, %v315_v61  ;;  %v314_v56 = vsel %vm313_vm1, %v312_v40, %v310_v50  ;;  %vm966_vm1 = vcmask 1040384  }
  0x9a   :  { %v1441_v33 = vpop.xlane.xlu1 %140 }
  0x9b   :  { %v1443_v34 = vpop.xlane.xlu0 %185  ;;  %v225_v7 = vmul.f32 0.00390625, %v1441_v33  ;;  %v320_v33 = vperm.slane %v224_v57, %v319_v46 }
  0x9c   :  { %v1445_v35 = vpop.xlane.xlu2 %188  ;;  %v240_v41 = vmul.f32 0.00390625, %v1443_v34 }
  0x9d   :  { %v241_v34 = vmul.f32 0.00390625, %v1445_v35  ;;  %v339_v35 = vadd.s32 4294967224, %v1498_v26 }
  0x9e   :  { %v374_v31 = vperm.slane %v240_v41, %v319_v46  ;;  %v373_v41 = vsel %vm317_vm2, %v372_v58, %v371_v25 }
  0x9f   :  { %v376_v59 = vperm.slane %v241_v34, %v323_v16 }
  0xa0   :  { %v375_v61 = vsel %vm321_vm3, %v374_v31, %v373_v41  ;;  %v343_v31 = vadd.s32 4294967216, %v1498_v26 }
  0xa2   :  { %v1459_v44 = vpop.xlane.xlu1 %191 }
  0xa3   :  { %v1461_v47 = vpop.xlane.xlu0 %143  ;;  %v242_v39 = vmul.f32 0.00390625, %v1459_v44  ;;  %v318_v44 = vsel %vm317_vm2, %v316_v32, %v314_v56  ;;  %v351_v56 = vadd.s32 4294967200, %v1498_v26 }
  0xa4   :  { %v1463_v48 = vpop.xlane.xlu2 %146  ;;  %v226_v30 = vmul.f32 0.00390625, %v1461_v47  ;;  %v324_v47 = vperm.slane %v225_v7, %v323_v16  ;;  %v322_v50 = vsel %vm321_vm3, %v320_v33, %v318_v44 }
  0xa5   :  { %v378_v42 = vperm.slane %v242_v39, %v327_v17  ;;  %v377_v39 = vsel %vm325_vm4, %v376_v59, %v375_v61 }
  0xa6   :  { %v328_v63 = vperm.slane %v226_v30, %v327_v17  ;;  %v326_v30 = vsel %vm325_vm4, %v324_v47, %v322_v50  ;;  %v355_v47 = vadd.s32 4294967192, %v1498_v26 }
  0xa8   :  { %v330_v17 = vsel %vm329_vm5, %v328_v63, %v326_v30 }
  0xaa   :  { %v1477_v53 = vpop.xlane.xlu1 %149 }
  0xab   :  { %v1479_v54 = vpop.xlane.xlu0 %194  ;;  %v228_v40 = vmul.f32 0.00390625, %v1477_v53  ;;  %v379_v53 = vsel %vm329_vm5, %v378_v42, %v377_v39  ;;  %v363_v39 = vadd.s32 4294967176, %v1498_v26 }
  0xac   :  { %v1481_v55 = vpop.xlane.xlu2 %197  ;;  %v243_v15 = vmul.f32 0.00390625, %v1479_v54  ;;  %v227_v54 = vmul.f32 0.00390625, %v1463_v48 }
  0xad   :  { %v244_v24 = vmul.f32 0.00390625, %v1481_v55  ;;  %v336_v57 = vperm.slane %v228_v40, %v335_v8 }
  0xae   :  { %v380_v46 = vperm.slane %v243_v15, %v331_v38  ;;  %v332_v55 = vperm.slane %v227_v54, %v331_v38 }
  0xaf   :  { %v382_v58 = vperm.slane %v244_v24, %v335_v8  ;;  %v359_v8 = vadd.s32 4294967184, %v1498_v26 }
  0xb0   :  { %v334_v38 = vsel %vm333_vm6, %v332_v55, %v330_v17 }
  0xb2   :  { %v1495_v62 = vpop.xlane.xlu1 %200 }
  0xb3   :  { %v1500_v36 = vpop.xlane.xlu0 %152  ;;  %v245_v32 = vmul.f32 0.00390625, %v1495_v62  ;;  %v381_v62 = vsel %vm333_vm6, %v380_v46, %v379_v53 }
  0xb4   :  { %v1502_v37 = vpop.xlane.xlu2 %155  ;;  %v229_v16 = vmul.f32 0.00390625, %v1500_v36 }
  0xb5   :  { %v230_v36 = vmul.f32 0.00390625, %v1502_v37  ;;  %v384_v7 = vperm.slane %v245_v32, %v339_v35 }
  0xb6   :  { %v340_v34 = vperm.slane %v229_v16, %v339_v35  ;;  %v338_v35 = vsel %vm337_vm7, %v336_v57, %v334_v38  ;;  %v422_v38 = vld [vmem:[%s2067_s3] sm:$0xff] }
  0xb7   :  { %446 = vmatpush.msra.mxu1 %v422_v38 }
  0xba   :  { %v1517_v45 = vpop.xlane.xlu1 %158 }
  0xbb   :  { %v204_v49 = vpop.xlane.xlu0 %203  ;;  %v231_v15 = vmul.f32 0.00390625, %v1517_v45  ;;  %v383_v45 = vsel %vm337_vm7, %v382_v58, %v381_v62 }
  0xbc   :  { %v207_v43 = vpop.xlane.xlu2 %206  ;;  %v246_v48 = vmul.f32 0.00390625, %v204_v49  ;;  %v385_v42 = vsel %vm341_vm8, %v384_v7, %v383_v45 }
  0xbd   :  { %v247_v25 = vmul.f32 0.00390625, %v207_v43  ;;  %v344_v43 = vperm.slane %v230_v36, %v343_v31  ;;  %v348_v63 = vperm.slane %v231_v15, %v347_v52 }
  0xbe   :  { %v386_v49 = vperm.slane %v246_v48, %v343_v31 }
  0xbf   :  { %v388_v54 = vperm.slane %v247_v25, %v347_v52 }
  0xc2   :  { %v210_v60 = vpop.xlane.xlu1 %209 }
  0xc3   :  { %v162_v3 = vpop.xlane.xlu0 %161  ;;  %v248_v33 = vmul.f32 0.00390625, %v210_v60  ;;  %v342_v60 = vsel %vm341_vm8, %v340_v34, %v338_v35 }
  0xc4   :  { %v165_v51 = vpop.xlane.xlu2 %164  ;;  %v232_v44 = vmul.f32 0.00390625, %v162_v3  ;;  %v387_v3 = vsel %vm345_vm9, %v386_v49, %v385_v42  ;;  %v346_v30 = vsel %vm345_vm9, %v344_v43, %v342_v60  ;;  %v1166_v43 = vld [vmem:[%s2068_s4] ss:$0 sm:$0xff] }
  0xc5   :  { %v390_v40 = vperm.slane %v248_v33, %v351_v56  ;;  %v233_v46 = vmul.f32 0.00390625, %v165_v51  ;;  %v389_v31 = vsel %vm349_vm10, %v388_v54, %v387_v3  ;;  %v350_v48 = vsel %vm349_vm10, %v348_v63, %v346_v30 }
  0xc6   :  { %v352_v50 = vperm.slane %v232_v44, %v351_v56  ;;  %v1165_v44 = vld [vmem:[%s2066_s2] ss:$0 sm:$0xff] }
  0xc7   :  { %v391_v53 = vsel %vm353_vm11, %v390_v40, %v389_v31  ;;  %v356_v17 = vperm.slane %v233_v46, %v355_v47 }
  0xc8   :  { %v354_v51 = vsel %vm353_vm11, %v352_v50, %v350_v48 }
  0xc9   :  { %v358_v15 = vsel %vm357_vm12, %v356_v17, %v354_v51 }
  0xca   :  { %v168_v41 = vpop.xlane.xlu1 %167 }
  0xcb   :  { %v213_v59 = vpop.xlane.xlu0 %212  ;;  %v234_v32 = vmul.f32 0.00390625, %v168_v41 }
  0xcc   :  { %v216_v37 = vpop.xlane.xlu2 %215  ;;  %v249_v61 = vmul.f32 0.00390625, %v213_v59 }
  0xcd   :  { %v250_v24 = vmul.f32 0.00390625, %v216_v37  ;;  %v360_v57 = vperm.slane %v234_v32, %v359_v8  ;;  %v2119_v37 = vlaneseq }
  0xce   :  { %v392_v16 = vperm.slane %v249_v61, %v355_v47 }
  0xcf   :  { %v394_v55 = vperm.slane %v250_v24, %v359_v8  ;;  %v362_v49 = vsel %vm361_vm13, %v360_v57, %v358_v15  ;;  %v1581_v35 = vshrl.u32 %v2119_v37, 7 }
  0xd0   :  { %v393_v62 = vsel %vm357_vm12, %v392_v16, %v391_v53 }
  0xd1   :  { %v395_v26 = vsel %vm361_vm13, %v394_v55, %v393_v62  ;;  %1134 = vset.pattern.permute.xlu1 %v1581_v35  ;;  %1132 = vset.pattern.permute.xlu2 %v1581_v35  ;;  %v464_v45 = vadd.s32 8, %v1581_v35  ;;  %v470_v24 = vadd.s32 16, %v1581_v35  ;;  %v482_v50 = vadd.s32 32, %v1581_v35 }
  0xd2   :  { %v219_v52 = vpop.xlane.xlu1 %218  ;;  %v476_v32 = vadd.s32 24, %v1581_v35  ;;  %v494_v16 = vadd.s32 48, %v1581_v35  ;;  %v488_v30 = vadd.s32 40, %v1581_v35  ;;  %v512_v31 = vadd.s32 72, %v1581_v35 }
  0xd3   :  { %v251_v58 = vmul.f32 0.00390625, %v219_v52  ;;  %v171_v36 = vpop.xlane.xlu0 %170  ;;  %1133 = vset.pattern.permute.xlu0 %v464_v45  ;;  %v500_v48 = vadd.s32 56, %v1581_v35  ;;  %v542_v53 = vadd.s32 112, %v1581_v35  ;;  %v506_v17 = vadd.s32 64, %v1581_v35 }
  0xd4   :  { %v235_v7 = vmul.f32 0.00390625, %v171_v36  ;;  %v518_v55 = vadd.s32 80, %v1581_v35  ;;  %v530_v52 = vadd.s32 96, %v1581_v35  ;;  %v548_v51 = vadd.s32 120, %v1581_v35 }
  0xd5   :  { %v396_v34 = vperm.slane %v251_v58, %v363_v39  ;;  %v536_v57 = vadd.s32 104, %v1581_v35 }
  0xd6   :  { %v364_v25 = vperm.slane %v235_v7, %v363_v39  ;;  %v524_v39 = vadd.s32 88, %v1581_v35 }
  0xd7   :  { %v397_v56 = vsel %vm365_vm14, %v396_v34, %v395_v26 }
  0xd8   :  { %v366_v33 = vsel %vm365_vm14, %v364_v25, %v362_v49 }
  0xd9   :  { %v399_v41 = vsel %vm398_vm15, %v397_v56, %v366_v33 }
  0xda   :  { %417 = vmatmul.f32.vlgmr.msra.gmra.mxu0 %v399_v41 }
 0x157   :  { %v418_v47 = vpop.f32.mrf.mxu0 }
 0x158   :  { %v419_v8 = vadd.f32 %v1165_v44, %v418_v47 }
 0x15a   :  { %v421_v59 = vmax.f32 %v419_v8, 0.0 }
 0x15c   :  { %1126 = vmatmul.msk.f32.vlgmr.msra.gmra.mxu1 %vm427_vm0, %v421_v59 }
 0x1d9   :  { %v448_v61 = vpop.f32.mrf.mxu1 }
 0x1da   :  { %v449_v42 = vadd.f32 %v1166_v43, %v448_v61  ;;  %v831_v43 = vld [vmem:[#allocation6 + $0xf0] sm:$0xff] }
 0x1db   :  { %v863_v61 = vld [vmem:[#allocation6 + $0x1f0] sm:$0xff]  ;;  %875 = vmatpush.msra.mxu2 %v831_v43 }
 0x1dc   :  { %v451_v60 = vmul.f32 0.5, %v449_v42  ;;  %v832_v42 = vld [vmem:[#allocation6 + $0xf8] sm:$0xff]  ;;  %895 = vmatpush.msra.mxu3 %v863_v61 }
 0x1dd   :  { %915 = vmatpush.msrb.mxu1 %v832_v42 }
 0x1de   :  { %1167 = vtanh.f32 %v451_v60 }
 0x1e4   :  { %v1168_v63 = vpop.eup %1167 }
 0x1e5   :  { %v453_v54 = vadd.f32 1.0, %v1168_v63 }
 0x1e7   :  { %v454_v3 = vmul.f32 0.5, %v453_v54 }
 0x1e9   :  { %v1589_v40 = vperm.slane %v454_v3, 0  ;;  %v1591_v46 = vperm.slane %v454_v3, 1  ;;  %v861_v3 = vld [vmem:[#allocation6 + $0x1e0] sm:$0xff] }
 0x1ea   :  { %896 = vmatpush.msra.mxu3 %v861_v3  ;;  %v822_v3 = vld [vmem:[#allocation6 + $0xa8] sm:$0xff] }
 0x1eb   :  { %557 = vperm.xlu1 %1134, %v1591_v46   ;;  %466 = vperm.xlu0 %1133, %v1589_v40  }
 0x1ec   :  { %460 = vperm.xlu2 %1132, %v1589_v40  }
 0x1f3   :  { %1137 = vset.pattern.permute.xlu1 %v470_v24  ;;  %1140 = vset.pattern.permute.xlu0 %v482_v50 }
 0x1f4   :  { %1135 = vset.pattern.permute.xlu2 %v464_v45 }
 0x1fb   :  { %569 = vperm.xlu1 %1137, %v1591_v46   ;;  %484 = vperm.xlu0 %1140, %v1589_v40  }
 0x1fc   :  { %563 = vperm.xlu2 %1135, %v1591_v46  }
 0x203   :  { %1139 = vset.pattern.permute.xlu1 %v476_v32  ;;  %1145 = vset.pattern.permute.xlu0 %v494_v16 }
 0x204   :  { %1136 = vset.pattern.permute.xlu2 %v470_v24 }
 0x20b   :  { %575 = vperm.xlu1 %1139, %v1591_v46   ;;  %593 = vperm.xlu0 %1145, %v1591_v46  }
 0x20c   :  { %472 = vperm.xlu2 %1136, %v1589_v40  }
 0x213   :  { %1142 = vset.pattern.permute.xlu1 %v488_v30  ;;  %1150 = vset.pattern.permute.xlu0 %v512_v31 }
 0x214   :  { %1138 = vset.pattern.permute.xlu2 %v476_v32 }
 0x21b   :  { %490 = vperm.xlu1 %1142, %v1589_v40   ;;  %514 = vperm.xlu0 %1150, %v1589_v40  }
 0x21c   :  { %478 = vperm.xlu2 %1138, %v1589_v40  }
 0x223   :  { %1144 = vset.pattern.permute.xlu1 %v494_v16  ;;  %1155 = vset.pattern.permute.xlu0 %v524_v39 }
 0x224   :  { %1141 = vset.pattern.permute.xlu2 %v482_v50 }
 0x22b   :  { %496 = vperm.xlu1 %1144, %v1589_v40   ;;  %623 = vperm.xlu0 %1155, %v1591_v46  }
 0x22c   :  { %581 = vperm.xlu2 %1141, %v1591_v46  }
 0x233   :  { %1147 = vset.pattern.permute.xlu1 %v500_v48  ;;  %1160 = vset.pattern.permute.xlu0 %v542_v53 }
 0x234   :  { %1143 = vset.pattern.permute.xlu2 %v488_v30 }
 0x23b   :  { %599 = vperm.xlu1 %1147, %v1591_v46   ;;  %544 = vperm.xlu0 %1160, %v1589_v40  }
 0x23c   :  { %587 = vperm.xlu2 %1143, %v1591_v46  }
 0x243   :  { %1149 = vset.pattern.permute.xlu1 %v506_v17  ;;  %1164 = vset.pattern.permute.xlu0 %v548_v51 }
 0x244   :  { %1146 = vset.pattern.permute.xlu2 %v500_v48  ;;  %v828_v48 = vld [vmem:[#allocation6 + $0xd8] sm:$0xff] }
 0x246   :  { %v461_v62 = vpop.permute.xlu2 %460 }
 0x247   :  { %v1664_v35 = vmul.f32 %v461_v62, %v1345_v2  ;;  %v1667_v60 = vmul.f32 %v461_v62, %v1349_v4  ;;  %v830_v4 = vld [vmem:[#allocation6 + $0xe8] sm:$0xff] }
 0x248   :  { %916 = vmatpush.msrb.mxu1 %v830_v4  ;;  %v2124_v4 = vld [vmem:[#allocation15_spill] sm:$0xff] }
 0x24a   :  { %917 = vmatpush.msrb.mxu1 %v828_v48  ;;  %v851_v48 = vld [vmem:[#allocation6 + $0x190] sm:$0xff] }
 0x24b   :  { %605 = vperm.xlu1 %1149, %v1591_v46  }
 0x24c   :  { %502 = vperm.xlu2 %1146, %v1589_v40  }
 0x253   :  { %1152 = vset.pattern.permute.xlu1 %v518_v55 }
 0x254   :  { %1148 = vset.pattern.permute.xlu2 %v506_v17 }
 0x256   :  { %v564_v58 = vpop.permute.xlu2 %563 }
 0x257   :  { %v1696_v30 = vmul.f32 %v564_v58, %v1359_v9  ;;  %v860_v9 = vld [vmem:[#allocation6 + $0x1d8] sm:$0xff] }
 0x25b   :  { %520 = vperm.xlu1 %1152, %v1589_v40  }
 0x25c   :  { %508 = vperm.xlu2 %1148, %v1589_v40  }
 0x25d   :  { %v558_v36 = vpop.permute.xlu1 %557  ;;  %v467_v44 = vpop.permute.xlu0 %466 }
 0x25e   :  { %v1658_v59 = vmul.f32 %v467_v44, %v1363_v11  ;;  %v1661_v37 = vmul.f32 %v467_v44, %v1365_v12  ;;  %v864_v11 = vld [vmem:[#allocation6 + $0x1f8] sm:$0xff]  ;;  %v829_v12 = vld [vmem:[#allocation6 + $0xe0] sm:$0xff]  ;;  %v1688_v50 = vmul.f32 %v558_v36, %v1341_v0  ;;  %v1691_v32 = vmul.f32 %v558_v36, %v1343_v1 }
 0x25f   :  { %935 = vmatpush.msrb.mxu0 %v864_v11  ;;  %876 = vmatpush.msra.mxu2 %v829_v12  ;;  %v1701_v0 = vmul.f32 %v564_v58, %v1361_v10  ;;  %v858_v58 = vld [vmem:[#allocation6 + $0x1c8] sm:$0xff]  ;;  %v824_v44 = vld [vmem:[#allocation6 + $0xb8] sm:$0xff]  ;;  %v821_v11 = vld [vmem:[#allocation6 + $0xa0] sm:$0xff] }
 0x260   :  { %v713_v2 = vadd.f32 %v1658_v59, %v1664_v35  ;;  %v755_v10 = vadd.f32 %v1696_v30, %v1688_v50  ;;  %v853_v12 = vld [vmem:[#allocation6 + $0x1a0] sm:$0xff] }
 0x263   :  { %1154 = vset.pattern.permute.xlu1 %v524_v39  ;;  %v859_v39 = vld [vmem:[#allocation6 + $0x1d0] sm:$0xff] }
 0x264   :  { %1151 = vset.pattern.permute.xlu2 %v512_v31  ;;  %v827_v31 = vld [vmem:[#allocation6 + $0xd0] sm:$0xff]  ;;  %897 = vmatpush.msra.mxu3 %v859_v39 }
 0x265   :  { %877 = vmatpush.msra.mxu2 %v827_v31  ;;  %v2127_v31 = vld [vmem:[#allocation16_spill] sm:$0xff] }
 0x266   :  { %v473_v7 = vpop.permute.xlu2 %472 }
 0x267   :  { %v1670_v63 = vmul.f32 %v473_v7, %v1351_v5  ;;  %v1673_v54 = vmul.f32 %v473_v7, %v1353_v6  ;;  %v734_v5 = vadd.f32 %v1661_v37, %v1667_v60 }
 0x26b   :  { %526 = vperm.xlu1 %1154, %v1589_v40  }
 0x26c   :  { %611 = vperm.xlu2 %1151, %v1591_v46  }
 0x26d   :  { %v570_v34 = vpop.permute.xlu1 %569  ;;  %v485_v45 = vpop.permute.xlu0 %484 }
 0x26e   :  { %v1704_v1 = vmul.f32 %v570_v34, %v1367_v13  ;;  %v776_v13 = vadd.f32 %v1701_v0, %v1691_v32  ;;  %v1722_v36 = vmul.f32 %v485_v45, %v1385_v22  ;;  %v1725_v7 = vmul.f32 %v485_v45, %v1387_v23  ;;  %v856_v23 = vld [vmem:[#allocation6 + $0x1b8] sm:$0xff] }
 0x270   :  { %v756_v43 = vadd.f32 %v755_v10, %v1704_v1  ;;  %v2131_v10 = vld [vmem:[#allocation14_spill] sm:$0xff] }
 0x273   :  { %1157 = vset.pattern.permute.xlu1 %v530_v52 }
 0x274   :  { %1153 = vset.pattern.permute.xlu2 %v518_v55 }
 0x276   :  { %v479_v15 = vpop.permute.xlu2 %478 }
 0x277   :  { %v1682_v6 = vmul.f32 %v479_v15, %v1381_v20  ;;  %v1685_v24 = vmul.f32 %v479_v15, %v1383_v21  ;;  %v714_v20 = vadd.f32 %v713_v2, %v1670_v63  ;;  %v735_v21 = vadd.f32 %v734_v5, %v1673_v54  ;;  %v823_v15 = vld [vmem:[#allocation6 + $0xb0] sm:$0xff] }
 0x279   :  { %v715_v17 = vadd.f32 %v714_v20, %v1682_v6  ;;  %v736_v55 = vadd.f32 %v735_v21, %v1685_v24  ;;  %v2125_v20 = vld [vmem:[#allocation12_spill] sm:$0xff] }
 0x27b   :  { %629 = vperm.xlu1 %1157, %v1591_v46   ;;  %v737_v45 = vadd.f32 %v736_v55, %v1725_v7  ;;  %v2128_v55 = vld [vmem:[#allocation13_spill] sm:$0xff] }
 0x27c   :  { %617 = vperm.xlu2 %1153, %v1591_v46  }
 0x27d   :  { %v1639_v25 = vpop.permute.xlu1 %575  ;;  %v1719_v62 = vpop.permute.xlu0 %593 }
 0x283   :  { %1159 = vset.pattern.permute.xlu1 %v536_v57 }
 0x284   :  { %1156 = vset.pattern.permute.xlu2 %v530_v52  ;;  %v825_v52 = vld [vmem:[#allocation6 + $0xc0] sm:$0xff] }
 0x285   :  { %878 = vmatpush.msra.mxu2 %v825_v52 }
 0x286   :  { %v1641_v26 = vpop.permute.xlu2 %581 }
 0x287   :  { %879 = vmatpush.msra.mxu2 %v823_v15  ;;  %v1748_v2 = vmul.f32 %v1641_v26, %v1399_v29  ;;  %v1759_v21 = vmul.f32 %v1641_v26, %v2125_v20  ;;  %v819_v29 = vld [vmem:[#allocation6 + $0x90] sm:$0xff]  ;;  %v852_v26 = vld [vmem:[#allocation6 + $0x198] sm:$0xff] }
 0x288   :  { %v816_v20 = vld [vmem:[#allocation6 + $0x78] sm:$0xff] }
 0x289   :  { %2123 = vst [vmem:[#allocation25_spill] sm:$0xff] %v1748_v2  ;;  %880 = vmatpush.msra.mxu2 %v821_v11  ;;  %v2134_v11 = vld [vmem:[#allocation19_spill] sm:$0xff] }
 0x28a   :  { %2126 = vst [vmem:[#allocation15_spill] sm:$0xff] %v1759_v21 }
 0x28b   :  { %635 = vperm.xlu1 %1159, %v1591_v46   ;;  %881 = vmatpush.msra.mxu2 %v819_v29 }
 0x28c   :  { %532 = vperm.xlu2 %1156, %v1589_v40  }
 0x28d   :  { %v1643_v49 = vpop.permute.xlu1 %490 }
 0x28e   :  { %v1735_v22 = vmul.f32 %v1643_v49, %v1395_v27 }
 0x293   :  { %1162 = vset.pattern.permute.xlu1 %v548_v51 }
 0x294   :  { %1158 = vset.pattern.permute.xlu2 %v536_v57  ;;  %v826_v57 = vld [vmem:[#allocation6 + $0xc8] sm:$0xff] }
 0x295   :  { %918 = vmatpush.msrb.mxu1 %v826_v57 }
 0x296   :  { %v1645_v56 = vpop.permute.xlu2 %587 }
 0x297   :  { %919 = vmatpush.msrb.mxu1 %v824_v44  ;;  %v1768_v52 = vmul.f32 %v1645_v56, %v2128_v55  ;;  %v849_v44 = vld [vmem:[#allocation6 + $0x180] sm:$0xff] }
 0x299   :  { %920 = vmatpush.msrb.mxu1 %v822_v3  ;;  %2129 = vst [vmem:[#allocation12_spill] sm:$0xff] %v1768_v52  ;;  %v2135_v3 = vld [vmem:[#allocation20_spill] sm:$0xff] }
 0x29b   :  { %550 = vperm.xlu1 %1162, %v1589_v40  }
 0x29c   :  { %538 = vperm.xlu2 %1158, %v1589_v40  }
 0x29d   :  { %v1647_v33 = vpop.permute.xlu1 %496 }
 0x29e   :  { %v1763_v39 = vmul.f32 %v1647_v33, %v2127_v31 }
 0x2a4   :  { %1161 = vset.pattern.permute.xlu2 %v542_v53  ;;  %v1707_v53 = vmul.f32 %v570_v34, %v1369_v14  ;;  %v1717_v14 = vmul.f32 %v1639_v25, %v1377_v18  ;;  %v1729_v34 = vmul.f32 %v1639_v25, %v1379_v19  ;;  %v855_v18 = vld [vmem:[#allocation6 + $0x1b0] sm:$0xff]  ;;  %v1741_v19 = vmul.f32 %v1643_v49, %v1397_v28  ;;  %v854_v49 = vld [vmem:[#allocation6 + $0x1a8] sm:$0xff] }
 0x2a5   :  { %v716_v25 = vadd.f32 %v715_v17, %v1722_v36 }
 0x2a6   :  { %v1649_v41 = vpop.permute.xlu2 %502  ;;  %2120 = vst [vmem:[#allocation22_spill] sm:$0xff] %v1707_v53  ;;  %v777_v61 = vadd.f32 %v776_v13, %v1707_v53  ;;  %v757_v27 = vadd.f32 %v756_v43, %v1717_v14  ;;  %v1777_v13 = vmul.f32 %v1645_v56, %v2131_v10  ;;  %v818_v43 = vld [vmem:[#allocation6 + $0x88] sm:$0xff] }
 0x2a7   :  { %2121 = vst [vmem:[#allocation23_spill] sm:$0xff] %v1717_v14  ;;  %v717_v17 = vadd.f32 %v716_v25, %v1735_v22  ;;  %v850_v56 = vld [vmem:[#allocation6 + $0x188] sm:$0xff] }
 0x2a8   :  { %2122 = vst [vmem:[#allocation24_spill] sm:$0xff] %v1729_v34  ;;  %v778_v5 = vadd.f32 %v777_v61, %v1729_v34  ;;  %v758_v61 = vadd.f32 %v757_v27, %v1748_v2  ;;  %v815_v27 = vld [vmem:[#allocation6 + $0x70] sm:$0xff]  ;;  %v1174_v10 = vld [vmem:[#allocation3 + $0x168] sm:$0xff] }
 0x2a9   :  { %2132 = vst [vmem:[#allocation16_spill] sm:$0xff] %v1777_v13 }
 0x2aa   :  { %v759_v31 = vadd.f32 %v758_v61, %v1768_v52  ;;  %v1189_v52 = vld [vmem:[#allocation3 + $0xd8] sm:$0xff] }
 0x2ac   :  { %641 = vperm.xlu2 %1161, %v1591_v46  }
 0x2ad   :  { %v1651_v38 = vpop.permute.xlu1 %599 }
 0x2b4   :  { %1163 = vset.pattern.permute.xlu2 %v548_v51  ;;  %v857_v51 = vld [vmem:[#allocation6 + $0x1c0] sm:$0xff] }
 0x2b5   :  { %898 = vmatpush.msra.mxu3 %v857_v51  ;;  %v2130_v51 = vld [vmem:[#allocation17_spill] sm:$0xff] }
 0x2b6   :  { %v1653_v47 = vpop.permute.xlu2 %508  ;;  %v1772_v57 = vmul.f32 %v1649_v41, %v2130_v51  ;;  %v813_v51 = vld [vmem:[#allocation6 + $0x60] sm:$0xff] }
 0x2b7   :  { %899 = vmatpush.msra.mxu3 %v855_v18  ;;  %v817_v18 = vld [vmem:[#allocation6 + $0x80] sm:$0xff] }
 0x2b8   :  { %882 = vmatpush.msra.mxu2 %v817_v18  ;;  %v1175_v18 = vld [vmem:[#allocation3 + $0x170] sm:$0xff] }
 0x2b9   :  { %900 = vmatpush.msra.mxu3 %v853_v12 }
 0x2ba   :  { %883 = vmatpush.msra.mxu2 %v815_v27  ;;  %v843_v27 = vld [vmem:[#allocation6 + $0x150] sm:$0xff] }
 0x2bb   :  { %901 = vmatpush.msra.mxu3 %v851_v48 }
 0x2bc   :  { %647 = vperm.xlu2 %1163, %v1591_v46   ;;  %v862_v46 = vld [vmem:[#allocation6 + $0x1e8] sm:$0xff]  ;;  %884 = vmatpush.msra.mxu2 %v813_v51 }
 0x2bd   :  { %v1655_v8 = vpop.permute.xlu1 %605  ;;  %936 = vmatpush.msrb.mxu0 %v862_v46  ;;  %v1752_v46 = vmul.f32 %v1647_v33, %v2124_v4  ;;  %v738_v33 = vadd.f32 %v737_v45, %v1741_v19  ;;  %v1787_v45 = vmul.f32 %v1653_v47, %v2134_v11  ;;  %902 = vmatpush.msra.mxu3 %v849_v44  ;;  %v2139_v11 = vld [vmem:[#allocation21_spill] sm:$0xff] }
 0x2be   :  { %v1793_v4 = vmul.f32 %v1653_v47, %v2135_v3  ;;  %v1808_v44 = vmul.f32 %v1175_v18, %v1651_v38  ;;  %v811_v3 = vld [vmem:[#allocation6 + $0x50] sm:$0xff] }
 0x2bf   :  { %937 = vmatpush.msrb.mxu0 %v860_v9  ;;  %v820_v9 = vld [vmem:[#allocation6 + $0x98] sm:$0xff]  ;;  %v718_v25 = vadd.f32 %v717_v17, %v1752_v46  ;;  %v739_v12 = vadd.f32 %v738_v33, %v1763_v39  ;;  %v814_v33 = vld [vmem:[#allocation6 + $0x68] sm:$0xff]  ;;  %885 = vmatpush.msra.mxu2 %v811_v3 }
 0x2c0   :  { %921 = vmatpush.msrb.mxu1 %v820_v9  ;;  %v1173_v9 = vld [vmem:[#allocation3 + $0x160] sm:$0xff]  ;;  %2138 = vst [vmem:[#allocation14_spill] sm:$0xff] %v1808_v44 }
 0x2c1   :  { %938 = vmatpush.msrb.mxu0 %v858_v58  ;;  %v2133_v58 = vld [vmem:[#allocation18_spill] sm:$0xff]  ;;  %v719_v29 = vadd.f32 %v718_v25, %v1772_v57  ;;  %v1800_v17 = vmul.f32 %v1173_v9, %v1719_v62  ;;  %v846_v25 = vld [vmem:[#allocation6 + $0x168] sm:$0xff]  ;;  %v1178_v9 = vld [vmem:[#allocation3 + $0xa0] sm:$0xff] }
 0x2c2   :  { %v1781_v15 = vmul.f32 %v1649_v41, %v2133_v58  ;;  %v779_v41 = vadd.f32 %v778_v5, %v1759_v21  ;;  %922 = vmatpush.msrb.mxu1 %v818_v43  ;;  %v848_v5 = vld [vmem:[#allocation6 + $0x178] sm:$0xff]  ;;  %v1805_v58 = vmul.f32 %v1174_v10, %v1719_v62  ;;  %v1180_v10 = vld [vmem:[#allocation3 + $0xa8] sm:$0xff]  ;;  %v1190_v21 = vld [vmem:[#allocation3 + $0x1a0] sm:$0xff] }
 0x2c3   :  { %939 = vmatpush.msrb.mxu0 %v856_v23  ;;  %v515_v23 = vpop.permute.xlu0 %514  ;;  %2136 = vst [vmem:[#allocation13_spill] sm:$0xff] %v1800_v17  ;;  %v720_v43 = vadd.f32 %v719_v29, %v1787_v45  ;;  %v1177_v29 = vld [vmem:[#allocation3 + $0x180] sm:$0xff] }
 0x2c4   :  { %v780_v47 = vadd.f32 %v779_v41, %v1777_v13  ;;  %v740_v55 = vadd.f32 %v739_v12, %v1781_v15  ;;  %923 = vmatpush.msrb.mxu1 %v816_v20  ;;  %2137 = vst [vmem:[#allocation17_spill] sm:$0xff] %v1805_v58  ;;  %v1176_v41 = vld [vmem:[#allocation3 + $0x178] sm:$0xff]  ;;  %v760_v20 = vadd.f32 %v759_v31, %v1800_v17  ;;  %v809_v31 = vld [vmem:[#allocation6 + $0x40] sm:$0xff]  ;;  %v1185_v17 = vld [vmem:[#allocation3 + $0xc8] sm:$0xff] }
 0x2c5   :  { %940 = vmatpush.msrb.mxu0 %v854_v49  ;;  %v847_v49 = vld [vmem:[#allocation6 + $0x170] sm:$0xff]  ;;  %v1817_v12 = vmul.f32 %v1176_v41, %v1651_v38  ;;  %v844_v38 = vld [vmem:[#allocation6 + $0x158] sm:$0xff]  ;;  %886 = vmatpush.msra.mxu2 %v809_v31 }
 0x2c6   :  { %v1677_v40 = vpop.permute.xlu2 %611  ;;  %903 = vmatpush.msra.mxu3 %v847_v49  ;;  %v741_v62 = vadd.f32 %v740_v55, %v1793_v4  ;;  %924 = vmatpush.msrb.mxu1 %v814_v33  ;;  %v812_v49 = vld [vmem:[#allocation6 + $0x58] sm:$0xff]  ;;  %v781_v33 = vadd.f32 %v780_v47, %v1805_v58  ;;  %v761_v3 = vadd.f32 %v760_v20, %v1808_v44  ;;  %v842_v47 = vld [vmem:[#allocation6 + $0x148] sm:$0xff]  ;;  %v805_v44 = vld [vmem:[#allocation6 + $0x20] sm:$0xff] }
 0x2c7   :  { %941 = vmatpush.msrb.mxu0 %v852_v26  ;;  %v845_v26 = vld [vmem:[#allocation6 + $0x160] sm:$0xff]  ;;  %2140 = vst [vmem:[#allocation18_spill] sm:$0xff] %v1817_v12  ;;  %v840_v20 = vld [vmem:[#allocation6 + $0x138] sm:$0xff] }
 0x2c8   :  { %904 = vmatpush.msra.mxu3 %v845_v26  ;;  %v1179_v26 = vld [vmem:[#allocation3 + $0x98] sm:$0xff]  ;;  %925 = vmatpush.msrb.mxu1 %v812_v49  ;;  %v782_v49 = vadd.f32 %v781_v33, %v1817_v12  ;;  %v806_v12 = vld [vmem:[#allocation6 + $0x28] sm:$0xff] }
 0x2c9   :  { %942 = vmatpush.msrb.mxu0 %v850_v56  ;;  %v1814_v56 = vmul.f32 %v515_v23, %v2139_v11  ;;  %v1827_v55 = vmul.f32 %v1179_v26, %v515_v23  ;;  %v810_v11 = vld [vmem:[#allocation6 + $0x48] sm:$0xff]  ;;  %v1182_v26 = vld [vmem:[#allocation3 + $0xb8] sm:$0xff] }
 0x2ca   :  { %905 = vmatpush.msra.mxu3 %v843_v27  ;;  %926 = vmatpush.msrb.mxu1 %v810_v11 }
 0x2cb   :  { %943 = vmatpush.msrb.mxu0 %v848_v5  ;;  %v1822_v5 = vmul.f32 %v1177_v29, %v1655_v8  ;;  %v1833_v41 = vpop.permute.xlu0 %623  ;;  %v721_v27 = vadd.f32 %v720_v43, %v1814_v56  ;;  %v1181_v29 = vld [vmem:[#allocation3 + $0xb0] sm:$0xff]  ;;  %v808_v43 = vld [vmem:[#allocation6 + $0x38] sm:$0xff] }
 0x2cc   :  { %927 = vmatpush.msrb.mxu1 %v808_v43 }
 0x2cd   :  { %v1693_v16 = vpop.permute.xlu1 %520  ;;  %944 = vmatpush.msrb.mxu0 %v846_v25  ;;  %2141 = vst [vmem:[#allocation19_spill] sm:$0xff] %v1822_v5  ;;  %v841_v25 = vld [vmem:[#allocation6 + $0x140] sm:$0xff] }
 0x2ce   :  { %v1825_v51 = vmul.f32 %v1178_v9, %v1693_v16  ;;  %v1831_v18 = vmul.f32 %v1180_v10, %v1693_v16  ;;  %906 = vmatpush.msra.mxu3 %v841_v25  ;;  %v807_v16 = vld [vmem:[#allocation6 + $0x30] sm:$0xff]  ;;  %v762_v25 = vadd.f32 %v761_v3, %v1822_v5  ;;  %928 = vmatpush.msrb.mxu1 %v806_v12 }
 0x2cf   :  { %945 = vmatpush.msrb.mxu0 %v844_v38  ;;  %v839_v9 = vld [vmem:[#allocation6 + $0x130] sm:$0xff]  ;;  %v742_v38 = vadd.f32 %v741_v62, %v1827_v55  ;;  %887 = vmatpush.msra.mxu2 %v807_v16  ;;  %v837_v62 = vld [vmem:[#allocation6 + $0x120] sm:$0xff] }
 0x2d0   :  { %v722_v58 = vadd.f32 %v721_v27, %v1825_v51  ;;  %907 = vmatpush.msra.mxu3 %v839_v9  ;;  %v803_v3 = vld [vmem:[#allocation6 + $0x10] sm:$0xff]  ;;  %v1187_v9 = vld [vmem:[#allocation3 + $0x198] sm:$0xff] }
 0x2d1   :  { %946 = vmatpush.msrb.mxu0 %v842_v47  ;;  %v743_v11 = vadd.f32 %v742_v38, %v1831_v18  ;;  %v1184_v47 = vld [vmem:[#allocation3 + $0xc0] sm:$0xff]  ;;  %v835_v27 = vld [vmem:[#allocation6 + $0x110] sm:$0xff]  ;;  %v1861_v5 = vmul.f32 %v1187_v9, %v1677_v40  ;;  %888 = vmatpush.msra.mxu2 %v805_v44 }
 0x2d2   :  { %908 = vmatpush.msra.mxu3 %v837_v62  ;;  %v833_v9 = vld [vmem:[#allocation6 + $0x100] sm:$0xff]  ;;  %v1191_v62 = vld [vmem:[#allocation3 + $0x1a8] sm:$0xff] }
 0x2d3   :  { %947 = vmatpush.msrb.mxu0 %v840_v20  ;;  %2144 = vst [vmem:[#allocation26_spill] sm:$0xff] %v1861_v5  ;;  %v1188_v20 = vld [vmem:[#allocation3 + $0xd0] sm:$0xff]  ;;  %889 = vmatpush.msra.mxu2 %v803_v3 }
 0x2d4   :  { %909 = vmatpush.msra.mxu3 %v835_v27 }
 0x2d6   :  { %v1737_v42 = vpop.permute.xlu2 %617  ;;  %910 = vmatpush.msra.mxu3 %v833_v9  ;;  %v1195_v9 = vld [vmem:[#allocation3 + $0x1b8] sm:$0xff] }
 0x2d7   :  { %v1873_v44 = vmul.f32 %v1190_v21, %v1737_v42  ;;  %v1876_v2 = vmul.f32 %v1191_v62, %v1737_v42  ;;  %v1196_v62 = vld [vmem:[#allocation3 + $0x1c0] sm:$0xff] }
 0x2d9   :  { %2145 = vst [vmem:[#allocation27_spill] sm:$0xff] %v1873_v44 }
 0x2da   :  { %2146 = vst [vmem:[#allocation28_spill] sm:$0xff] %v1876_v2 }
 0x2dd   :  { %v1754_v28 = vpop.permute.xlu1 %526 }
 0x2de   :  { %v1838_v23 = vmul.f32 %v1181_v29, %v1754_v28  ;;  %v1843_v10 = vmul.f32 %v1182_v26, %v1754_v28  ;;  %v1183_v29 = vld [vmem:[#allocation3 + $0x188] sm:$0xff] }
 0x2df   :  { %v1846_v31 = vmul.f32 %v1183_v29, %v1655_v8  ;;  %v838_v28 = vld [vmem:[#allocation6 + $0x128] sm:$0xff]  ;;  %v1186_v29 = vld [vmem:[#allocation3 + $0x190] sm:$0xff] }
 0x2e0   :  { %v1858_v16 = vmul.f32 %v1186_v29, %v1677_v40  ;;  %v723_v38 = vadd.f32 %v722_v58, %v1838_v23  ;;  %v744_v43 = vadd.f32 %v743_v11, %v1843_v10  ;;  %948 = vmatpush.msrb.mxu0 %v838_v28  ;;  %v801_v40 = vld [vmem:[#allocation6] sm:$0xff]  ;;  %v802_v11 = vld [vmem:[#allocation6 + $0x8] sm:$0xff] }
 0x2e1   :  { %2142 = vst [vmem:[#allocation20_spill] sm:$0xff] %v1846_v31  ;;  %v783_v58 = vadd.f32 %v782_v49, %v1846_v31  ;;  %890 = vmatpush.msra.mxu2 %v801_v40 }
 0x2e2   :  { %2143 = vst [vmem:[#allocation21_spill] sm:$0xff] %v1858_v16  ;;  %v763_v49 = vadd.f32 %v762_v25, %v1858_v16  ;;  %v1194_v25 = vld [vmem:[#allocation3 + $0x1b0] sm:$0xff] }
 0x2e3   :  { %v784_v21 = vadd.f32 %v783_v58, %v1861_v5  ;;  %v1891_v40 = vmul.f32 %v1194_v25, %v1833_v41  ;;  %v1894_v58 = vmul.f32 %v1195_v9, %v1833_v41 }
 0x2e4   :  { %v764_v3 = vadd.f32 %v763_v49, %v1873_v44 }
 0x2e5   :  { %v785_v27 = vadd.f32 %v784_v21, %v1876_v2  ;;  %2147 = vst [vmem:[#allocation29_spill] sm:$0xff] %v1891_v40  ;;  %v1200_v2 = vld [vmem:[#allocation3 + $0x1d0] sm:$0xff] }
 0x2e6   :  { %v1797_v48 = vpop.permute.xlu2 %532  ;;  %2148 = vst [vmem:[#allocation30_spill] sm:$0xff] %v1894_v58  ;;  %v765_v9 = vadd.f32 %v764_v3, %v1891_v40 }
 0x2e7   :  { %v1852_v26 = vmul.f32 %v1184_v47, %v1797_v48  ;;  %v1855_v8 = vmul.f32 %v1185_v17, %v1797_v48  ;;  %v804_v48 = vld [vmem:[#allocation6 + $0x18] sm:$0xff] }
 0x2e8   :  { %v836_v17 = vld [vmem:[#allocation6 + $0x118] sm:$0xff]  ;;  %929 = vmatpush.msrb.mxu1 %v804_v48 }
 0x2e9   :  { %v745_v12 = vadd.f32 %v744_v43, %v1855_v8  ;;  %949 = vmatpush.msrb.mxu0 %v836_v17  ;;  %v1193_v17 = vld [vmem:[#allocation3 + $0xe8] sm:$0xff] }
 0x2ea   :  { %930 = vmatpush.msrb.mxu1 %v802_v11 }
 0x2ed   :  { %v1811_v61 = vpop.permute.xlu1 %629 }
 0x2ee   :  { %v1897_v11 = vmul.f32 %v1196_v62, %v1811_v61  ;;  %v786_v62 = vadd.f32 %v785_v27, %v1894_v58  ;;  %v1203_v27 = vld [vmem:[#allocation3 + $0x1e8] sm:$0xff] }
 0x2f0   :  { %2149 = vst [vmem:[#allocation31_spill] sm:$0xff] %v1897_v11 }
 0x2f6   :  { %v539_v33 = vpop.permute.xlu2 %538 }
 0x2f7   :  { %v1867_v13 = vmul.f32 %v1188_v20, %v539_v33  ;;  %v1869_v29 = vmul.f32 %v1189_v52, %v539_v33  ;;  %v834_v20 = vld [vmem:[#allocation6 + $0x108] sm:$0xff]  ;;  %v724_v52 = vadd.f32 %v723_v38, %v1852_v26  ;;  %v545_v33 = vpop.permute.xlu0 %544  ;;  %v1192_v38 = vld [vmem:[#allocation3 + $0xe0] sm:$0xff] }
 0x2f8   :  { %950 = vmatpush.msrb.mxu0 %v834_v20  ;;  %v1886_v48 = vmul.f32 %v1192_v38, %v545_v33  ;;  %v1888_v43 = vmul.f32 %v1193_v17, %v545_v33  ;;  %v1197_v20 = vld [vmem:[#allocation3 + $0x1c8] sm:$0xff]  ;;  %v1198_v33 = vld [vmem:[#allocation3 + $0xf0] sm:$0xff]  ;;  %v1199_v38 = vld [vmem:[#allocation3 + $0xf8] sm:$0xff] }
 0x2f9   :  { %v725_v42 = vadd.f32 %v724_v52, %v1867_v13  ;;  %v746_v28 = vadd.f32 %v745_v12, %v1869_v29  ;;  %v1900_v52 = vmul.f32 %v1197_v20, %v1811_v61  ;;  %v1201_v20 = vld [vmem:[#allocation3 + $0x1d8] sm:$0xff] }
 0x2fb   :  { %2150 = vst [vmem:[#allocation32_spill] sm:$0xff] %v1900_v52  ;;  %v726_v25 = vadd.f32 %v725_v42, %v1886_v48  ;;  %v747_v41 = vadd.f32 %v746_v28, %v1888_v43  ;;  %v766_v42 = vadd.f32 %v765_v9, %v1897_v11  ;;  %v787_v28 = vadd.f32 %v786_v62, %v1900_v52 }
 0x2fd   :  { %v1864_v47 = vpop.permute.xlu1 %635 }
 0x2fe   :  { %v1911_v61 = vmul.f32 %v1200_v2, %v1864_v47  ;;  %v1914_v44 = vmul.f32 %v1201_v20, %v1864_v47 }
 0x300   :  { %2151 = vst [vmem:[#allocation33_spill] sm:$0xff] %v1911_v61  ;;  %v767_v5 = vadd.f32 %v766_v42, %v1911_v61  ;;  %v788_v47 = vadd.f32 %v787_v28, %v1914_v44 }
 0x301   :  { %2152 = vst [vmem:[#allocation34_spill] sm:$0xff] %v1914_v44 }
 0x306   :  { %v642_v49 = vpop.permute.xlu2 %641 }
 0x307   :  { %v1922_v58 = vmul.f32 %v1203_v27, %v642_v49 }
 0x309   :  { %2154 = vst [vmem:[#allocation36_spill] sm:$0xff] %v1922_v58  ;;  %v789_v9 = vadd.f32 %v788_v47, %v1922_v58 }
 0x30d   :  { %v551_v12 = vpop.permute.xlu1 %550 }
 0x30e   :  { %v1902_v21 = vmul.f32 %v1198_v33, %v551_v12  ;;  %v1904_v17 = vmul.f32 %v1199_v38, %v551_v12  ;;  %v1202_v38 = vld [vmem:[#allocation3 + $0x1e0] sm:$0xff] }
 0x30f   :  { %v1920_v3 = vmul.f32 %v1202_v38, %v642_v49  ;;  %v1204_v38 = vld [vmem:[#allocation3 + $0x1f0] sm:$0xff]  ;;  %v1205_v49 = vld [vmem:[#allocation3 + $0x1f8] sm:$0xff] }
 0x310   :  { %v727_v33 = vadd.f32 %v726_v25, %v1902_v21  ;;  %v748_v12 = vadd.f32 %v747_v41, %v1904_v17 }
 0x311   :  { %2153 = vst [vmem:[#allocation35_spill] sm:$0xff] %v1920_v3  ;;  %v768_v41 = vadd.f32 %v767_v5, %v1920_v3 }
 0x312   :  { %v728_v2 = vrot.slane %v727_v33, 4  ;;  %v749_v40 = vrot.slane %v748_v12, 4 }
 0x314   :  { %v729_v20 = vadd.f32 %v728_v2, %v727_v33  ;;  %v750_v25 = vadd.f32 %v749_v40, %v748_v12 }
 0x316   :  { %v648_v11 = vpop.permute.xlu2 %647  ;;  %v730_v62 = vrot.slane %v729_v20, 2  ;;  %v751_v52 = vrot.slane %v750_v25, 2 }
 0x317   :  { %v1928_v16 = vmul.f32 %v1204_v38, %v648_v11  ;;  %v1930_v27 = vmul.f32 %v1205_v49, %v648_v11 }
 0x318   :  { %v731_v28 = vadd.f32 %v730_v62, %v729_v20  ;;  %v752_v33 = vadd.f32 %v751_v52, %v750_v25 }
 0x319   :  { %2155 = vst [vmem:[#allocation37_spill] sm:$0xff] %v1928_v16  ;;  %v769_v31 = vadd.f32 %v768_v41, %v1928_v16  ;;  %v790_v42 = vadd.f32 %v789_v9, %v1930_v27 }
 0x31a   :  { %v732_v3 = vrot.slane %v731_v28, 1  ;;  %v753_v44 = vrot.slane %v752_v33, 1 }
 0x31b   :  { %v770_v40 = vrot.slane %v769_v31, 4  ;;  %v791_v12 = vrot.slane %v790_v42, 4 }
 0x31c   :  { %v733_v34 = vadd.f32 %v732_v3, %v731_v28  ;;  %v754_v11 = vadd.f32 %v753_v44, %v752_v33 }
 0x31d   :  { %v771_v5 = vadd.f32 %v770_v40, %v769_v31  ;;  %v792_v2 = vadd.f32 %v791_v12, %v790_v42 }
 0x31e   :  { %v797_v16 = vmul.f32 0.0078125, %v733_v34  ;;  %v798_v20 = vmul.f32 0.0078125, %v754_v11 }
 0x31f   :  { %v772_v47 = vrot.slane %v771_v5, 2  ;;  %v793_v58 = vrot.slane %v792_v2, 2 }
 0x321   :  { %v773_v61 = vadd.f32 %v772_v47, %v771_v5  ;;  %v794_v38 = vadd.f32 %v793_v58, %v792_v2  ;;  %v866_v58 = vstv %s2070_s6  ;;  %s1288_s6 = smov [#allocation8]  }
 0x322   :  { %s1110_s24 = sshll.u32 %s1288_s6, 4  ;;  %s1111_s24 = int_to_ptr.vmem [resolvable:$true] %s1110_s24 }
 0x323   :  { %v774_v14 = vrot.slane %v773_v61, 1  ;;  %v795_v49 = vrot.slane %v794_v38, 1 }
 0x325   :  { %v775_v53 = vadd.f32 %v774_v14, %v773_v61  ;;  %v796_v41 = vadd.f32 %v795_v49, %v794_v38 }
 0x327   :  { %v799_v9 = vmul.f32 0.0078125, %v775_v53  ;;  %v800_v52 = vmul.f32 0.0078125, %v796_v41 }
 0x329   :  { %v871_v25 = vsel %vm398_vm15, %v799_v9, %v797_v16  ;;  %v872_v31 = vsel %vm398_vm15, %v800_v52, %v798_v20 }
 0x32a   :  { %891 = vmatmul.f32.vlgmr.msra.gmra.mxu2 %v871_v25  ;;  %911 = vmatmul.f32.vlgmr.msra.gmra.mxu3 %v872_v31 }
 0x32b   :  { %931 = vmatmul.f32.vlgmr.msrb.gmra.mxu1 %v871_v25  ;;  %951 = vmatmul.f32.vlgmr.msrb.gmra.mxu0 %v872_v31 }
 0x3a8   :  { %v932_v44 = vpop.f32.mrf.mxu1  ;;  %v952_v14 = vpop.f32.mrf.mxu0 }
 0x3a9   :  { %v933_v3 = vadd.f32 %v932_v44, %v866_v58 }
 0x3ab   :  { %v953_v61 = vadd.f32 %v952_v14, %v933_v3 }
 0x3ad   :  { %v956_v34 = vmul.f32 0.5, %v953_v61  ;;  %v892_v53 = vpop.f32.mrf.mxu2  ;;  %v912_v42 = vpop.f32.mrf.mxu3 }
 0x3ae   :  { %v893_v62 = vadd.f32 %v892_v53, %v866_v58  ;;  %v2158_v53 = vld [vmem:[#allocation24_spill] sm:$0xff] }
 0x3af   :  { %1169 = vtanh.f32 %v956_v34  ;;  %v2157_v34 = vld [vmem:[#allocation23_spill] sm:$0xff] }
 0x3b0   :  { %v913_v16 = vadd.f32 %v912_v42, %v893_v62  ;;  %v2159_v62 = vld [vmem:[#allocation25_spill] sm:$0xff]  ;;  %v2160_v42 = vld [vmem:[#allocation15_spill] sm:$0xff] }
 0x3b2   :  { %v955_v28 = vmul.f32 0.5, %v913_v16  ;;  %v2161_v16 = vld [vmem:[#allocation12_spill] sm:$0xff] }
 0x3b4   :  { %1171 = vtanh.f32 %v955_v28 }
 0x3b5   :  { %v1170_v33 = vpop.eup %1169 }
 0x3b6   :  { %v960_v40 = vadd.f32 1.0, %v1170_v33  ;;  %v2162_v33 = vld [vmem:[#allocation16_spill] sm:$0xff] }
 0x3b8   :  { %v962_v12 = vmul.f32 0.5, %v960_v40 }
 0x3ba   :  { %v1172_v5 = vpop.eup %1171  ;;  %v965_v47 = vrot.slane %v962_v12, 7  ;;  %v2163_v12 = vld [vmem:[#allocation13_spill] sm:$0xff] }
 0x3bb   :  { %v959_v2 = vadd.f32 1.0, %v1172_v5 }
 0x3bd   :  { %v961_v38 = vmul.f32 0.5, %v959_v2  ;;  %v2164_v2 = vld [vmem:[#allocation17_spill] sm:$0xff] }
 0x3bf   :  { %v967_v11 = vsel %vm966_vm1, %v961_v38, %v965_v47 }
 0x3c0   :  { %v970_v49 = vperm.slane %v967_v11, 0  ;;  %v1939_v41 = vperm.slane %v967_v11, 1 }
 0x3c2   :  { %v978_v9 = vmul.f32 %v970_v49, %v1664_v35  ;;  %v979_v20 = vmul.f32 %v1939_v41, %v1667_v60  ;;  %v980_v52 = vmul.f32 %v970_v49, %v1658_v59  ;;  %v981_v25 = vmul.f32 %v1939_v41, %v1661_v37 }
 0x3c3   :  { %v982_v31 = vmul.f32 %v970_v49, %v1670_v63  ;;  %v983_v58 = vmul.f32 %v1939_v41, %v1673_v54  ;;  %v984_v44 = vmul.f32 %v970_v49, %v1682_v6  ;;  %v985_v35 = vmul.f32 %v1939_v41, %v1685_v24 }
 0x3c4   :  { %1042 = vst [vmem:[#allocation8] sm:$0xff] %v978_v9  ;;  %v986_v60 = vmul.f32 %v970_v49, %v1722_v36  ;;  %v987_v59 = vmul.f32 %v1939_v41, %v1725_v7  ;;  %v988_v37 = vmul.f32 %v970_v49, %v1735_v22  ;;  %v989_v63 = vmul.f32 %v1939_v41, %v1741_v19  ;;  %v2167_v9 = vld [vmem:[#allocation19_spill] sm:$0xff] }
 0x3c5   :  { %1043 = vst [vmem:[#allocation8 + $0x8] sm:$0xff] %v979_v20  ;;  %v990_v54 = vmul.f32 %v970_v49, %v1752_v46  ;;  %v991_v6 = vmul.f32 %v1939_v41, %v1763_v39  ;;  %v992_v24 = vmul.f32 %v970_v49, %v1772_v57  ;;  %v993_v36 = vmul.f32 %v1939_v41, %v1781_v15 }
 0x3c6   :  { %1044 = vst [vmem:[#allocation8 + $0x10] sm:$0xff] %v980_v52  ;;  %v994_v7 = vmul.f32 %v970_v49, %v1787_v45  ;;  %v995_v22 = vmul.f32 %v1939_v41, %v1793_v4  ;;  %v996_v19 = vmul.f32 %v970_v49, %v1814_v56  ;;  %v997_v46 = vmul.f32 %v1939_v41, %v1827_v55  ;;  %v2168_v52 = vld [vmem:[#allocation20_spill] sm:$0xff] }
 0x3c7   :  { %1045 = vst [vmem:[#allocation8 + $0x18] sm:$0xff] %v981_v25  ;;  %v998_v39 = vmul.f32 %v970_v49, %v1825_v51  ;;  %v968_v57 = vsel %vm398_vm15, %v961_v38, %v965_v47  ;;  %v999_v15 = vmul.f32 %v1939_v41, %v1831_v18  ;;  %v1000_v45 = vmul.f32 %v970_v49, %v1838_v23  ;;  %v2165_v38 = vld [vmem:[#allocation14_spill] sm:$0xff] }
 0x3c8   :  { %1046 = vst [vmem:[#allocation8 + $0x20] sm:$0xff] %v982_v31  ;;  %v1001_v4 = vmul.f32 %v1939_v41, %v1843_v10  ;;  %v969_v56 = vrot.slane %v968_v57, 1  ;;  %v1002_v55 = vmul.f32 %v970_v49, %v1852_v26  ;;  %v1003_v51 = vmul.f32 %v1939_v41, %v1855_v8  ;;  %v2169_v31 = vld [vmem:[#allocation21_spill] sm:$0xff] }
 0x3c9   :  { %1047 = vst [vmem:[#allocation8 + $0x28] sm:$0xff] %v983_v58  ;;  %v1004_v3 = vmul.f32 %v970_v49, %v1867_v13  ;;  %v1005_v18 = vmul.f32 %v1939_v41, %v1869_v29  ;;  %v1006_v10 = vmul.f32 %v970_v49, %v1886_v48  ;;  %v1007_v26 = vmul.f32 %v1939_v41, %v1888_v43 }
 0x3ca   :  { %1048 = vst [vmem:[#allocation8 + $0x30] sm:$0xff] %v984_v44  ;;  %v1984_v23 = vperm.slane %v969_v56, 0  ;;  %v1987_v14 = vperm.slane %v969_v56, 1  ;;  %v1008_v8 = vmul.f32 %v970_v49, %v1902_v21  ;;  %v1009_v13 = vmul.f32 %v1939_v41, %v1904_v17  ;;  %v2156_v17 = vld [vmem:[#allocation22_spill] sm:$0xff] }
 0x3cb   :  { %1049 = vst [vmem:[#allocation8 + $0x38] sm:$0xff] %v985_v35  ;;  %v2166_v49 = vld [vmem:[#allocation18_spill] sm:$0xff] }
 0x3cc   :  { %1050 = vst [vmem:[#allocation8 + $0x40] sm:$0xff] %v986_v60  ;;  %v1010_v29 = vmul.f32 %v1984_v23, %v1688_v50  ;;  %v1011_v48 = vmul.f32 %v1987_v14, %v1691_v32  ;;  %v1012_v61 = vmul.f32 %v1984_v23, %v1696_v30  ;;  %v1013_v43 = vmul.f32 %v1987_v14, %v1701_v0  ;;  %v2170_v44 = vld [vmem:[#allocation26_spill] sm:$0xff]  ;;  %v2171_v60 = vld [vmem:[#allocation27_spill] sm:$0xff] }
 0x3cd   :  { %1051 = vst [vmem:[#allocation8 + $0x48] sm:$0xff] %v987_v59  ;;  %v1014_v21 = vmul.f32 %v1984_v23, %v1704_v1  ;;  %v1015_v50 = vmul.f32 %v1987_v14, %v2156_v17  ;;  %v1016_v32 = vmul.f32 %v1984_v23, %v2157_v34  ;;  %v1017_v30 = vmul.f32 %v1987_v14, %v2158_v53 }
 0x3ce   :  { %1052 = vst [vmem:[#allocation8 + $0x50] sm:$0xff] %v988_v37  ;;  %v1018_v0 = vmul.f32 %v1984_v23, %v2159_v62  ;;  %v1019_v1 = vmul.f32 %v1987_v14, %v2160_v42  ;;  %v1020_v28 = vmul.f32 %v1984_v23, %v2161_v16  ;;  %v1021_v40 = vmul.f32 %v1987_v14, %v2162_v33  ;;  %v2172_v37 = vld [vmem:[#allocation28_spill] sm:$0xff] }
 0x3cf   :  { %1053 = vst [vmem:[#allocation8 + $0x58] sm:$0xff] %v989_v63  ;;  %v1022_v5 = vmul.f32 %v1984_v23, %v2163_v12  ;;  %v1023_v47 = vmul.f32 %v1987_v14, %v2164_v2  ;;  %v1024_v11 = vmul.f32 %v1984_v23, %v2165_v38  ;;  %v1025_v41 = vmul.f32 %v1987_v14, %v2166_v49 }
 0x3d0   :  { %1054 = vst [vmem:[#allocation8 + $0x60] sm:$0xff] %v990_v54  ;;  %v1026_v20 = vmul.f32 %v1984_v23, %v2167_v9  ;;  %v1027_v25 = vmul.f32 %v1987_v14, %v2168_v52  ;;  %v1028_v58 = vmul.f32 %v1984_v23, %v2169_v31  ;;  %v1029_v35 = vmul.f32 %v1987_v14, %v2170_v44  ;;  %v2173_v54 = vld [vmem:[#allocation29_spill] sm:$0xff] }
 0x3d1   :  { %1055 = vst [vmem:[#allocation8 + $0x68] sm:$0xff] %v991_v6  ;;  %v1030_v59 = vmul.f32 %v1984_v23, %v2171_v60  ;;  %v1031_v63 = vmul.f32 %v1987_v14, %v2172_v37  ;;  %v1032_v6 = vmul.f32 %v1984_v23, %v2173_v54 }
 0x3d2   :  { %1056 = vst [vmem:[#allocation8 + $0x70] sm:$0xff] %v992_v24  ;;  %v2174_v24 = vld [vmem:[#allocation30_spill] sm:$0xff] }
 0x3d3   :  { %1057 = vst [vmem:[#allocation8 + $0x78] sm:$0xff] %v993_v36  ;;  %v1033_v36 = vmul.f32 %v1987_v14, %v2174_v24 }
 0x3d4   :  { %1058 = vst [vmem:[#allocation8 + $0x80] sm:$0xff] %v994_v7  ;;  %v2175_v7 = vld [vmem:[#allocation31_spill] sm:$0xff] }
 0x3d5   :  { %1059 = vst [vmem:[#allocation8 + $0x88] sm:$0xff] %v995_v22  ;;  %v1034_v22 = vmul.f32 %v1984_v23, %v2175_v7 }
 0x3d6   :  { %1060 = vst [vmem:[#allocation8 + $0x90] sm:$0xff] %v996_v19  ;;  %v2176_v19 = vld [vmem:[#allocation32_spill] sm:$0xff] }
 0x3d7   :  { %1061 = vst [vmem:[#allocation8 + $0x98] sm:$0xff] %v997_v46  ;;  %v1035_v46 = vmul.f32 %v1987_v14, %v2176_v19 }
 0x3d8   :  { %1062 = vst [vmem:[#allocation8 + $0xa0] sm:$0xff] %v998_v39  ;;  %v2177_v39 = vld [vmem:[#allocation33_spill] sm:$0xff] }
 0x3d9   :  { %1063 = vst [vmem:[#allocation8 + $0xa8] sm:$0xff] %v999_v15  ;;  %v1036_v57 = vmul.f32 %v1984_v23, %v2177_v39  ;;  %v2178_v15 = vld [vmem:[#allocation34_spill] sm:$0xff] }
 0x3da   :  { %1064 = vst [vmem:[#allocation8 + $0xb0] sm:$0xff] %v1000_v45  ;;  %v1037_v45 = vmul.f32 %v1987_v14, %v2178_v15 }
 0x3db   :  { %1065 = vst [vmem:[#allocation8 + $0xb8] sm:$0xff] %v1001_v4  ;;  %v2179_v4 = vld [vmem:[#allocation35_spill] sm:$0xff] }
 0x3dc   :  { %1066 = vst [vmem:[#allocation8 + $0xc0] sm:$0xff] %v1002_v55  ;;  %v1038_v56 = vmul.f32 %v1984_v23, %v2179_v4  ;;  %v2180_v55 = vld [vmem:[#allocation36_spill] sm:$0xff] }
 0x3dd   :  { %1067 = vst [vmem:[#allocation8 + $0xc8] sm:$0xff] %v1003_v51  ;;  %v1039_v51 = vmul.f32 %v1987_v14, %v2180_v55 }
 0x3de   :  { %1068 = vst [vmem:[#allocation8 + $0xd0] sm:$0xff] %v1004_v3  ;;  %v2181_v3 = vld [vmem:[#allocation37_spill] sm:$0xff] }
 0x3df   :  { %1069 = vst [vmem:[#allocation8 + $0xd8] sm:$0xff] %v1005_v18  ;;  %v1040_v18 = vmul.f32 %v1984_v23, %v2181_v3 }
 0x3e0   :  { %1070 = vst [vmem:[#allocation8 + $0xe0] sm:$0xff] %v1006_v10  ;;  %v1041_v10 = vmul.f32 %v1987_v14, %v1930_v27 }
 0x3e1   :  { %1071 = vst [vmem:[#allocation8 + $0xe8] sm:$0xff] %v1007_v26 }
 0x3e2   :  { %1072 = vst [vmem:[#allocation8 + $0xf0] sm:$0xff] %v1008_v8 }
 0x3e3   :  { %1073 = vst [vmem:[#allocation8 + $0xf8] sm:$0xff] %v1009_v13 }
 0x3e4   :  { %1074 = vst [vmem:[#allocation8 + $0x100] sm:$0xff] %v1010_v29 }
 0x3e5   :  { %1075 = vst [vmem:[#allocation8 + $0x108] sm:$0xff] %v1011_v48 }
 0x3e6   :  { %1076 = vst [vmem:[#allocation8 + $0x110] sm:$0xff] %v1012_v61 }
 0x3e7   :  { %1077 = vst [vmem:[#allocation8 + $0x118] sm:$0xff] %v1013_v43 }
 0x3e8   :  { %1078 = vst [vmem:[#allocation8 + $0x120] sm:$0xff] %v1014_v21 }
 0x3e9   :  { %1079 = vst [vmem:[#allocation8 + $0x128] sm:$0xff] %v1015_v50 }
 0x3ea   :  { %1080 = vst [vmem:[#allocation8 + $0x130] sm:$0xff] %v1016_v32 }
 0x3eb   :  { %1081 = vst [vmem:[#allocation8 + $0x138] sm:$0xff] %v1017_v30 }
 0x3ec   :  { %1082 = vst [vmem:[#allocation8 + $0x140] sm:$0xff] %v1018_v0 }
 0x3ed   :  { %1083 = vst [vmem:[#allocation8 + $0x148] sm:$0xff] %v1019_v1 }
 0x3ee   :  { %1084 = vst [vmem:[#allocation8 + $0x150] sm:$0xff] %v1020_v28 }
 0x3ef   :  { %1085 = vst [vmem:[#allocation8 + $0x158] sm:$0xff] %v1021_v40 }
 0x3f0   :  { %1086 = vst [vmem:[#allocation8 + $0x160] sm:$0xff] %v1022_v5 }
 0x3f1   :  { %1087 = vst [vmem:[#allocation8 + $0x168] sm:$0xff] %v1023_v47 }
 0x3f2   :  { %1088 = vst [vmem:[#allocation8 + $0x170] sm:$0xff] %v1024_v11 }
 0x3f3   :  { %1089 = vst [vmem:[#allocation8 + $0x178] sm:$0xff] %v1025_v41 }
 0x3f4   :  { %1090 = vst [vmem:[#allocation8 + $0x180] sm:$0xff] %v1026_v20 }
 0x3f5   :  { %1091 = vst [vmem:[#allocation8 + $0x188] sm:$0xff] %v1027_v25 }
 0x3f6   :  { %1092 = vst [vmem:[#allocation8 + $0x190] sm:$0xff] %v1028_v58 }
 0x3f7   :  { %1093 = vst [vmem:[#allocation8 + $0x198] sm:$0xff] %v1029_v35 }
 0x3f8   :  { %1094 = vst [vmem:[#allocation8 + $0x1a0] sm:$0xff] %v1030_v59 }
 0x3f9   :  { %1095 = vst [vmem:[#allocation8 + $0x1a8] sm:$0xff] %v1031_v63 }
 0x3fa   :  { %1096 = vst [vmem:[#allocation8 + $0x1b0] sm:$0xff] %v1032_v6 }
 0x3fb   :  { %1097 = vst [vmem:[#allocation8 + $0x1b8] sm:$0xff] %v1033_v36 }
 0x3fc   :  { %1098 = vst [vmem:[#allocation8 + $0x1c0] sm:$0xff] %v1034_v22 }
 0x3fd   :  { %1099 = vst [vmem:[#allocation8 + $0x1c8] sm:$0xff] %v1035_v46 }
 0x3fe   :  { %1100 = vst [vmem:[#allocation8 + $0x1d0] sm:$0xff] %v1036_v57 }
 0x3ff   :  { %1101 = vst [vmem:[#allocation8 + $0x1d8] sm:$0xff] %v1037_v45 }
 0x400   :  { %1102 = vst [vmem:[#allocation8 + $0x1e0] sm:$0xff] %v1038_v56 }
 0x401   :  { %1103 = vst [vmem:[#allocation8 + $0x1e8] sm:$0xff] %v1039_v51 }
 0x402   :  { %1104 = vst [vmem:[#allocation8 + $0x1f0] sm:$0xff] %v1040_v18 }
 0x403   :  { %1105 = vst [vmem:[#allocation8 + $0x1f8] sm:$0xff] %v1041_v10 }
 0x404   :  { %1118 = dma.vmem_to_hbm [thread:$0]  %s1111_s24, 8192, %s1113_s27, [#allocation5], %s1285_s9, %s1285_s9, %s1286_s10  }
 0x405   :  { %1282 = dma.done.wait [#allocation5], 8192  }
 0x406   :  { %1283 = vsyncadd [#allocation5], 4294959104 }
 0x407   :  { %1123 = vsyncpa [#allocation4], 1 }
 0x408   :  { %1124 = vsyncpa [#allocation7], 1 }
 0x409   :  { %1125 = vsyncpa [#allocation5], 1 }

// kernel: tpu_custom_call.1
= control target key start
LH: loop header
LB: loop body
LE: loop exit
PB: predicated region body
PF: predicated region fallthrough
CT: control target
= control target key end

     0   :  { %13 = vsyncpa [#allocation4], 0  ;;  %s2064_s0 = inlined_call_operand.hbm [shape: f32[2,128,256], index: 0, kind: input, shape index: {}]   ;;  %s2065_s1 = inlined_call_operand.vmem [shape: f32[128,8], index: 1, kind: input, shape index: {}]   ;;  %s2066_s2 = inlined_call_operand.vmem [shape: f32[1,8], index: 2, kind: input, shape index: {}]   ;;  %s2067_s3 = inlined_call_operand.vmem [shape: f32[8,128], index: 3, kind: input, shape index: {}]   ;;  %s2068_s4 = inlined_call_operand.vmem [shape: f32[1,128], index: 4, kind: input, shape index: {}]   ;;  %s2069_s5 = inlined_call_operand.hbm [shape: f32[256,256], index: 5, kind: input, shape index: {}]   ;;  %s2070_s6 = inlined_call_operand.<no memory space> [shape: f32[1], index: 6, kind: input, shape index: {}]   ;;  %s2071_s7 = inlined_call_operand.hbm [shape: f32[2,128,256], index: 7, kind: output, shape index: {}]  }
   0x1   :  { %14 = vsyncpa [#allocation7], 0 }
   0x2   :  { %15 = vsyncpa [#allocation5], 0  ;;  %s20_s26 = sshll.u32 %s2064_s0, 4  ;;  %s1284_s27 = smov [#allocation3]   ;;  %s21_s26 = int_to_ptr.hbm [resolvable:$true] %s20_s26 }
   0x3   :  { %s22_s28 = sshll.u32 %s1284_s27, 4  ;;  %s41_s8 = sshll.u32 %s2069_s5, 4  ;;  %s23_s28 = int_to_ptr.vmem [resolvable:$true] %s22_s28  ;;  %s42_s8 = int_to_ptr.hbm [resolvable:$true] %s41_s8 }
   0x4   :  { %s1285_s9 = smov 256   ;;  %s1286_s10 = smov 16  }
   0x5   :  { %28 = dma.hbm_to_vmem [thread:$0]  %s21_s26, 8192, %s23_s28, [#allocation4], %s1285_s9, %s1285_s9, %s1286_s10  }
   0x6   :  { %s1287_s11 = smov [#allocation6]  }
   0x7   :  { %s43_s12 = sshll.u32 %s1287_s11, 4  ;;  %s44_s12 = int_to_ptr.vmem [resolvable:$true] %s43_s12 }
   0x8   :  { %49 = dma.hbm_to_vmem [thread:$0]  %s42_s8, 8192, %s44_s12, [#allocation7], %s1285_s9, %s1285_s9, %s1286_s10  }
   0x9   :  { %1278 = dma.done.wait [#allocation4], 8192  }
   0xa   :  { %1279 = vsyncadd [#allocation4], 4294959104 }
   0xb   :  { %1280 = dma.done.wait [#allocation7], 8192  }
   0xc   :  { %1281 = vsyncadd [#allocation7], 4294959104  ;;  %v1341_v0 = vld [vmem:[#allocation3 + $0x100] sm:$0xff]  ;;  %v1343_v1 = vld [vmem:[#allocation3 + $0x108] sm:$0xff]  ;;  %vm309_vm0 = vcmask 130112   ;;  %vm313_vm1 = vcmask 195712  }
   0xd   :  { %v1345_v2 = vld [vmem:[#allocation3] sm:$0xff]  ;;  %v172_v3 = vadd.f32 %v1343_v1, %v1341_v0  ;;  %v1349_v4 = vld [vmem:[#allocation3 + $0x8] sm:$0xff]  ;;  %v1359_v9 = vld [vmem:[#allocation3 + $0x110] sm:$0xff]  ;;  %vm317_vm2 = vcmask 261312   ;;  %vm321_vm3 = vcmask 326912   ;;  %vm325_vm4 = vcmask 392512  }
   0xe   :  { %v1351_v5 = vld [vmem:[#allocation3 + $0x20] sm:$0xff]  ;;  %v1353_v6 = vld [vmem:[#allocation3 + $0x28] sm:$0xff]  ;;  %v124_v7 = vadd.f32 %v1349_v4, %v1345_v2  ;;  %v1361_v10 = vld [vmem:[#allocation3 + $0x118] sm:$0xff]  ;;  %vm329_vm5 = vcmask 458112   ;;  %vm333_vm6 = vcmask 523712   ;;  %vm337_vm7 = vcmask 589312  }
   0xf   :  { %v130_v8 = vadd.f32 %v1353_v6, %v1351_v5  ;;  %173 = vadd.xlane.f32.xlu1 %v172_v3  ;;  %v1363_v11 = vld [vmem:[#allocation3 + $0x10] sm:$0xff]  ;;  %v1365_v12 = vld [vmem:[#allocation3 + $0x18] sm:$0xff]  ;;  %v1367_v13 = vld [vmem:[#allocation3 + $0x120] sm:$0xff]  ;;  %v175_v15 = vadd.f32 %v1361_v10, %v1359_v9  ;;  %vm341_vm8 = vcmask 654912   ;;  %vm345_vm9 = vcmask 720512   ;;  %s1112_s27 = sshll.u32 %s2071_s7, 4  ;;  %s1113_s27 = int_to_ptr.hbm [resolvable:$true] %s1112_s27 }
  0x10   :  { %125 = vadd.xlane.f32.xlu0 %v124_v7  ;;  %v1369_v14 = vld [vmem:[#allocation3 + $0x128] sm:$0xff]  ;;  %v127_v16 = vadd.f32 %v1365_v12, %v1363_v11  ;;  %v1377_v18 = vld [vmem:[#allocation3 + $0x130] sm:$0xff]  ;;  %v1379_v19 = vld [vmem:[#allocation3 + $0x138] sm:$0xff]  ;;  %vm349_vm10 = vcmask 786112   ;;  %vm353_vm11 = vcmask 851712   ;;  %vm357_vm12 = vcmask 917312  }
  0x11   :  { %131 = vadd.xlane.f32.xlu2 %v130_v8  ;;  %v178_v17 = vadd.f32 %v1369_v14, %v1367_v13  ;;  %v1381_v20 = vld [vmem:[#allocation3 + $0x30] sm:$0xff]  ;;  %v1383_v21 = vld [vmem:[#allocation3 + $0x38] sm:$0xff]  ;;  %v1385_v22 = vld [vmem:[#allocation3 + $0x40] sm:$0xff]  ;;  %v181_v24 = vadd.f32 %v1379_v19, %v1377_v18  ;;  %vm361_vm13 = vcmask 982912   ;;  %vm365_vm14 = vcmask 1048512  }
  0x12   :  { %v1387_v23 = vld [vmem:[#allocation3 + $0x48] sm:$0xff]  ;;  %v133_v25 = vadd.f32 %v1383_v21, %v1381_v20  ;;  %v1395_v27 = vld [vmem:[#allocation3 + $0x50] sm:$0xff]  ;;  %v1397_v28 = vld [vmem:[#allocation3 + $0x58] sm:$0xff]  ;;  %vm398_vm15 = vcmask 1041409  }
  0x13   :  { %v136_v26 = vadd.f32 %v1387_v23, %v1385_v22  ;;  %v1399_v29 = vld [vmem:[#allocation3 + $0x140] sm:$0xff]  ;;  %v1401_v30 = vld [vmem:[#allocation3 + $0x148] sm:$0xff]  ;;  %v1403_v31 = vld [vmem:[#allocation3 + $0x150] sm:$0xff]  ;;  %v139_v33 = vadd.f32 %v1397_v28, %v1395_v27 }
  0x14   :  { %2109 = vst [vmem:[#allocation12_spill] sm:$0xff] %v1401_v30  ;;  %v1405_v32 = vld [vmem:[#allocation3 + $0x158] sm:$0xff]  ;;  %v184_v34 = vadd.f32 %v1401_v30, %v1399_v29  ;;  %v104_v36 = vld [vmem:[#allocation3 + $0x160] sm:$0xff]  ;;  %v105_v37 = vld [vmem:[#allocation3 + $0x168] sm:$0xff] }
  0x15   :  { %2110 = vst [vmem:[#allocation13_spill] sm:$0xff] %v1403_v31  ;;  %v187_v35 = vadd.f32 %v1405_v32, %v1403_v31  ;;  %v1413_v38 = vld [vmem:[#allocation3 + $0x60] sm:$0xff]  ;;  %v1415_v39 = vld [vmem:[#allocation3 + $0x68] sm:$0xff]  ;;  %v1417_v40 = vld [vmem:[#allocation3 + $0x70] sm:$0xff]  ;;  %v190_v42 = vadd.f32 %v105_v37, %v104_v36 }
  0x16   :  { %2111 = vst [vmem:[#allocation14_spill] sm:$0xff] %v1405_v32  ;;  %v1419_v41 = vld [vmem:[#allocation3 + $0x78] sm:$0xff]  ;;  %v142_v43 = vadd.f32 %v1415_v39, %v1413_v38  ;;  %v1425_v45 = vld [vmem:[#allocation3 + $0x80] sm:$0xff]  ;;  %v1427_v46 = vld [vmem:[#allocation3 + $0x88] sm:$0xff] }
  0x17   :  { %176 = vadd.xlane.f32.xlu1 %v175_v15  ;;  %2112 = vst [vmem:[#allocation15_spill] sm:$0xff] %v1413_v38  ;;  %v145_v44 = vadd.f32 %v1419_v41, %v1417_v40  ;;  %v106_v47 = vld [vmem:[#allocation3 + $0x170] sm:$0xff]  ;;  %v107_v48 = vld [vmem:[#allocation3 + $0x178] sm:$0xff]  ;;  %v108_v49 = vld [vmem:[#allocation3 + $0x180] sm:$0xff]  ;;  %v148_v51 = vadd.f32 %v1427_v46, %v1425_v45 }
  0x18   :  { %128 = vadd.xlane.f32.xlu0 %v127_v16  ;;  %2113 = vst [vmem:[#allocation16_spill] sm:$0xff] %v1415_v39  ;;  %v109_v50 = vld [vmem:[#allocation3 + $0x188] sm:$0xff]  ;;  %v193_v52 = vadd.f32 %v107_v48, %v106_v47  ;;  %v110_v54 = vld [vmem:[#allocation3 + $0x190] sm:$0xff]  ;;  %v111_v55 = vld [vmem:[#allocation3 + $0x198] sm:$0xff] }
  0x19   :  { %179 = vadd.xlane.f32.xlu2 %v178_v17  ;;  %2114 = vst [vmem:[#allocation17_spill] sm:$0xff] %v1417_v40  ;;  %v196_v53 = vadd.f32 %v109_v50, %v108_v49  ;;  %v1431_v56 = vld [vmem:[#allocation3 + $0x90] sm:$0xff]  ;;  %v79_v57 = vld [vmem:[#allocation3 + $0x98] sm:$0xff]  ;;  %v80_v58 = vld [vmem:[#allocation3 + $0xa0] sm:$0xff]  ;;  %v199_v60 = vadd.f32 %v111_v55, %v110_v54 }
  0x1a   :  { %2115 = vst [vmem:[#allocation18_spill] sm:$0xff] %v1419_v41  ;;  %v81_v59 = vld [vmem:[#allocation3 + $0xa8] sm:$0xff]  ;;  %v151_v61 = vadd.f32 %v79_v57, %v1431_v56  ;;  %v82_v63 = vld [vmem:[#allocation3 + $0xb0] sm:$0xff]  ;;  %v83_v3 = vld [vmem:[#allocation3 + $0xb8] sm:$0xff] }
  0x1b   :  { %2116 = vst [vmem:[#allocation19_spill] sm:$0xff] %v1425_v45  ;;  %v154_v62 = vadd.f32 %v81_v59, %v80_v58  ;;  %v112_v7 = vld [vmem:[#allocation3 + $0x1a0] sm:$0xff]  ;;  %v113_v8 = vld [vmem:[#allocation3 + $0x1a8] sm:$0xff]  ;;  %v114_v15 = vld [vmem:[#allocation3 + $0x1b0] sm:$0xff]  ;;  %v157_v17 = vadd.f32 %v83_v3, %v82_v63 }
  0x1c   :  { %2117 = vst [vmem:[#allocation20_spill] sm:$0xff] %v1427_v46  ;;  %v115_v16 = vld [vmem:[#allocation3 + $0x1b8] sm:$0xff]  ;;  %v86_v36 = vld [vmem:[#allocation3 + $0xd0] sm:$0xff]  ;;  %v88_v47 = vld [vmem:[#allocation3 + $0xe0] sm:$0xff] }
  0x1d   :  { %2118 = vst [vmem:[#allocation21_spill] sm:$0xff] %v1431_v56  ;;  %v87_v37 = vld [vmem:[#allocation3 + $0xd8] sm:$0xff]  ;;  %v89_v48 = vld [vmem:[#allocation3 + $0xe8] sm:$0xff]  ;;  %v118_v49 = vld [vmem:[#allocation3 + $0x1d0] sm:$0xff] }
  0x1e   :  { %v119_v50 = vld [vmem:[#allocation3 + $0x1d8] sm:$0xff]  ;;  %v122_v57 = vld [vmem:[#allocation3 + $0x1f0] sm:$0xff] }
  0x1f   :  { %182 = vadd.xlane.f32.xlu1 %v181_v24  ;;  %v202_v24 = vadd.f32 %v113_v8, %v112_v7  ;;  %v211_v54 = vadd.f32 %v119_v50, %v118_v49  ;;  %v123_v58 = vld [vmem:[#allocation3 + $0x1f8] sm:$0xff]  ;;  %v90_v59 = vld [vmem:[#allocation3 + $0xf0] sm:$0xff]  ;;  %v261_v50 = vld [vmem:[%s2065_s1 + $0x48] sm:$0xff] }
  0x20   :  { %134 = vadd.xlane.f32.xlu0 %v133_v25  ;;  %v205_v25 = vadd.f32 %v115_v16, %v114_v15  ;;  %v262_v49 = vld [vmem:[%s2065_s1 + $0x50] sm:$0xff] }
  0x21   :  { %137 = vadd.xlane.f32.xlu2 %v136_v26  ;;  %v116_v26 = vld [vmem:[#allocation3 + $0x1c0] sm:$0xff] }
  0x27   :  { %140 = vadd.xlane.f32.xlu1 %v139_v33  ;;  %v117_v33 = vld [vmem:[#allocation3 + $0x1c8] sm:$0xff] }
  0x28   :  { %185 = vadd.xlane.f32.xlu0 %v184_v34  ;;  %v84_v34 = vld [vmem:[#allocation3 + $0xc0] sm:$0xff] }
  0x29   :  { %188 = vadd.xlane.f32.xlu2 %v187_v35  ;;  %v85_v35 = vld [vmem:[#allocation3 + $0xc8] sm:$0xff] }
  0x2f   :  { %191 = vadd.xlane.f32.xlu1 %v190_v42  ;;  %v208_v42 = vadd.f32 %v117_v33, %v116_v26  ;;  %v267_v26 = vld [vmem:[%s2065_s1 + $0x78] sm:$0xff] }
  0x30   :  { %143 = vadd.xlane.f32.xlu0 %v142_v43  ;;  %v160_v43 = vadd.f32 %v85_v35, %v84_v34  ;;  %401 = vmatpush.msra.mxu0 %v267_v26 }
  0x31   :  { %146 = vadd.xlane.f32.xlu2 %v145_v44  ;;  %v163_v44 = vadd.f32 %v87_v37, %v86_v36  ;;  %v266_v36 = vld [vmem:[%s2065_s1 + $0x70] sm:$0xff]  ;;  %v265_v37 = vld [vmem:[%s2065_s1 + $0x68] sm:$0xff] }
  0x32   :  { %402 = vmatpush.msra.mxu0 %v266_v36 }
  0x34   :  { %403 = vmatpush.msra.mxu0 %v265_v37 }
  0x37   :  { %149 = vadd.xlane.f32.xlu1 %v148_v51  ;;  %v120_v51 = vld [vmem:[#allocation3 + $0x1e0] sm:$0xff] }
  0x38   :  { %194 = vadd.xlane.f32.xlu0 %v193_v52  ;;  %v121_v52 = vld [vmem:[#allocation3 + $0x1e8] sm:$0xff] }
  0x39   :  { %197 = vadd.xlane.f32.xlu2 %v196_v53  ;;  %v166_v53 = vadd.f32 %v89_v48, %v88_v47  ;;  %v214_v55 = vadd.f32 %v121_v52, %v120_v51  ;;  %v260_v51 = vld [vmem:[%s2065_s1 + $0x40] sm:$0xff]  ;;  %v259_v52 = vld [vmem:[%s2065_s1 + $0x38] sm:$0xff] }
  0x3f   :  { %200 = vadd.xlane.f32.xlu1 %v199_v60  ;;  %v91_v60 = vld [vmem:[#allocation3 + $0xf8] sm:$0xff] }
  0x40   :  { %152 = vadd.xlane.f32.xlu0 %v151_v61  ;;  %v217_v61 = vadd.f32 %v123_v58, %v122_v57  ;;  %v258_v57 = vld [vmem:[%s2065_s1 + $0x30] sm:$0xff]  ;;  %v257_v58 = vld [vmem:[%s2065_s1 + $0x28] sm:$0xff] }
  0x41   :  { %155 = vadd.xlane.f32.xlu2 %v154_v62  ;;  %v169_v62 = vadd.f32 %v91_v60, %v90_v59  ;;  %v2072_v59 = vlaneseq  ;;  %v256_v60 = vld [vmem:[%s2065_s1 + $0x20] sm:$0xff] }
  0x43   :  { %v1498_v26 = vand.u32 127, %v2072_v59 }
  0x45   :  { %v319_v46 = vadd.s32 4294967264, %v1498_v26  ;;  %v331_v38 = vadd.s32 4294967240, %v1498_v26 }
  0x47   :  { %158 = vadd.xlane.f32.xlu1 %v157_v17 }
  0x48   :  { %203 = vadd.xlane.f32.xlu0 %v202_v24 }
  0x49   :  { %206 = vadd.xlane.f32.xlu2 %v205_v25 }
  0x4f   :  { %209 = vadd.xlane.f32.xlu1 %v208_v42  ;;  %v264_v42 = vld [vmem:[%s2065_s1 + $0x60] sm:$0xff] }
  0x50   :  { %161 = vadd.xlane.f32.xlu0 %v160_v43  ;;  %404 = vmatpush.msra.mxu0 %v264_v42  ;;  %v263_v43 = vld [vmem:[%s2065_s1 + $0x58] sm:$0xff]  ;;  %v254_v42 = vld [vmem:[%s2065_s1 + $0x10] sm:$0xff] }
  0x51   :  { %164 = vadd.xlane.f32.xlu2 %v163_v44 }
  0x52   :  { %405 = vmatpush.msra.mxu0 %v263_v43  ;;  %v307_v43 = vadd.s32 4294967288, %v1498_v26 }
  0x54   :  { %406 = vmatpush.msra.mxu0 %v262_v49 }
  0x56   :  { %407 = vmatpush.msra.mxu0 %v261_v50 }
  0x57   :  { %167 = vadd.xlane.f32.xlu1 %v166_v53 }
  0x58   :  { %212 = vadd.xlane.f32.xlu0 %v211_v54  ;;  %408 = vmatpush.msra.mxu0 %v260_v51  ;;  %v253_v51 = vld [vmem:[%s2065_s1 + $0x8] sm:$0xff] }
  0x59   :  { %215 = vadd.xlane.f32.xlu2 %v214_v55 }
  0x5a   :  { %409 = vmatpush.msra.mxu0 %v259_v52  ;;  %v252_v52 = vld [vmem:[%s2065_s1] sm:$0xff] }
  0x5c   :  { %410 = vmatpush.msra.mxu0 %v258_v57 }
  0x5e   :  { %411 = vmatpush.msra.mxu0 %v257_v58 }
  0x5f   :  { %218 = vadd.xlane.f32.xlu1 %v217_v61  ;;  %v255_v61 = vld [vmem:[%s2065_s1 + $0x18] sm:$0xff] }
  0x60   :  { %170 = vadd.xlane.f32.xlu0 %v169_v62  ;;  %412 = vmatpush.msra.mxu0 %v256_v60  ;;  %v311_v60 = vadd.s32 4294967280, %v1498_v26 }
  0x62   :  { %413 = vmatpush.msra.mxu0 %v255_v61  ;;  %v315_v61 = vadd.s32 4294967272, %v1498_v26 }
  0x64   :  { %414 = vmatpush.msra.mxu0 %v254_v42 }
  0x66   :  { %415 = vmatpush.msra.mxu0 %v253_v51 }
  0x68   :  { %416 = vmatpush.msra.mxu0 %v252_v52 }
  0x82   :  { %v174_v63 = vpop.xlane.xlu1 %173 }
  0x83   :  { %v126_v3 = vpop.xlane.xlu0 %125  ;;  %v236_v57 = vmul.f32 0.00390625, %v174_v63 }
  0x84   :  { %v1434_v7 = vpop.xlane.xlu2 %131  ;;  %v220_v58 = vmul.f32 0.00390625, %v126_v3 }
  0x85   :  { %v367_v63 = vperm.slane %v236_v57, %v1498_v26  ;;  %v222_v51 = vmul.f32 0.00390625, %v1434_v7 }
  0x86   :  { %v306_v3 = vperm.slane %v220_v58, %v1498_v26 }
  0x87   :  { %v312_v40 = vperm.slane %v222_v51, %v311_v60 }
  0x8a   :  { %v177_v8 = vpop.xlane.xlu1 %176 }
  0x8b   :  { %v129_v15 = vpop.xlane.xlu0 %128  ;;  %v237_v49 = vmul.f32 0.00390625, %v177_v8 }
  0x8c   :  { %v180_v16 = vpop.xlane.xlu2 %179  ;;  %v221_v50 = vmul.f32 0.00390625, %v129_v15 }
  0x8d   :  { %v368_v8 = vperm.slane %v237_v49, %v307_v43  ;;  %v238_v42 = vmul.f32 0.00390625, %v180_v16  ;;  %v323_v16 = vadd.s32 4294967256, %v1498_v26 }
  0x8e   :  { %v308_v15 = vperm.slane %v221_v50, %v307_v43 }
  0x8f   :  { %v370_v52 = vperm.slane %v238_v42, %v311_v60 }
  0x90   :  { %v310_v50 = vsel %vm309_vm0, %v308_v15, %v306_v3 }
  0x92   :  { %v183_v17 = vpop.xlane.xlu1 %182 }
  0x93   :  { %v135_v24 = vpop.xlane.xlu0 %134  ;;  %v239_v59 = vmul.f32 0.00390625, %v183_v17  ;;  %v327_v17 = vadd.s32 4294967248, %v1498_v26 }
  0x94   :  { %v1436_v25 = vpop.xlane.xlu2 %137  ;;  %v223_v56 = vmul.f32 0.00390625, %v135_v24  ;;  %v369_v24 = vsel %vm309_vm0, %v368_v8, %v367_v63  ;;  %v335_v8 = vadd.s32 4294967232, %v1498_v26  ;;  %vm427_vm0 = vcmask 64512  }
  0x95   :  { %v224_v57 = vmul.f32 0.00390625, %v1436_v25  ;;  %v372_v58 = vperm.slane %v239_v59, %v315_v61  ;;  %v371_v25 = vsel %vm313_vm1, %v370_v52, %v369_v24  ;;  %v347_v52 = vadd.s32 4294967208, %v1498_v26 }
  0x96   :  { %v316_v32 = vperm.slane %v223_v56, %v315_v61  ;;  %v314_v56 = vsel %vm313_vm1, %v312_v40, %v310_v50  ;;  %vm966_vm1 = vcmask 1040384  }
  0x9a   :  { %v1441_v33 = vpop.xlane.xlu1 %140 }
  0x9b   :  { %v1443_v34 = vpop.xlane.xlu0 %185  ;;  %v225_v7 = vmul.f32 0.00390625, %v1441_v33  ;;  %v320_v33 = vperm.slane %v224_v57, %v319_v46 }
  0x9c   :  { %v1445_v35 = vpop.xlane.xlu2 %188  ;;  %v240_v41 = vmul.f32 0.00390625, %v1443_v34 }
  0x9d   :  { %v241_v34 = vmul.f32 0.00390625, %v1445_v35  ;;  %v339_v35 = vadd.s32 4294967224, %v1498_v26 }
  0x9e   :  { %v374_v31 = vperm.slane %v240_v41, %v319_v46  ;;  %v373_v41 = vsel %vm317_vm2, %v372_v58, %v371_v25 }
  0x9f   :  { %v376_v59 = vperm.slane %v241_v34, %v323_v16 }
  0xa0   :  { %v375_v61 = vsel %vm321_vm3, %v374_v31, %v373_v41  ;;  %v343_v31 = vadd.s32 4294967216, %v1498_v26 }
  0xa2   :  { %v1459_v44 = vpop.xlane.xlu1 %191 }
  0xa3   :  { %v1461_v47 = vpop.xlane.xlu0 %143  ;;  %v242_v39 = vmul.f32 0.00390625, %v1459_v44  ;;  %v318_v44 = vsel %vm317_vm2, %v316_v32, %v314_v56  ;;  %v351_v56 = vadd.s32 4294967200, %v1498_v26 }
  0xa4   :  { %v1463_v48 = vpop.xlane.xlu2 %146  ;;  %v226_v30 = vmul.f32 0.00390625, %v1461_v47  ;;  %v324_v47 = vperm.slane %v225_v7, %v323_v16  ;;  %v322_v50 = vsel %vm321_vm3, %v320_v33, %v318_v44 }
  0xa5   :  { %v378_v42 = vperm.slane %v242_v39, %v327_v17  ;;  %v377_v39 = vsel %vm325_vm4, %v376_v59, %v375_v61 }
  0xa6   :  { %v328_v63 = vperm.slane %v226_v30, %v327_v17  ;;  %v326_v30 = vsel %vm325_vm4, %v324_v47, %v322_v50  ;;  %v355_v47 = vadd.s32 4294967192, %v1498_v26 }
  0xa8   :  { %v330_v17 = vsel %vm329_vm5, %v328_v63, %v326_v30 }
  0xaa   :  { %v1477_v53 = vpop.xlane.xlu1 %149 }
  0xab   :  { %v1479_v54 = vpop.xlane.xlu0 %194  ;;  %v228_v40 = vmul.f32 0.00390625, %v1477_v53  ;;  %v379_v53 = vsel %vm329_vm5, %v378_v42, %v377_v39  ;;  %v363_v39 = vadd.s32 4294967176, %v1498_v26 }
  0xac   :  { %v1481_v55 = vpop.xlane.xlu2 %197  ;;  %v243_v15 = vmul.f32 0.00390625, %v1479_v54  ;;  %v227_v54 = vmul.f32 0.00390625, %v1463_v48 }
  0xad   :  { %v244_v24 = vmul.f32 0.00390625, %v1481_v55  ;;  %v336_v57 = vperm.slane %v228_v40, %v335_v8 }
  0xae   :  { %v380_v46 = vperm.slane %v243_v15, %v331_v38  ;;  %v332_v55 = vperm.slane %v227_v54, %v331_v38 }
  0xaf   :  { %v382_v58 = vperm.slane %v244_v24, %v335_v8  ;;  %v359_v8 = vadd.s32 4294967184, %v1498_v26 }
  0xb0   :  { %v334_v38 = vsel %vm333_vm6, %v332_v55, %v330_v17 }
  0xb2   :  { %v1495_v62 = vpop.xlane.xlu1 %200 }
  0xb3   :  { %v1500_v36 = vpop.xlane.xlu0 %152  ;;  %v245_v32 = vmul.f32 0.00390625, %v1495_v62  ;;  %v381_v62 = vsel %vm333_vm6, %v380_v46, %v379_v53 }
  0xb4   :  { %v1502_v37 = vpop.xlane.xlu2 %155  ;;  %v229_v16 = vmul.f32 0.00390625, %v1500_v36 }
  0xb5   :  { %v230_v36 = vmul.f32 0.00390625, %v1502_v37  ;;  %v384_v7 = vperm.slane %v245_v32, %v339_v35 }
  0xb6   :  { %v340_v34 = vperm.slane %v229_v16, %v339_v35  ;;  %v338_v35 = vsel %vm337_vm7, %v336_v57, %v334_v38  ;;  %v422_v38 = vld [vmem:[%s2067_s3] sm:$0xff] }
  0xb7   :  { %446 = vmatpush.msra.mxu1 %v422_v38 }
  0xba   :  { %v1517_v45 = vpop.xlane.xlu1 %158 }
  0xbb   :  { %v204_v49 = vpop.xlane.xlu0 %203  ;;  %v231_v15 = vmul.f32 0.00390625, %v1517_v45  ;;  %v383_v45 = vsel %vm337_vm7, %v382_v58, %v381_v62 }
  0xbc   :  { %v207_v43 = vpop.xlane.xlu2 %206  ;;  %v246_v48 = vmul.f32 0.00390625, %v204_v49  ;;  %v385_v42 = vsel %vm341_vm8, %v384_v7, %v383_v45 }
  0xbd   :  { %v247_v25 = vmul.f32 0.00390625, %v207_v43  ;;  %v344_v43 = vperm.slane %v230_v36, %v343_v31  ;;  %v348_v63 = vperm.slane %v231_v15, %v347_v52 }
  0xbe   :  { %v386_v49 = vperm.slane %v246_v48, %v343_v31 }
  0xbf   :  { %v388_v54 = vperm.slane %v247_v25, %v347_v52 }
  0xc2   :  { %v210_v60 = vpop.xlane.xlu1 %209 }
  0xc3   :  { %v162_v3 = vpop.xlane.xlu0 %161  ;;  %v248_v33 = vmul.f32 0.00390625, %v210_v60  ;;  %v342_v60 = vsel %vm341_vm8, %v340_v34, %v338_v35 }
  0xc4   :  { %v165_v51 = vpop.xlane.xlu2 %164  ;;  %v232_v44 = vmul.f32 0.00390625, %v162_v3  ;;  %v387_v3 = vsel %vm345_vm9, %v386_v49, %v385_v42  ;;  %v346_v30 = vsel %vm345_vm9, %v344_v43, %v342_v60  ;;  %v1166_v43 = vld [vmem:[%s2068_s4] ss:$0 sm:$0xff] }
  0xc5   :  { %v390_v40 = vperm.slane %v248_v33, %v351_v56  ;;  %v233_v46 = vmul.f32 0.00390625, %v165_v51  ;;  %v389_v31 = vsel %vm349_vm10, %v388_v54, %v387_v3  ;;  %v350_v48 = vsel %vm349_vm10, %v348_v63, %v346_v30 }
  0xc6   :  { %v352_v50 = vperm.slane %v232_v44, %v351_v56  ;;  %v1165_v44 = vld [vmem:[%s2066_s2] ss:$0 sm:$0xff] }
  0xc7   :  { %v391_v53 = vsel %vm353_vm11, %v390_v40, %v389_v31  ;;  %v356_v17 = vperm.slane %v233_v46, %v355_v47 }
  0xc8   :  { %v354_v51 = vsel %vm353_vm11, %v352_v50, %v350_v48 }
  0xc9   :  { %v358_v15 = vsel %vm357_vm12, %v356_v17, %v354_v51 }
  0xca   :  { %v168_v41 = vpop.xlane.xlu1 %167 }
  0xcb   :  { %v213_v59 = vpop.xlane.xlu0 %212  ;;  %v234_v32 = vmul.f32 0.00390625, %v168_v41 }
  0xcc   :  { %v216_v37 = vpop.xlane.xlu2 %215  ;;  %v249_v61 = vmul.f32 0.00390625, %v213_v59 }
  0xcd   :  { %v250_v24 = vmul.f32 0.00390625, %v216_v37  ;;  %v360_v57 = vperm.slane %v234_v32, %v359_v8  ;;  %v2119_v37 = vlaneseq }
  0xce   :  { %v392_v16 = vperm.slane %v249_v61, %v355_v47 }
  0xcf   :  { %v394_v55 = vperm.slane %v250_v24, %v359_v8  ;;  %v362_v49 = vsel %vm361_vm13, %v360_v57, %v358_v15  ;;  %v1581_v35 = vshrl.u32 %v2119_v37, 7 }
  0xd0   :  { %v393_v62 = vsel %vm357_vm12, %v392_v16, %v391_v53 }
  0xd1   :  { %v395_v26 = vsel %vm361_vm13, %v394_v55, %v393_v62  ;;  %1134 = vset.pattern.permute.xlu1 %v1581_v35  ;;  %1132 = vset.pattern.permute.xlu2 %v1581_v35  ;;  %v464_v45 = vadd.s32 8, %v1581_v35  ;;  %v470_v24 = vadd.s32 16, %v1581_v35  ;;  %v482_v50 = vadd.s32 32, %v1581_v35 }
  0xd2   :  { %v219_v52 = vpop.xlane.xlu1 %218  ;;  %v476_v32 = vadd.s32 24, %v1581_v35  ;;  %v494_v16 = vadd.s32 48, %v1581_v35  ;;  %v488_v30 = vadd.s32 40, %v1581_v35  ;;  %v512_v31 = vadd.s32 72, %v1581_v35 }
  0xd3   :  { %v251_v58 = vmul.f32 0.00390625, %v219_v52  ;;  %v171_v36 = vpop.xlane.xlu0 %170  ;;  %1133 = vset.pattern.permute.xlu0 %v464_v45  ;;  %v500_v48 = vadd.s32 56, %v1581_v35  ;;  %v542_v53 = vadd.s32 112, %v1581_v35  ;;  %v506_v17 = vadd.s32 64, %v1581_v35 }
  0xd4   :  { %v235_v7 = vmul.f32 0.00390625, %v171_v36  ;;  %v518_v55 = vadd.s32 80, %v1581_v35  ;;  %v530_v52 = vadd.s32 96, %v1581_v35  ;;  %v548_v51 = vadd.s32 120, %v1581_v35 }
  0xd5   :  { %v396_v34 = vperm.slane %v251_v58, %v363_v39  ;;  %v536_v57 = vadd.s32 104, %v1581_v35 }
  0xd6   :  { %v364_v25 = vperm.slane %v235_v7, %v363_v39  ;;  %v524_v39 = vadd.s32 88, %v1581_v35 }
  0xd7   :  { %v397_v56 = vsel %vm365_vm14, %v396_v34, %v395_v26 }
  0xd8   :  { %v366_v33 = vsel %vm365_vm14, %v364_v25, %v362_v49 }
  0xd9   :  { %v399_v41 = vsel %vm398_vm15, %v397_v56, %v366_v33 }
  0xda   :  { %417 = vmatmul.f32.vlgmr.msra.gmra.mxu0 %v399_v41 }
 0x157   :  { %v418_v47 = vpop.f32.mrf.mxu0 }
 0x158   :  { %v419_v8 = vadd.f32 %v1165_v44, %v418_v47 }
 0x15a   :  { %v421_v59 = vmax.f32 %v419_v8, 0.0 }
 0x15c   :  { %1126 = vmatmul.msk.f32.vlgmr.msra.gmra.mxu1 %vm427_vm0, %v421_v59 }
 0x1d9   :  { %v448_v61 = vpop.f32.mrf.mxu1 }
 0x1da   :  { %v449_v42 = vadd.f32 %v1166_v43, %v448_v61  ;;  %v831_v43 = vld [vmem:[#allocation6 + $0xf0] sm:$0xff] }
 0x1db   :  { %v863_v61 = vld [vmem:[#allocation6 + $0x1f0] sm:$0xff]  ;;  %875 = vmatpush.msra.mxu2 %v831_v43 }
 0x1dc   :  { %v451_v60 = vmul.f32 0.5, %v449_v42  ;;  %v832_v42 = vld [vmem:[#allocation6 + $0xf8] sm:$0xff]  ;;  %895 = vmatpush.msra.mxu3 %v863_v61 }
 0x1dd   :  { %915 = vmatpush.msrb.mxu1 %v832_v42 }
 0x1de   :  { %1167 = vtanh.f32 %v451_v60 }
 0x1e4   :  { %v1168_v63 = vpop.eup %1167 }
 0x1e5   :  { %v453_v54 = vadd.f32 1.0, %v1168_v63 }
 0x1e7   :  { %v454_v3 = vmul.f32 0.5, %v453_v54 }
 0x1e9   :  { %v1589_v40 = vperm.slane %v454_v3, 0  ;;  %v1591_v46 = vperm.slane %v454_v3, 1  ;;  %v861_v3 = vld [vmem:[#allocation6 + $0x1e0] sm:$0xff] }
 0x1ea   :  { %896 = vmatpush.msra.mxu3 %v861_v3  ;;  %v822_v3 = vld [vmem:[#allocation6 + $0xa8] sm:$0xff] }
 0x1eb   :  { %557 = vperm.xlu1 %1134, %v1591_v46   ;;  %466 = vperm.xlu0 %1133, %v1589_v40  }
 0x1ec   :  { %460 = vperm.xlu2 %1132, %v1589_v40  }
 0x1f3   :  { %1137 = vset.pattern.permute.xlu1 %v470_v24  ;;  %1140 = vset.pattern.permute.xlu0 %v482_v50 }
 0x1f4   :  { %1135 = vset.pattern.permute.xlu2 %v464_v45 }
 0x1fb   :  { %569 = vperm.xlu1 %1137, %v1591_v46   ;;  %484 = vperm.xlu0 %1140, %v1589_v40  }
 0x1fc   :  { %563 = vperm.xlu2 %1135, %v1591_v46  }
 0x203   :  { %1139 = vset.pattern.permute.xlu1 %v476_v32  ;;  %1145 = vset.pattern.permute.xlu0 %v494_v16 }
 0x204   :  { %1136 = vset.pattern.permute.xlu2 %v470_v24 }
 0x20b   :  { %575 = vperm.xlu1 %1139, %v1591_v46   ;;  %593 = vperm.xlu0 %1145, %v1591_v46  }
 0x20c   :  { %472 = vperm.xlu2 %1136, %v1589_v40  }
 0x213   :  { %1142 = vset.pattern.permute.xlu1 %v488_v30  ;;  %1150 = vset.pattern.permute.xlu0 %v512_v31 }
 0x214   :  { %1138 = vset.pattern.permute.xlu2 %v476_v32 }
 0x21b   :  { %490 = vperm.xlu1 %1142, %v1589_v40   ;;  %514 = vperm.xlu0 %1150, %v1589_v40  }
 0x21c   :  { %478 = vperm.xlu2 %1138, %v1589_v40  }
 0x223   :  { %1144 = vset.pattern.permute.xlu1 %v494_v16  ;;  %1155 = vset.pattern.permute.xlu0 %v524_v39 }
 0x224   :  { %1141 = vset.pattern.permute.xlu2 %v482_v50 }
 0x22b   :  { %496 = vperm.xlu1 %1144, %v1589_v40   ;;  %623 = vperm.xlu0 %1155, %v1591_v46  }
 0x22c   :  { %581 = vperm.xlu2 %1141, %v1591_v46  }
 0x233   :  { %1147 = vset.pattern.permute.xlu1 %v500_v48  ;;  %1160 = vset.pattern.permute.xlu0 %v542_v53 }
 0x234   :  { %1143 = vset.pattern.permute.xlu2 %v488_v30 }
 0x23b   :  { %599 = vperm.xlu1 %1147, %v1591_v46   ;;  %544 = vperm.xlu0 %1160, %v1589_v40  }
 0x23c   :  { %587 = vperm.xlu2 %1143, %v1591_v46  }
 0x243   :  { %1149 = vset.pattern.permute.xlu1 %v506_v17  ;;  %1164 = vset.pattern.permute.xlu0 %v548_v51 }
 0x244   :  { %1146 = vset.pattern.permute.xlu2 %v500_v48  ;;  %v828_v48 = vld [vmem:[#allocation6 + $0xd8] sm:$0xff] }
 0x246   :  { %v461_v62 = vpop.permute.xlu2 %460 }
 0x247   :  { %v1664_v35 = vmul.f32 %v461_v62, %v1345_v2  ;;  %v1667_v60 = vmul.f32 %v461_v62, %v1349_v4  ;;  %v830_v4 = vld [vmem:[#allocation6 + $0xe8] sm:$0xff] }
 0x248   :  { %916 = vmatpush.msrb.mxu1 %v830_v4  ;;  %v2124_v4 = vld [vmem:[#allocation15_spill] sm:$0xff] }
 0x24a   :  { %917 = vmatpush.msrb.mxu1 %v828_v48  ;;  %v851_v48 = vld [vmem:[#allocation6 + $0x190] sm:$0xff] }
 0x24b   :  { %605 = vperm.xlu1 %1149, %v1591_v46  }
 0x24c   :  { %502 = vperm.xlu2 %1146, %v1589_v40  }
 0x253   :  { %1152 = vset.pattern.permute.xlu1 %v518_v55 }
 0x254   :  { %1148 = vset.pattern.permute.xlu2 %v506_v17 }
 0x256   :  { %v564_v58 = vpop.permute.xlu2 %563 }
 0x257   :  { %v1696_v30 = vmul.f32 %v564_v58, %v1359_v9  ;;  %v860_v9 = vld [vmem:[#allocation6 + $0x1d8] sm:$0xff] }
 0x25b   :  { %520 = vperm.xlu1 %1152, %v1589_v40  }
 0x25c   :  { %508 = vperm.xlu2 %1148, %v1589_v40  }
 0x25d   :  { %v558_v36 = vpop.permute.xlu1 %557  ;;  %v467_v44 = vpop.permute.xlu0 %466 }
 0x25e   :  { %v1658_v59 = vmul.f32 %v467_v44, %v1363_v11  ;;  %v1661_v37 = vmul.f32 %v467_v44, %v1365_v12  ;;  %v864_v11 = vld [vmem:[#allocation6 + $0x1f8] sm:$0xff]  ;;  %v829_v12 = vld [vmem:[#allocation6 + $0xe0] sm:$0xff]  ;;  %v1688_v50 = vmul.f32 %v558_v36, %v1341_v0  ;;  %v1691_v32 = vmul.f32 %v558_v36, %v1343_v1 }
 0x25f   :  { %935 = vmatpush.msrb.mxu0 %v864_v11  ;;  %876 = vmatpush.msra.mxu2 %v829_v12  ;;  %v1701_v0 = vmul.f32 %v564_v58, %v1361_v10  ;;  %v858_v58 = vld [vmem:[#allocation6 + $0x1c8] sm:$0xff]  ;;  %v824_v44 = vld [vmem:[#allocation6 + $0xb8] sm:$0xff]  ;;  %v821_v11 = vld [vmem:[#allocation6 + $0xa0] sm:$0xff] }
 0x260   :  { %v713_v2 = vadd.f32 %v1658_v59, %v1664_v35  ;;  %v755_v10 = vadd.f32 %v1696_v30, %v1688_v50  ;;  %v853_v12 = vld [vmem:[#allocation6 + $0x1a0] sm:$0xff] }
 0x263   :  { %1154 = vset.pattern.permute.xlu1 %v524_v39  ;;  %v859_v39 = vld [vmem:[#allocation6 + $0x1d0] sm:$0xff] }
 0x264   :  { %1151 = vset.pattern.permute.xlu2 %v512_v31  ;;  %v827_v31 = vld [vmem:[#allocation6 + $0xd0] sm:$0xff]  ;;  %897 = vmatpush.msra.mxu3 %v859_v39 }
 0x265   :  { %877 = vmatpush.msra.mxu2 %v827_v31  ;;  %v2127_v31 = vld [vmem:[#allocation16_spill] sm:$0xff] }
 0x266   :  { %v473_v7 = vpop.permute.xlu2 %472 }
 0x267   :  { %v1670_v63 = vmul.f32 %v473_v7, %v1351_v5  ;;  %v1673_v54 = vmul.f32 %v473_v7, %v1353_v6  ;;  %v734_v5 = vadd.f32 %v1661_v37, %v1667_v60 }
 0x26b   :  { %526 = vperm.xlu1 %1154, %v1589_v40  }
 0x26c   :  { %611 = vperm.xlu2 %1151, %v1591_v46  }
 0x26d   :  { %v570_v34 = vpop.permute.xlu1 %569  ;;  %v485_v45 = vpop.permute.xlu0 %484 }
 0x26e   :  { %v1704_v1 = vmul.f32 %v570_v34, %v1367_v13  ;;  %v776_v13 = vadd.f32 %v1701_v0, %v1691_v32  ;;  %v1722_v36 = vmul.f32 %v485_v45, %v1385_v22  ;;  %v1725_v7 = vmul.f32 %v485_v45, %v1387_v23  ;;  %v856_v23 = vld [vmem:[#allocation6 + $0x1b8] sm:$0xff] }
 0x270   :  { %v756_v43 = vadd.f32 %v755_v10, %v1704_v1  ;;  %v2131_v10 = vld [vmem:[#allocation14_spill] sm:$0xff] }
 0x273   :  { %1157 = vset.pattern.permute.xlu1 %v530_v52 }
 0x274   :  { %1153 = vset.pattern.permute.xlu2 %v518_v55 }
 0x276   :  { %v479_v15 = vpop.permute.xlu2 %478 }
 0x277   :  { %v1682_v6 = vmul.f32 %v479_v15, %v1381_v20  ;;  %v1685_v24 = vmul.f32 %v479_v15, %v1383_v21  ;;  %v714_v20 = vadd.f32 %v713_v2, %v1670_v63  ;;  %v735_v21 = vadd.f32 %v734_v5, %v1673_v54  ;;  %v823_v15 = vld [vmem:[#allocation6 + $0xb0] sm:$0xff] }
 0x279   :  { %v715_v17 = vadd.f32 %v714_v20, %v1682_v6  ;;  %v736_v55 = vadd.f32 %v735_v21, %v1685_v24  ;;  %v2125_v20 = vld [vmem:[#allocation12_spill] sm:$0xff] }
 0x27b   :  { %629 = vperm.xlu1 %1157, %v1591_v46   ;;  %v737_v45 = vadd.f32 %v736_v55, %v1725_v7  ;;  %v2128_v55 = vld [vmem:[#allocation13_spill] sm:$0xff] }
 0x27c   :  { %617 = vperm.xlu2 %1153, %v1591_v46  }
 0x27d   :  { %v1639_v25 = vpop.permute.xlu1 %575  ;;  %v1719_v62 = vpop.permute.xlu0 %593 }
 0x283   :  { %1159 = vset.pattern.permute.xlu1 %v536_v57 }
 0x284   :  { %1156 = vset.pattern.permute.xlu2 %v530_v52  ;;  %v825_v52 = vld [vmem:[#allocation6 + $0xc0] sm:$0xff] }
 0x285   :  { %878 = vmatpush.msra.mxu2 %v825_v52 }
 0x286   :  { %v1641_v26 = vpop.permute.xlu2 %581 }
 0x287   :  { %879 = vmatpush.msra.mxu2 %v823_v15  ;;  %v1748_v2 = vmul.f32 %v1641_v26, %v1399_v29  ;;  %v1759_v21 = vmul.f32 %v1641_v26, %v2125_v20  ;;  %v819_v29 = vld [vmem:[#allocation6 + $0x90] sm:$0xff]  ;;  %v852_v26 = vld [vmem:[#allocation6 + $0x198] sm:$0xff] }
 0x288   :  { %v816_v20 = vld [vmem:[#allocation6 + $0x78] sm:$0xff] }
 0x289   :  { %2123 = vst [vmem:[#allocation25_spill] sm:$0xff] %v1748_v2  ;;  %880 = vmatpush.msra.mxu2 %v821_v11  ;;  %v2134_v11 = vld [vmem:[#allocation19_spill] sm:$0xff] }
 0x28a   :  { %2126 = vst [vmem:[#allocation15_spill] sm:$0xff] %v1759_v21 }
 0x28b   :  { %635 = vperm.xlu1 %1159, %v1591_v46   ;;  %881 = vmatpush.msra.mxu2 %v819_v29 }
 0x28c   :  { %532 = vperm.xlu2 %1156, %v1589_v40  }
 0x28d   :  { %v1643_v49 = vpop.permute.xlu1 %490 }
 0x28e   :  { %v1735_v22 = vmul.f32 %v1643_v49, %v1395_v27 }
 0x293   :  { %1162 = vset.pattern.permute.xlu1 %v548_v51 }
 0x294   :  { %1158 = vset.pattern.permute.xlu2 %v536_v57  ;;  %v826_v57 = vld [vmem:[#allocation6 + $0xc8] sm:$0xff] }
 0x295   :  { %918 = vmatpush.msrb.mxu1 %v826_v57 }
 0x296   :  { %v1645_v56 = vpop.permute.xlu2 %587 }
 0x297   :  { %919 = vmatpush.msrb.mxu1 %v824_v44  ;;  %v1768_v52 = vmul.f32 %v1645_v56, %v2128_v55  ;;  %v849_v44 = vld [vmem:[#allocation6 + $0x180] sm:$0xff] }
 0x299   :  { %920 = vmatpush.msrb.mxu1 %v822_v3  ;;  %2129 = vst [vmem:[#allocation12_spill] sm:$0xff] %v1768_v52  ;;  %v2135_v3 = vld [vmem:[#allocation20_spill] sm:$0xff] }
 0x29b   :  { %550 = vperm.xlu1 %1162, %v1589_v40  }
 0x29c   :  { %538 = vperm.xlu2 %1158, %v1589_v40  }
 0x29d   :  { %v1647_v33 = vpop.permute.xlu1 %496 }
 0x29e   :  { %v1763_v39 = vmul.f32 %v1647_v33, %v2127_v31 }
 0x2a4   :  { %1161 = vset.pattern.permute.xlu2 %v542_v53  ;;  %v1707_v53 = vmul.f32 %v570_v34, %v1369_v14  ;;  %v1717_v14 = vmul.f32 %v1639_v25, %v1377_v18  ;;  %v1729_v34 = vmul.f32 %v1639_v25, %v1379_v19  ;;  %v855_v18 = vld [vmem:[#allocation6 + $0x1b0] sm:$0xff]  ;;  %v1741_v19 = vmul.f32 %v1643_v49, %v1397_v28  ;;  %v854_v49 = vld [vmem:[#allocation6 + $0x1a8] sm:$0xff] }
 0x2a5   :  { %v716_v25 = vadd.f32 %v715_v17, %v1722_v36 }
 0x2a6   :  { %v1649_v41 = vpop.permute.xlu2 %502  ;;  %2120 = vst [vmem:[#allocation22_spill] sm:$0xff] %v1707_v53  ;;  %v777_v61 = vadd.f32 %v776_v13, %v1707_v53  ;;  %v757_v27 = vadd.f32 %v756_v43, %v1717_v14  ;;  %v1777_v13 = vmul.f32 %v1645_v56, %v2131_v10  ;;  %v818_v43 = vld [vmem:[#allocation6 + $0x88] sm:$0xff] }
 0x2a7   :  { %2121 = vst [vmem:[#allocation23_spill] sm:$0xff] %v1717_v14  ;;  %v717_v17 = vadd.f32 %v716_v25, %v1735_v22  ;;  %v850_v56 = vld [vmem:[#allocation6 + $0x188] sm:$0xff] }
 0x2a8   :  { %2122 = vst [vmem:[#allocation24_spill] sm:$0xff] %v1729_v34  ;;  %v778_v5 = vadd.f32 %v777_v61, %v1729_v34  ;;  %v758_v61 = vadd.f32 %v757_v27, %v1748_v2  ;;  %v815_v27 = vld [vmem:[#allocation6 + $0x70] sm:$0xff]  ;;  %v1174_v10 = vld [vmem:[#allocation3 + $0x168] sm:$0xff] }
 0x2a9   :  { %2132 = vst [vmem:[#allocation16_spill] sm:$0xff] %v1777_v13 }
 0x2aa   :  { %v759_v31 = vadd.f32 %v758_v61, %v1768_v52  ;;  %v1189_v52 = vld [vmem:[#allocation3 + $0xd8] sm:$0xff] }
 0x2ac   :  { %641 = vperm.xlu2 %1161, %v1591_v46  }
 0x2ad   :  { %v1651_v38 = vpop.permute.xlu1 %599 }
 0x2b4   :  { %1163 = vset.pattern.permute.xlu2 %v548_v51  ;;  %v857_v51 = vld [vmem:[#allocation6 + $0x1c0] sm:$0xff] }
 0x2b5   :  { %898 = vmatpush.msra.mxu3 %v857_v51  ;;  %v2130_v51 = vld [vmem:[#allocation17_spill] sm:$0xff] }
 0x2b6   :  { %v1653_v47 = vpop.permute.xlu2 %508  ;;  %v1772_v57 = vmul.f32 %v1649_v41, %v2130_v51  ;;  %v813_v51 = vld [vmem:[#allocation6 + $0x60] sm:$0xff] }
 0x2b7   :  { %899 = vmatpush.msra.mxu3 %v855_v18  ;;  %v817_v18 = vld [vmem:[#allocation6 + $0x80] sm:$0xff] }
 0x2b8   :  { %882 = vmatpush.msra.mxu2 %v817_v18  ;;  %v1175_v18 = vld [vmem:[#allocation3 + $0x170] sm:$0xff] }
 0x2b9   :  { %900 = vmatpush.msra.mxu3 %v853_v12 }
 0x2ba   :  { %883 = vmatpush.msra.mxu2 %v815_v27  ;;  %v843_v27 = vld [vmem:[#allocation6 + $0x150] sm:$0xff] }
 0x2bb   :  { %901 = vmatpush.msra.mxu3 %v851_v48 }
 0x2bc   :  { %647 = vperm.xlu2 %1163, %v1591_v46   ;;  %v862_v46 = vld [vmem:[#allocation6 + $0x1e8] sm:$0xff]  ;;  %884 = vmatpush.msra.mxu2 %v813_v51 }
 0x2bd   :  { %v1655_v8 = vpop.permute.xlu1 %605  ;;  %936 = vmatpush.msrb.mxu0 %v862_v46  ;;  %v1752_v46 = vmul.f32 %v1647_v33, %v2124_v4  ;;  %v738_v33 = vadd.f32 %v737_v45, %v1741_v19  ;;  %v1787_v45 = vmul.f32 %v1653_v47, %v2134_v11  ;;  %902 = vmatpush.msra.mxu3 %v849_v44  ;;  %v2139_v11 = vld [vmem:[#allocation21_spill] sm:$0xff] }
 0x2be   :  { %v1793_v4 = vmul.f32 %v1653_v47, %v2135_v3  ;;  %v1808_v44 = vmul.f32 %v1175_v18, %v1651_v38  ;;  %v811_v3 = vld [vmem:[#allocation6 + $0x50] sm:$0xff] }
 0x2bf   :  { %937 = vmatpush.msrb.mxu0 %v860_v9  ;;  %v820_v9 = vld [vmem:[#allocation6 + $0x98] sm:$0xff]  ;;  %v718_v25 = vadd.f32 %v717_v17, %v1752_v46  ;;  %v739_v12 = vadd.f32 %v738_v33, %v1763_v39  ;;  %v814_v33 = vld [vmem:[#allocation6 + $0x68] sm:$0xff]  ;;  %885 = vmatpush.msra.mxu2 %v811_v3 }
 0x2c0   :  { %921 = vmatpush.msrb.mxu1 %v820_v9  ;;  %v1173_v9 = vld [vmem:[#allocation3 + $0x160] sm:$0xff]  ;;  %2138 = vst [vmem:[#allocation14_spill] sm:$0xff] %v1808_v44 }
 0x2c1   :  { %938 = vmatpush.msrb.mxu0 %v858_v58  ;;  %v2133_v58 = vld [vmem:[#allocation18_spill] sm:$0xff]  ;;  %v719_v29 = vadd.f32 %v718_v25, %v1772_v57  ;;  %v1800_v17 = vmul.f32 %v1173_v9, %v1719_v62  ;;  %v846_v25 = vld [vmem:[#allocation6 + $0x168] sm:$0xff]  ;;  %v1178_v9 = vld [vmem:[#allocation3 + $0xa0] sm:$0xff] }
 0x2c2   :  { %v1781_v15 = vmul.f32 %v1649_v41, %v2133_v58  ;;  %v779_v41 = vadd.f32 %v778_v5, %v1759_v21  ;;  %922 = vmatpush.msrb.mxu1 %v818_v43  ;;  %v848_v5 = vld [vmem:[#allocation6 + $0x178] sm:$0xff]  ;;  %v1805_v58 = vmul.f32 %v1174_v10, %v1719_v62  ;;  %v1180_v10 = vld [vmem:[#allocation3 + $0xa8] sm:$0xff]  ;;  %v1190_v21 = vld [vmem:[#allocation3 + $0x1a0] sm:$0xff] }
 0x2c3   :  { %939 = vmatpush.msrb.mxu0 %v856_v23  ;;  %v515_v23 = vpop.permute.xlu0 %514  ;;  %2136 = vst [vmem:[#allocation13_spill] sm:$0xff] %v1800_v17  ;;  %v720_v43 = vadd.f32 %v719_v29, %v1787_v45  ;;  %v1177_v29 = vld [vmem:[#allocation3 + $0x180] sm:$0xff] }
 0x2c4   :  { %v780_v47 = vadd.f32 %v779_v41, %v1777_v13  ;;  %v740_v55 = vadd.f32 %v739_v12, %v1781_v15  ;;  %923 = vmatpush.msrb.mxu1 %v816_v20  ;;  %2137 = vst [vmem:[#allocation17_spill] sm:$0xff] %v1805_v58  ;;  %v1176_v41 = vld [vmem:[#allocation3 + $0x178] sm:$0xff]  ;;  %v760_v20 = vadd.f32 %v759_v31, %v1800_v17  ;;  %v809_v31 = vld [vmem:[#allocation6 + $0x40] sm:$0xff]  ;;  %v1185_v17 = vld [vmem:[#allocation3 + $0xc8] sm:$0xff] }
 0x2c5   :  { %940 = vmatpush.msrb.mxu0 %v854_v49  ;;  %v847_v49 = vld [vmem:[#allocation6 + $0x170] sm:$0xff]  ;;  %v1817_v12 = vmul.f32 %v1176_v41, %v1651_v38  ;;  %v844_v38 = vld [vmem:[#allocation6 + $0x158] sm:$0xff]  ;;  %886 = vmatpush.msra.mxu2 %v809_v31 }
 0x2c6   :  { %v1677_v40 = vpop.permute.xlu2 %611  ;;  %903 = vmatpush.msra.mxu3 %v847_v49  ;;  %v741_v62 = vadd.f32 %v740_v55, %v1793_v4  ;;  %924 = vmatpush.msrb.mxu1 %v814_v33  ;;  %v812_v49 = vld [vmem:[#allocation6 + $0x58] sm:$0xff]  ;;  %v781_v33 = vadd.f32 %v780_v47, %v1805_v58  ;;  %v761_v3 = vadd.f32 %v760_v20, %v1808_v44  ;;  %v842_v47 = vld [vmem:[#allocation6 + $0x148] sm:$0xff]  ;;  %v805_v44 = vld [vmem:[#allocation6 + $0x20] sm:$0xff] }
 0x2c7   :  { %941 = vmatpush.msrb.mxu0 %v852_v26  ;;  %v845_v26 = vld [vmem:[#allocation6 + $0x160] sm:$0xff]  ;;  %2140 = vst [vmem:[#allocation18_spill] sm:$0xff] %v1817_v12  ;;  %v840_v20 = vld [vmem:[#allocation6 + $0x138] sm:$0xff] }
 0x2c8   :  { %904 = vmatpush.msra.mxu3 %v845_v26  ;;  %v1179_v26 = vld [vmem:[#allocation3 + $0x98] sm:$0xff]  ;;  %925 = vmatpush.msrb.mxu1 %v812_v49  ;;  %v782_v49 = vadd.f32 %v781_v33, %v1817_v12  ;;  %v806_v12 = vld [vmem:[#allocation6 + $0x28] sm:$0xff] }
 0x2c9   :  { %942 = vmatpush.msrb.mxu0 %v850_v56  ;;  %v1814_v56 = vmul.f32 %v515_v23, %v2139_v11  ;;  %v1827_v55 = vmul.f32 %v1179_v26, %v515_v23  ;;  %v810_v11 = vld [vmem:[#allocation6 + $0x48] sm:$0xff]  ;;  %v1182_v26 = vld [vmem:[#allocation3 + $0xb8] sm:$0xff] }
 0x2ca   :  { %905 = vmatpush.msra.mxu3 %v843_v27  ;;  %926 = vmatpush.msrb.mxu1 %v810_v11 }
 0x2cb   :  { %943 = vmatpush.msrb.mxu0 %v848_v5  ;;  %v1822_v5 = vmul.f32 %v1177_v29, %v1655_v8  ;;  %v1833_v41 = vpop.permute.xlu0 %623  ;;  %v721_v27 = vadd.f32 %v720_v43, %v1814_v56  ;;  %v1181_v29 = vld [vmem:[#allocation3 + $0xb0] sm:$0xff]  ;;  %v808_v43 = vld [vmem:[#allocation6 + $0x38] sm:$0xff] }
 0x2cc   :  { %927 = vmatpush.msrb.mxu1 %v808_v43 }
 0x2cd   :  { %v1693_v16 = vpop.permute.xlu1 %520  ;;  %944 = vmatpush.msrb.mxu0 %v846_v25  ;;  %2141 = vst [vmem:[#allocation19_spill] sm:$0xff] %v1822_v5  ;;  %v841_v25 = vld [vmem:[#allocation6 + $0x140] sm:$0xff] }
 0x2ce   :  { %v1825_v51 = vmul.f32 %v1178_v9, %v1693_v16  ;;  %v1831_v18 = vmul.f32 %v1180_v10, %v1693_v16  ;;  %906 = vmatpush.msra.mxu3 %v841_v25  ;;  %v807_v16 = vld [vmem:[#allocation6 + $0x30] sm:$0xff]  ;;  %v762_v25 = vadd.f32 %v761_v3, %v1822_v5  ;;  %928 = vmatpush.msrb.mxu1 %v806_v12 }
 0x2cf   :  { %945 = vmatpush.msrb.mxu0 %v844_v38  ;;  %v839_v9 = vld [vmem:[#allocation6 + $0x130] sm:$0xff]  ;;  %v742_v38 = vadd.f32 %v741_v62, %v1827_v55  ;;  %887 = vmatpush.msra.mxu2 %v807_v16  ;;  %v837_v62 = vld [vmem:[#allocation6 + $0x120] sm:$0xff] }
 0x2d0   :  { %v722_v58 = vadd.f32 %v721_v27, %v1825_v51  ;;  %907 = vmatpush.msra.mxu3 %v839_v9  ;;  %v803_v3 = vld [vmem:[#allocation6 + $0x10] sm:$0xff]  ;;  %v1187_v9 = vld [vmem:[#allocation3 + $0x198] sm:$0xff] }
 0x2d1   :  { %946 = vmatpush.msrb.mxu0 %v842_v47  ;;  %v743_v11 = vadd.f32 %v742_v38, %v1831_v18  ;;  %v1184_v47 = vld [vmem:[#allocation3 + $0xc0] sm:$0xff]  ;;  %v835_v27 = vld [vmem:[#allocation6 + $0x110] sm:$0xff]  ;;  %v1861_v5 = vmul.f32 %v1187_v9, %v1677_v40  ;;  %888 = vmatpush.msra.mxu2 %v805_v44 }
 0x2d2   :  { %908 = vmatpush.msra.mxu3 %v837_v62  ;;  %v833_v9 = vld [vmem:[#allocation6 + $0x100] sm:$0xff]  ;;  %v1191_v62 = vld [vmem:[#allocation3 + $0x1a8] sm:$0xff] }
 0x2d3   :  { %947 = vmatpush.msrb.mxu0 %v840_v20  ;;  %2144 = vst [vmem:[#allocation26_spill] sm:$0xff] %v1861_v5  ;;  %v1188_v20 = vld [vmem:[#allocation3 + $0xd0] sm:$0xff]  ;;  %889 = vmatpush.msra.mxu2 %v803_v3 }
 0x2d4   :  { %909 = vmatpush.msra.mxu3 %v835_v27 }
 0x2d6   :  { %v1737_v42 = vpop.permute.xlu2 %617  ;;  %910 = vmatpush.msra.mxu3 %v833_v9  ;;  %v1195_v9 = vld [vmem:[#allocation3 + $0x1b8] sm:$0xff] }
 0x2d7   :  { %v1873_v44 = vmul.f32 %v1190_v21, %v1737_v42  ;;  %v1876_v2 = vmul.f32 %v1191_v62, %v1737_v42  ;;  %v1196_v62 = vld [vmem:[#allocation3 + $0x1c0] sm:$0xff] }
 0x2d9   :  { %2145 = vst [vmem:[#allocation27_spill] sm:$0xff] %v1873_v44 }
 0x2da   :  { %2146 = vst [vmem:[#allocation28_spill] sm:$0xff] %v1876_v2 }
 0x2dd   :  { %v1754_v28 = vpop.permute.xlu1 %526 }
 0x2de   :  { %v1838_v23 = vmul.f32 %v1181_v29, %v1754_v28  ;;  %v1843_v10 = vmul.f32 %v1182_v26, %v1754_v28  ;;  %v1183_v29 = vld [vmem:[#allocation3 + $0x188] sm:$0xff] }
 0x2df   :  { %v1846_v31 = vmul.f32 %v1183_v29, %v1655_v8  ;;  %v838_v28 = vld [vmem:[#allocation6 + $0x128] sm:$0xff]  ;;  %v1186_v29 = vld [vmem:[#allocation3 + $0x190] sm:$0xff] }
 0x2e0   :  { %v1858_v16 = vmul.f32 %v1186_v29, %v1677_v40  ;;  %v723_v38 = vadd.f32 %v722_v58, %v1838_v23  ;;  %v744_v43 = vadd.f32 %v743_v11, %v1843_v10  ;;  %948 = vmatpush.msrb.mxu0 %v838_v28  ;;  %v801_v40 = vld [vmem:[#allocation6] sm:$0xff]  ;;  %v802_v11 = vld [vmem:[#allocation6 + $0x8] sm:$0xff] }
 0x2e1   :  { %2142 = vst [vmem:[#allocation20_spill] sm:$0xff] %v1846_v31  ;;  %v783_v58 = vadd.f32 %v782_v49, %v1846_v31  ;;  %890 = vmatpush.msra.mxu2 %v801_v40 }
 0x2e2   :  { %2143 = vst [vmem:[#allocation21_spill] sm:$0xff] %v1858_v16  ;;  %v763_v49 = vadd.f32 %v762_v25, %v1858_v16  ;;  %v1194_v25 = vld [vmem:[#allocation3 + $0x1b0] sm:$0xff] }
 0x2e3   :  { %v784_v21 = vadd.f32 %v783_v58, %v1861_v5  ;;  %v1891_v40 = vmul.f32 %v1194_v25, %v1833_v41  ;;  %v1894_v58 = vmul.f32 %v1195_v9, %v1833_v41 }
 0x2e4   :  { %v764_v3 = vadd.f32 %v763_v49, %v1873_v44 }
 0x2e5   :  { %v785_v27 = vadd.f32 %v784_v21, %v1876_v2  ;;  %2147 = vst [vmem:[#allocation29_spill] sm:$0xff] %v1891_v40  ;;  %v1200_v2 = vld [vmem:[#allocation3 + $0x1d0] sm:$0xff] }
 0x2e6   :  { %v1797_v48 = vpop.permute.xlu2 %532  ;;  %2148 = vst [vmem:[#allocation30_spill] sm:$0xff] %v1894_v58  ;;  %v765_v9 = vadd.f32 %v764_v3, %v1891_v40 }
 0x2e7   :  { %v1852_v26 = vmul.f32 %v1184_v47, %v1797_v48  ;;  %v1855_v8 = vmul.f32 %v1185_v17, %v1797_v48  ;;  %v804_v48 = vld [vmem:[#allocation6 + $0x18] sm:$0xff] }
 0x2e8   :  { %v836_v17 = vld [vmem:[#allocation6 + $0x118] sm:$0xff]  ;;  %929 = vmatpush.msrb.mxu1 %v804_v48 }
 0x2e9   :  { %v745_v12 = vadd.f32 %v744_v43, %v1855_v8  ;;  %949 = vmatpush.msrb.mxu0 %v836_v17  ;;  %v1193_v17 = vld [vmem:[#allocation3 + $0xe8] sm:$0xff] }
 0x2ea   :  { %930 = vmatpush.msrb.mxu1 %v802_v11 }
 0x2ed   :  { %v1811_v61 = vpop.permute.xlu1 %629 }
 0x2ee   :  { %v1897_v11 = vmul.f32 %v1196_v62, %v1811_v61  ;;  %v786_v62 = vadd.f32 %v785_v27, %v1894_v58  ;;  %v1203_v27 = vld [vmem:[#allocation3 + $0x1e8] sm:$0xff] }
 0x2f0   :  { %2149 = vst [vmem:[#allocation31_spill] sm:$0xff] %v1897_v11 }
 0x2f6   :  { %v539_v33 = vpop.permute.xlu2 %538 }
 0x2f7   :  { %v1867_v13 = vmul.f32 %v1188_v20, %v539_v33  ;;  %v1869_v29 = vmul.f32 %v1189_v52, %v539_v33  ;;  %v834_v20 = vld [vmem:[#allocation6 + $0x108] sm:$0xff]  ;;  %v724_v52 = vadd.f32 %v723_v38, %v1852_v26  ;;  %v545_v33 = vpop.permute.xlu0 %544  ;;  %v1192_v38 = vld [vmem:[#allocation3 + $0xe0] sm:$0xff] }
 0x2f8   :  { %950 = vmatpush.msrb.mxu0 %v834_v20  ;;  %v1886_v48 = vmul.f32 %v1192_v38, %v545_v33  ;;  %v1888_v43 = vmul.f32 %v1193_v17, %v545_v33  ;;  %v1197_v20 = vld [vmem:[#allocation3 + $0x1c8] sm:$0xff]  ;;  %v1198_v33 = vld [vmem:[#allocation3 + $0xf0] sm:$0xff]  ;;  %v1199_v38 = vld [vmem:[#allocation3 + $0xf8] sm:$0xff] }
 0x2f9   :  { %v725_v42 = vadd.f32 %v724_v52, %v1867_v13  ;;  %v746_v28 = vadd.f32 %v745_v12, %v1869_v29  ;;  %v1900_v52 = vmul.f32 %v1197_v20, %v1811_v61  ;;  %v1201_v20 = vld [vmem:[#allocation3 + $0x1d8] sm:$0xff] }
 0x2fb   :  { %2150 = vst [vmem:[#allocation32_spill] sm:$0xff] %v1900_v52  ;;  %v726_v25 = vadd.f32 %v725_v42, %v1886_v48  ;;  %v747_v41 = vadd.f32 %v746_v28, %v1888_v43  ;;  %v766_v42 = vadd.f32 %v765_v9, %v1897_v11  ;;  %v787_v28 = vadd.f32 %v786_v62, %v1900_v52 }
 0x2fd   :  { %v1864_v47 = vpop.permute.xlu1 %635 }
 0x2fe   :  { %v1911_v61 = vmul.f32 %v1200_v2, %v1864_v47  ;;  %v1914_v44 = vmul.f32 %v1201_v20, %v1864_v47 }
 0x300   :  { %2151 = vst [vmem:[#allocation33_spill] sm:$0xff] %v1911_v61  ;;  %v767_v5 = vadd.f32 %v766_v42, %v1911_v61  ;;  %v788_v47 = vadd.f32 %v787_v28, %v1914_v44 }
 0x301   :  { %2152 = vst [vmem:[#allocation34_spill] sm:$0xff] %v1914_v44 }
 0x306   :  { %v642_v49 = vpop.permute.xlu2 %641 }
 0x307   :  { %v1922_v58 = vmul.f32 %v1203_v27, %v642_v49 }
 0x309   :  { %2154 = vst [vmem:[#allocation36_spill] sm:$0xff] %v1922_v58  ;;  %v789_v9 = vadd.f32 %v788_v47, %v1922_v58 }
 0x30d   :  { %v551_v12 = vpop.permute.xlu1 %550 }
 0x30e   :  { %v1902_v21 = vmul.f32 %v1198_v33, %v551_v12  ;;  %v1904_v17 = vmul.f32 %v1199_v38, %v551_v12  ;;  %v1202_v38 = vld [vmem:[#allocation3 + $0x1e0] sm:$0xff] }
 0x30f   :  { %v1920_v3 = vmul.f32 %v1202_v38, %v642_v49  ;;  %v1204_v38 = vld [vmem:[#allocation3 + $0x1f0] sm:$0xff]  ;;  %v1205_v49 = vld [vmem:[#allocation3 + $0x1f8] sm:$0xff] }
 0x310   :  { %v727_v33 = vadd.f32 %v726_v25, %v1902_v21  ;;  %v748_v12 = vadd.f32 %v747_v41, %v1904_v17 }
 0x311   :  { %2153 = vst [vmem:[#allocation35_spill] sm:$0xff] %v1920_v3  ;;  %v768_v41 = vadd.f32 %v767_v5, %v1920_v3 }
 0x312   :  { %v728_v2 = vrot.slane %v727_v33, 4  ;;  %v749_v40 = vrot.slane %v748_v12, 4 }
 0x314   :  { %v729_v20 = vadd.f32 %v728_v2, %v727_v33  ;;  %v750_v25 = vadd.f32 %v749_v40, %v748_v12 }
 0x316   :  { %v648_v11 = vpop.permute.xlu2 %647  ;;  %v730_v62 = vrot.slane %v729_v20, 2  ;;  %v751_v52 = vrot.slane %v750_v25, 2 }
 0x317   :  { %v1928_v16 = vmul.f32 %v1204_v38, %v648_v11  ;;  %v1930_v27 = vmul.f32 %v1205_v49, %v648_v11 }
 0x318   :  { %v731_v28 = vadd.f32 %v730_v62, %v729_v20  ;;  %v752_v33 = vadd.f32 %v751_v52, %v750_v25 }
 0x319   :  { %2155 = vst [vmem:[#allocation37_spill] sm:$0xff] %v1928_v16  ;;  %v769_v31 = vadd.f32 %v768_v41, %v1928_v16  ;;  %v790_v42 = vadd.f32 %v789_v9, %v1930_v27 }
 0x31a   :  { %v732_v3 = vrot.slane %v731_v28, 1  ;;  %v753_v44 = vrot.slane %v752_v33, 1 }
 0x31b   :  { %v770_v40 = vrot.slane %v769_v31, 4  ;;  %v791_v12 = vrot.slane %v790_v42, 4 }
 0x31c   :  { %v733_v34 = vadd.f32 %v732_v3, %v731_v28  ;;  %v754_v11 = vadd.f32 %v753_v44, %v752_v33 }
 0x31d   :  { %v771_v5 = vadd.f32 %v770_v40, %v769_v31  ;;  %v792_v2 = vadd.f32 %v791_v12, %v790_v42 }
 0x31e   :  { %v797_v16 = vmul.f32 0.0078125, %v733_v34  ;;  %v798_v20 = vmul.f32 0.0078125, %v754_v11 }
 0x31f   :  { %v772_v47 = vrot.slane %v771_v5, 2  ;;  %v793_v58 = vrot.slane %v792_v2, 2 }
 0x321   :  { %v773_v61 = vadd.f32 %v772_v47, %v771_v5  ;;  %v794_v38 = vadd.f32 %v793_v58, %v792_v2  ;;  %v866_v58 = vstv %s2070_s6  ;;  %s1288_s6 = smov [#allocation8]  }
 0x322   :  { %s1110_s24 = sshll.u32 %s1288_s6, 4  ;;  %s1111_s24 = int_to_ptr.vmem [resolvable:$true] %s1110_s24 }
 0x323   :  { %v774_v14 = vrot.slane %v773_v61, 1  ;;  %v795_v49 = vrot.slane %v794_v38, 1 }
 0x325   :  { %v775_v53 = vadd.f32 %v774_v14, %v773_v61  ;;  %v796_v41 = vadd.f32 %v795_v49, %v794_v38 }
 0x327   :  { %v799_v9 = vmul.f32 0.0078125, %v775_v53  ;;  %v800_v52 = vmul.f32 0.0078125, %v796_v41 }
 0x329   :  { %v871_v25 = vsel %vm398_vm15, %v799_v9, %v797_v16  ;;  %v872_v31 = vsel %vm398_vm15, %v800_v52, %v798_v20 }
 0x32a   :  { %891 = vmatmul.f32.vlgmr.msra.gmra.mxu2 %v871_v25  ;;  %911 = vmatmul.f32.vlgmr.msra.gmra.mxu3 %v872_v31 }
 0x32b   :  { %931 = vmatmul.f32.vlgmr.msrb.gmra.mxu1 %v871_v25  ;;  %951 = vmatmul.f32.vlgmr.msrb.gmra.mxu0 %v872_v31 }
 0x3a8   :  { %v932_v44 = vpop.f32.mrf.mxu1  ;;  %v952_v14 = vpop.f32.mrf.mxu0 }
 0x3a9   :  { %v933_v3 = vadd.f32 %v932_v44, %v866_v58 }
 0x3ab   :  { %v953_v61 = vadd.f32 %v952_v14, %v933_v3 }
 0x3ad   :  { %v956_v34 = vmul.f32 0.5, %v953_v61  ;;  %v892_v53 = vpop.f32.mrf.mxu2  ;;  %v912_v42 = vpop.f32.mrf.mxu3 }
 0x3ae   :  { %v893_v62 = vadd.f32 %v892_v53, %v866_v58  ;;  %v2158_v53 = vld [vmem:[#allocation24_spill] sm:$0xff] }
 0x3af   :  { %1169 = vtanh.f32 %v956_v34  ;;  %v2157_v34 = vld [vmem:[#allocation23_spill] sm:$0xff] }
 0x3b0   :  { %v913_v16 = vadd.f32 %v912_v42, %v893_v62  ;;  %v2159_v62 = vld [vmem:[#allocation25_spill] sm:$0xff]  ;;  %v2160_v42 = vld [vmem:[#allocation15_spill] sm:$0xff] }
 0x3b2   :  { %v955_v28 = vmul.f32 0.5, %v913_v16  ;;  %v2161_v16 = vld [vmem:[#allocation12_spill] sm:$0xff] }
 0x3b4   :  { %1171 = vtanh.f32 %v955_v28 }
 0x3b5   :  { %v1170_v33 = vpop.eup %1169 }
 0x3b6   :  { %v960_v40 = vadd.f32 1.0, %v1170_v33  ;;  %v2162_v33 = vld [vmem:[#allocation16_spill] sm:$0xff] }
 0x3b8   :  { %v962_v12 = vmul.f32 0.5, %v960_v40 }
 0x3ba   :  { %v1172_v5 = vpop.eup %1171  ;;  %v965_v47 = vrot.slane %v962_v12, 7  ;;  %v2163_v12 = vld [vmem:[#allocation13_spill] sm:$0xff] }
 0x3bb   :  { %v959_v2 = vadd.f32 1.0, %v1172_v5 }
 0x3bd   :  { %v961_v38 = vmul.f32 0.5, %v959_v2  ;;  %v2164_v2 = vld [vmem:[#allocation17_spill] sm:$0xff] }
 0x3bf   :  { %v967_v11 = vsel %vm966_vm1, %v961_v38, %v965_v47 }
 0x3c0   :  { %v970_v49 = vperm.slane %v967_v11, 0  ;;  %v1939_v41 = vperm.slane %v967_v11, 1 }
 0x3c2   :  { %v978_v9 = vmul.f32 %v970_v49, %v1664_v35  ;;  %v979_v20 = vmul.f32 %v1939_v41, %v1667_v60  ;;  %v980_v52 = vmul.f32 %v970_v49, %v1658_v59  ;;  %v981_v25 = vmul.f32 %v1939_v41, %v1661_v37 }
 0x3c3   :  { %v982_v31 = vmul.f32 %v970_v49, %v1670_v63  ;;  %v983_v58 = vmul.f32 %v1939_v41, %v1673_v54  ;;  %v984_v44 = vmul.f32 %v970_v49, %v1682_v6  ;;  %v985_v35 = vmul.f32 %v1939_v41, %v1685_v24 }
 0x3c4   :  { %1042 = vst [vmem:[#allocation8] sm:$0xff] %v978_v9  ;;  %v986_v60 = vmul.f32 %v970_v49, %v1722_v36  ;;  %v987_v59 = vmul.f32 %v1939_v41, %v1725_v7  ;;  %v988_v37 = vmul.f32 %v970_v49, %v1735_v22  ;;  %v989_v63 = vmul.f32 %v1939_v41, %v1741_v19  ;;  %v2167_v9 = vld [vmem:[#allocation19_spill] sm:$0xff] }
 0x3c5   :  { %1043 = vst [vmem:[#allocation8 + $0x8] sm:$0xff] %v979_v20  ;;  %v990_v54 = vmul.f32 %v970_v49, %v1752_v46  ;;  %v991_v6 = vmul.f32 %v1939_v41, %v1763_v39  ;;  %v992_v24 = vmul.f32 %v970_v49, %v1772_v57  ;;  %v993_v36 = vmul.f32 %v1939_v41, %v1781_v15 }
 0x3c6   :  { %1044 = vst [vmem:[#allocation8 + $0x10] sm:$0xff] %v980_v52  ;;  %v994_v7 = vmul.f32 %v970_v49, %v1787_v45  ;;  %v995_v22 = vmul.f32 %v1939_v41, %v1793_v4  ;;  %v996_v19 = vmul.f32 %v970_v49, %v1814_v56  ;;  %v997_v46 = vmul.f32 %v1939_v41, %v1827_v55  ;;  %v2168_v52 = vld [vmem:[#allocation20_spill] sm:$0xff] }
 0x3c7   :  { %1045 = vst [vmem:[#allocation8 + $0x18] sm:$0xff] %v981_v25  ;;  %v998_v39 = vmul.f32 %v970_v49, %v1825_v51  ;;  %v968_v57 = vsel %vm398_vm15, %v961_v38, %v965_v47  ;;  %v999_v15 = vmul.f32 %v1939_v41, %v1831_v18  ;;  %v1000_v45 = vmul.f32 %v970_v49, %v1838_v23  ;;  %v2165_v38 = vld [vmem:[#allocation14_spill] sm:$0xff] }
 0x3c8   :  { %1046 = vst [vmem:[#allocation8 + $0x20] sm:$0xff] %v982_v31  ;;  %v1001_v4 = vmul.f32 %v1939_v41, %v1843_v10  ;;  %v969_v56 = vrot.slane %v968_v57, 1  ;;  %v1002_v55 = vmul.f32 %v970_v49, %v1852_v26  ;;  %v1003_v51 = vmul.f32 %v1939_v41, %v1855_v8  ;;  %v2169_v31 = vld [vmem:[#allocation21_spill] sm:$0xff] }
 0x3c9   :  { %1047 = vst [vmem:[#allocation8 + $0x28] sm:$0xff] %v983_v58  ;;  %v1004_v3 = vmul.f32 %v970_v49, %v1867_v13  ;;  %v1005_v18 = vmul.f32 %v1939_v41, %v1869_v29  ;;  %v1006_v10 = vmul.f32 %v970_v49, %v1886_v48  ;;  %v1007_v26 = vmul.f32 %v1939_v41, %v1888_v43 }
 0x3ca   :  { %1048 = vst [vmem:[#allocation8 + $0x30] sm:$0xff] %v984_v44  ;;  %v1984_v23 = vperm.slane %v969_v56, 0  ;;  %v1987_v14 = vperm.slane %v969_v56, 1  ;;  %v1008_v8 = vmul.f32 %v970_v49, %v1902_v21  ;;  %v1009_v13 = vmul.f32 %v1939_v41, %v1904_v17  ;;  %v2156_v17 = vld [vmem:[#allocation22_spill] sm:$0xff] }
 0x3cb   :  { %1049 = vst [vmem:[#allocation8 + $0x38] sm:$0xff] %v985_v35  ;;  %v2166_v49 = vld [vmem:[#allocation18_spill] sm:$0xff] }
 0x3cc   :  { %1050 = vst [vmem:[#allocation8 + $0x40] sm:$0xff] %v986_v60  ;;  %v1010_v29 = vmul.f32 %v1984_v23, %v1688_v50  ;;  %v1011_v48 = vmul.f32 %v1987_v14, %v1691_v32  ;;  %v1012_v61 = vmul.f32 %v1984_v23, %v1696_v30  ;;  %v1013_v43 = vmul.f32 %v1987_v14, %v1701_v0  ;;  %v2170_v44 = vld [vmem:[#allocation26_spill] sm:$0xff]  ;;  %v2171_v60 = vld [vmem:[#allocation27_spill] sm:$0xff] }
 0x3cd   :  { %1051 = vst [vmem:[#allocation8 + $0x48] sm:$0xff] %v987_v59  ;;  %v1014_v21 = vmul.f32 %v1984_v23, %v1704_v1  ;;  %v1015_v50 = vmul.f32 %v1987_v14, %v2156_v17  ;;  %v1016_v32 = vmul.f32 %v1984_v23, %v2157_v34  ;;  %v1017_v30 = vmul.f32 %v1987_v14, %v2158_v53 }
 0x3ce   :  { %1052 = vst [vmem:[#allocation8 + $0x50] sm:$0xff] %v988_v37  ;;  %v1018_v0 = vmul.f32 %v1984_v23, %v2159_v62  ;;  %v1019_v1 = vmul.f32 %v1987_v14, %v2160_v42  ;;  %v1020_v28 = vmul.f32 %v1984_v23, %v2161_v16  ;;  %v1021_v40 = vmul.f32 %v1987_v14, %v2162_v33  ;;  %v2172_v37 = vld [vmem:[#allocation28_spill] sm:$0xff] }
 0x3cf   :  { %1053 = vst [vmem:[#allocation8 + $0x58] sm:$0xff] %v989_v63  ;;  %v1022_v5 = vmul.f32 %v1984_v23, %v2163_v12  ;;  %v1023_v47 = vmul.f32 %v1987_v14, %v2164_v2  ;;  %v1024_v11 = vmul.f32 %v1984_v23, %v2165_v38  ;;  %v1025_v41 = vmul.f32 %v1987_v14, %v2166_v49 }
 0x3d0   :  { %1054 = vst [vmem:[#allocation8 + $0x60] sm:$0xff] %v990_v54  ;;  %v1026_v20 = vmul.f32 %v1984_v23, %v2167_v9  ;;  %v1027_v25 = vmul.f32 %v1987_v14, %v2168_v52  ;;  %v1028_v58 = vmul.f32 %v1984_v23, %v2169_v31  ;;  %v1029_v35 = vmul.f32 %v1987_v14, %v2170_v44  ;;  %v2173_v54 = vld [vmem:[#allocation29_spill] sm:$0xff] }
 0x3d1   :  { %1055 = vst [vmem:[#allocation8 + $0x68] sm:$0xff] %v991_v6  ;;  %v1030_v59 = vmul.f32 %v1984_v23, %v2171_v60  ;;  %v1031_v63 = vmul.f32 %v1987_v14, %v2172_v37  ;;  %v1032_v6 = vmul.f32 %v1984_v23, %v2173_v54 }
 0x3d2   :  { %1056 = vst [vmem:[#allocation8 + $0x70] sm:$0xff] %v992_v24  ;;  %v2174_v24 = vld [vmem:[#allocation30_spill] sm:$0xff] }
 0x3d3   :  { %1057 = vst [vmem:[#allocation8 + $0x78] sm:$0xff] %v993_v36  ;;  %v1033_v36 = vmul.f32 %v1987_v14, %v2174_v24 }
 0x3d4   :  { %1058 = vst [vmem:[#allocation8 + $0x80] sm:$0xff] %v994_v7  ;;  %v2175_v7 = vld [vmem:[#allocation31_spill] sm:$0xff] }
 0x3d5   :  { %1059 = vst [vmem:[#allocation8 + $0x88] sm:$0xff] %v995_v22  ;;  %v1034_v22 = vmul.f32 %v1984_v23, %v2175_v7 }
 0x3d6   :  { %1060 = vst [vmem:[#allocation8 + $0x90] sm:$0xff] %v996_v19  ;;  %v2176_v19 = vld [vmem:[#allocation32_spill] sm:$0xff] }
 0x3d7   :  { %1061 = vst [vmem:[#allocation8 + $0x98] sm:$0xff] %v997_v46  ;;  %v1035_v46 = vmul.f32 %v1987_v14, %v2176_v19 }
 0x3d8   :  { %1062 = vst [vmem:[#allocation8 + $0xa0] sm:$0xff] %v998_v39  ;;  %v2177_v39 = vld [vmem:[#allocation33_spill] sm:$0xff] }
 0x3d9   :  { %1063 = vst [vmem:[#allocation8 + $0xa8] sm:$0xff] %v999_v15  ;;  %v1036_v57 = vmul.f32 %v1984_v23, %v2177_v39  ;;  %v2178_v15 = vld [vmem:[#allocation34_spill] sm:$0xff] }
 0x3da   :  { %1064 = vst [vmem:[#allocation8 + $0xb0] sm:$0xff] %v1000_v45  ;;  %v1037_v45 = vmul.f32 %v1987_v14, %v2178_v15 }
 0x3db   :  { %1065 = vst [vmem:[#allocation8 + $0xb8] sm:$0xff] %v1001_v4  ;;  %v2179_v4 = vld [vmem:[#allocation35_spill] sm:$0xff] }
 0x3dc   :  { %1066 = vst [vmem:[#allocation8 + $0xc0] sm:$0xff] %v1002_v55  ;;  %v1038_v56 = vmul.f32 %v1984_v23, %v2179_v4  ;;  %v2180_v55 = vld [vmem:[#allocation36_spill] sm:$0xff] }
 0x3dd   :  { %1067 = vst [vmem:[#allocation8 + $0xc8] sm:$0xff] %v1003_v51  ;;  %v1039_v51 = vmul.f32 %v1987_v14, %v2180_v55 }
 0x3de   :  { %1068 = vst [vmem:[#allocation8 + $0xd0] sm:$0xff] %v1004_v3  ;;  %v2181_v3 = vld [vmem:[#allocation37_spill] sm:$0xff] }
 0x3df   :  { %1069 = vst [vmem:[#allocation8 + $0xd8] sm:$0xff] %v1005_v18  ;;  %v1040_v18 = vmul.f32 %v1984_v23, %v2181_v3 }
 0x3e0   :  { %1070 = vst [vmem:[#allocation8 + $0xe0] sm:$0xff] %v1006_v10  ;;  %v1041_v10 = vmul.f32 %v1987_v14, %v1930_v27 }
 0x3e1   :  { %1071 = vst [vmem:[#allocation8 + $0xe8] sm:$0xff] %v1007_v26 }
 0x3e2   :  { %1072 = vst [vmem:[#allocation8 + $0xf0] sm:$0xff] %v1008_v8 }
 0x3e3   :  { %1073 = vst [vmem:[#allocation8 + $0xf8] sm:$0xff] %v1009_v13 }
 0x3e4   :  { %1074 = vst [vmem:[#allocation8 + $0x100] sm:$0xff] %v1010_v29 }
 0x3e5   :  { %1075 = vst [vmem:[#allocation8 + $0x108] sm:$0xff] %v1011_v48 }
 0x3e6   :  { %1076 = vst [vmem:[#allocation8 + $0x110] sm:$0xff] %v1012_v61 }
 0x3e7   :  { %1077 = vst [vmem:[#allocation8 + $0x118] sm:$0xff] %v1013_v43 }
 0x3e8   :  { %1078 = vst [vmem:[#allocation8 + $0x120] sm:$0xff] %v1014_v21 }
 0x3e9   :  { %1079 = vst [vmem:[#allocation8 + $0x128] sm:$0xff] %v1015_v50 }
 0x3ea   :  { %1080 = vst [vmem:[#allocation8 + $0x130] sm:$0xff] %v1016_v32 }
 0x3eb   :  { %1081 = vst [vmem:[#allocation8 + $0x138] sm:$0xff] %v1017_v30 }
 0x3ec   :  { %1082 = vst [vmem:[#allocation8 + $0x140] sm:$0xff] %v1018_v0 }
 0x3ed   :  { %1083 = vst [vmem:[#allocation8 + $0x148] sm:$0xff] %v1019_v1 }
 0x3ee   :  { %1084 = vst [vmem:[#allocation8 + $0x150] sm:$0xff] %v1020_v28 }
 0x3ef   :  { %1085 = vst [vmem:[#allocation8 + $0x158] sm:$0xff] %v1021_v40 }
 0x3f0   :  { %1086 = vst [vmem:[#allocation8 + $0x160] sm:$0xff] %v1022_v5 }
 0x3f1   :  { %1087 = vst [vmem:[#allocation8 + $0x168] sm:$0xff] %v1023_v47 }
 0x3f2   :  { %1088 = vst [vmem:[#allocation8 + $0x170] sm:$0xff] %v1024_v11 }
 0x3f3   :  { %1089 = vst [vmem:[#allocation8 + $0x178] sm:$0xff] %v1025_v41 }
 0x3f4   :  { %1090 = vst [vmem:[#allocation8 + $0x180] sm:$0xff] %v1026_v20 }
 0x3f5   :  { %1091 = vst [vmem:[#allocation8 + $0x188] sm:$0xff] %v1027_v25 }
 0x3f6   :  { %1092 = vst [vmem:[#allocation8 + $0x190] sm:$0xff] %v1028_v58 }
 0x3f7   :  { %1093 = vst [vmem:[#allocation8 + $0x198] sm:$0xff] %v1029_v35 }
 0x3f8   :  { %1094 = vst [vmem:[#allocation8 + $0x1a0] sm:$0xff] %v1030_v59 }
 0x3f9   :  { %1095 = vst [vmem:[#allocation8 + $0x1a8] sm:$0xff] %v1031_v63 }
 0x3fa   :  { %1096 = vst [vmem:[#allocation8 + $0x1b0] sm:$0xff] %v1032_v6 }
 0x3fb   :  { %1097 = vst [vmem:[#allocation8 + $0x1b8] sm:$0xff] %v1033_v36 }
 0x3fc   :  { %1098 = vst [vmem:[#allocation8 + $0x1c0] sm:$0xff] %v1034_v22 }
 0x3fd   :  { %1099 = vst [vmem:[#allocation8 + $0x1c8] sm:$0xff] %v1035_v46 }
 0x3fe   :  { %1100 = vst [vmem:[#allocation8 + $0x1d0] sm:$0xff] %v1036_v57 }
 0x3ff   :  { %1101 = vst [vmem:[#allocation8 + $0x1d8] sm:$0xff] %v1037_v45 }
 0x400   :  { %1102 = vst [vmem:[#allocation8 + $0x1e0] sm:$0xff] %v1038_v56 }
 0x401   :  { %1103 = vst [vmem:[#allocation8 + $0x1e8] sm:$0xff] %v1039_v51 }
 0x402   :  { %1104 = vst [vmem:[#allocation8 + $0x1f0] sm:$0xff] %v1040_v18 }
 0x403   :  { %1105 = vst [vmem:[#allocation8 + $0x1f8] sm:$0xff] %v1041_v10 }
 0x404   :  { %1118 = dma.vmem_to_hbm [thread:$0]  %s1111_s24, 8192, %s1113_s27, [#allocation5], %s1285_s9, %s1285_s9, %s1286_s10  }
 0x405   :  { %1282 = dma.done.wait [#allocation5], 8192  }
 0x406   :  { %1283 = vsyncadd [#allocation5], 4294959104 }
 0x407   :  { %1123 = vsyncpa [#allocation4], 1 }
 0x408   :  { %1124 = vsyncpa [#allocation7], 1 }
 0x409   :  { %1125 = vsyncpa [#allocation5], 1 }

</bundles_post_ra>
